<compile_context>
chip_gen: v7x
topology: tpu7x:2x2x1
jax: 0.10.0
libtpu: 0.0.40
codegen_flags: <defaults>
</compile_context>

<pallas_src>
import functools

import jax
import jax.numpy as jnp
from jax import lax
from jax.experimental import pallas as pl
from jax.experimental.pallas import tpu as pltpu


def _lane_tile(M):
    # pick a fat lane tile (per-grid-step overhead ~0.35us) but keep >=2 grid
    # steps on the big layers so v7x's two TensorCores both get work.
    if M >= 4096 and M % 2048 == 0:
        return 2048
    if M >= 2048 and M % 1024 == 0:
        return 1024
    return M


# --------------------------------------------------------------------------
# Pallas kernel 1: bf16 matmul (f32 accumulate) with fused BN-stats partials
#                  and optional tanh epilogue.
# --------------------------------------------------------------------------
def _mm_kernel(w_ref, x_ref, o_ref, *stats_refs, activation, with_stats):
    # (Cout, K) @ (K, tn) -> (Cout, tn), bf16 inputs, f32 accumulation (MXU native)
    acc = jnp.dot(w_ref[...], x_ref[...], preferred_element_type=jnp.float32)
    if with_stats:
        s_ref, q_ref = stats_refs
        s_ref[...] = jnp.sum(acc, axis=1, keepdims=True)[None]          # (1,Cout,1)
        q_ref[...] = jnp.sum(acc * acc, axis=1, keepdims=True)[None]    # (1,Cout,1)
    if activation == "tanh":
        acc = jnp.tanh(acc)                                             # f32 EUP
    o_ref[...] = acc.astype(o_ref.dtype)


def matmul_fused(w2t, colst, *, with_stats, activation=None):
    Cout, K = w2t.shape
    K2, M = colst.shape
    assert K == K2
    tn = _lane_tile(M)
    grid = (M // tn,)
    G = grid[0]

    out_shape = [jax.ShapeDtypeStruct((Cout, M), jnp.float32)]
    out_specs = [pl.BlockSpec((Cout, tn), lambda i: (0, i))]
    if with_stats:
        out_shape += [jax.ShapeDtypeStruct((G, Cout, 1), jnp.float32)] * 2
        out_specs += [pl.BlockSpec((1, Cout, 1), lambda i: (i, 0, 0))] * 2

    res = pl.pallas_call(
        functools.partial(_mm_kernel, activation=activation, with_stats=with_stats),
        out_shape=tuple(out_shape),
        grid_spec=pltpu.PrefetchScalarGridSpec(
            num_scalar_prefetch=0,
            grid=grid,
            in_specs=[pl.BlockSpec((Cout, K), lambda i: (0, 0)),
                      pl.BlockSpec((K, tn), lambda i: (0, i))],
            out_specs=tuple(out_specs),
        ),
        compiler_params=pltpu.CompilerParams(dimension_semantics=("parallel",)),
    )(w2t, colst)
    if with_stats:
        y, psum, psq = res
        return y, psum, psq
    return res[0] if isinstance(res, (tuple, list)) else res


# --------------------------------------------------------------------------
# Pallas kernel 2: fused per-channel scale/bias + ReLU (BatchNorm apply).
# Channels are rows, N*H*W is on lanes -> lane-dense loads/stores, f32 math,
# bf16 output (feeds the next layer's bf16 matmul anyway).
# --------------------------------------------------------------------------
def _bn_relu_kernel(y_ref, s_ref, b_ref, o_ref):
    y = y_ref[...] * s_ref[...] + b_ref[...]
    o_ref[...] = jnp.maximum(y, 0.0).astype(o_ref.dtype)


def scale_bias_relu(y, scale, bias):
    C, M = y.shape
    return pl.pallas_call(
        _bn_relu_kernel,
        out_shape=jax.ShapeDtypeStruct((C, M), jnp.bfloat16),
        grid_spec=pltpu.PrefetchScalarGridSpec(
            num_scalar_prefetch=0,
            grid=(1,),
            in_specs=[pl.BlockSpec((C, M), lambda i: (0, 0)),
                      pl.BlockSpec((C, 1), lambda i: (0, 0)),
                      pl.BlockSpec((C, 1), lambda i: (0, 0))],
            out_specs=pl.BlockSpec((C, M), lambda i: (0, 0)),
        ),
        compiler_params=pltpu.CompilerParams(dimension_semantics=("arbitrary",)),
    )(y, scale, bias)


# --------------------------------------------------------------------------
# XLA glue: ConvTranspose2d == zero-dilate + pad + regular conv (flipped kernel)
# Everything stays in channels-first (C, N, H, W) and bf16.
# --------------------------------------------------------------------------
def build_colst(x_cnhw, stride, padding, k):
    Cin, N, H, W = x_cnhw.shape
    if stride > 1:
        Hd, Wd = (H - 1) * stride + 1, (W - 1) * stride + 1
        xd = jnp.zeros((Cin, N, Hd, Wd), x_cnhw.dtype)
        xd = xd.at[:, :, ::stride, ::stride].set(x_cnhw)
    else:
        xd = x_cnhw
    pe = k - 1 - padding
    xp = jnp.pad(xd, ((0, 0), (0, 0), (pe, pe), (pe, pe)))
    Hout = (H - 1) * stride - 2 * padding + k
    Wout = (W - 1) * stride - 2 * padding + k
    # rows ordered (kh, kw, ci); cols ordered (n, h, w)
    colst = jnp.concatenate(
        [xp[:, :, kh:kh + Hout, kw:kw + Wout].reshape(Cin, N * Hout * Wout)
         for kh in range(k) for kw in range(k)],
        axis=0,
    )
    return colst, (N, Hout, Wout)


def prep_weight(w):
    # torch ConvTranspose2d weight (Cin, Cout, kH, kW) -> flipped, (Cout, k*k*Cin),
    # rows padded up to a multiple of 8 sublanes, bf16.
    Cin, Cout, k, _ = w.shape
    wf = jnp.flip(w, axis=(2, 3))
    w2t = jnp.transpose(wf, (1, 2, 3, 0)).reshape(Cout, k * k * Cin)
    cpad = max(8, -(-Cout // 8) * 8)
    if cpad != Cout:
        w2t = jnp.pad(w2t, ((0, cpad - Cout), (0, 0)))
    return w2t.astype(jnp.bfloat16), Cout


def bn_scale_bias(psum, psq, gamma, beta, count, eps=1e-5):
    s = jnp.sum(psum, axis=0)                    # (Cout, 1)
    q = jnp.sum(psq, axis=0)                     # (Cout, 1)
    mean = s / count
    var = jnp.maximum(q / count - mean * mean, 0.0)   # clamp f32 cancellation
    scale = gamma[:, None] * lax.rsqrt(var + eps)
    bias = beta[:, None] - mean * scale
    return scale, bias


def generator_forward(x_nchw, params):
    # NCHW -> (C, N, H, W), bf16 activations between layers
    x = jnp.transpose(x_nchw, (1, 0, 2, 3)).astype(jnp.bfloat16)

    for name, stride, pad in [("1", 1, 0), ("2", 2, 1), ("3", 2, 1), ("4", 2, 1)]:
        w = params["w" + name]
        k = w.shape[2]
        colst, (N, Ho, Wo) = build_colst(x, stride, pad, k)
        w2t, Cout = prep_weight(w)
        M = N * Ho * Wo
        y, psum, psq = matmul_fused(w2t, colst, with_stats=True)     # Pallas
        scale, bias = bn_scale_bias(psum, psq, params["g" + name],
                                    params["b" + name], M)
        a = scale_bias_relu(y, scale, bias)                          # Pallas
        x = a.reshape(Cout, N, Ho, Wo)

    # final layer: tanh epilogue, no BN
    w = params["w5"]
    colst, (N, Ho, Wo) = build_colst(x, 2, 1, w.shape[2])
    w2t, Cout = prep_weight(w)                                       # Cout=3 -> padded to 8
    y = matmul_fused(w2t, colst, with_stats=False, activation="tanh")
    out = y[:Cout].reshape(Cout, N, Ho, Wo)
    return jnp.transpose(out, (1, 0, 2, 3))                          # -> NCHW, f32


# --------------------------------------------------------------------------
# Pure-JAX f32 reference (mirrors PyTorch semantics) for validation
# --------------------------------------------------------------------------
def _ref_tconv(x, w, stride, padding):
    k = w.shape[2]
    w_oihw = jnp.transpose(jnp.flip(w, axis=(2, 3)), (1, 0, 2, 3))
    pe = k - 1 - padding
    return lax.conv_general_dilated(
        x, w_oihw, window_strides=(1, 1), padding=[(pe, pe), (pe, pe)],
        lhs_dilation=(stride, stride),
        dimension_numbers=("NCHW", "OIHW", "NCHW"),
        precision=lax.Precision.HIGHEST)


def _ref_bn_relu(x, gamma, beta, eps=1e-5):
    mean = x.mean(axis=(0, 2, 3), keepdims=True)
    var = x.var(axis=(0, 2, 3), keepdims=True)
    xn = (x - mean) / jnp.sqrt(var + eps)
    return jnp.maximum(xn * gamma[None, :, None, None] + beta[None, :, None, None], 0.0)


def reference_forward(x, params):
    x = x.astype(jnp.float32)
    for name, stride, pad in [("1", 1, 0), ("2", 2, 1), ("3", 2, 1), ("4", 2, 1)]:
        x = _ref_tconv(x, params["w" + name], stride, pad)
        x = _ref_bn_relu(x, params["g" + name], params["b" + name])
    return jnp.tanh(_ref_tconv(x, params["w5"], 2, 1))


# --------------------------------------------------------------------------
def init_params(key, z_dim, gf):
    chans = [(z_dim, gf * 8), (gf * 8, gf * 4), (gf * 4, gf * 2), (gf * 2, gf), (gf, 3)]
    params = {}
    keys = jax.random.split(key, 3 * len(chans))
    for i, (cin, cout) in enumerate(chans):
        kw, kg, kb = keys[3 * i], keys[3 * i + 1], keys[3 * i + 2]
        params[f"w{i + 1}"] = 0.02 * jax.random.normal(kw, (cin, cout, 4, 4), jnp.float32)
        if i < 4:  # no BN after the last tconv
            params[f"g{i + 1}"] = 1.0 + 0.02 * jax.random.normal(kg, (cout,), jnp.float32)
            params[f"b{i + 1}"] = 0.1 * jax.random.normal(kb, (cout,), jnp.float32)
    return params


if __name__ == "__main__":
    z_dim, g_feature_num, batch = 16, 8, 2
    key = jax.random.PRNGKey(0)
    kx, kp = jax.random.split(key)

    x = jax.random.normal(kx, (batch, z_dim, 1, 1), jnp.float32)   # latent noise
    params = init_params(kp, z_dim, g_feature_num)

    out = jax.jit(generator_forward)(x, params)
    out = jax.block_until_ready(out)

    ref = reference_forward(x, params)

    assert out.shape == (batch, 3, 64, 64), out.shape
    assert out.dtype == jnp.float32
    assert bool(jnp.all(jnp.isfinite(out)))
    # bf16 matmul inputs (f32 accumulate) vs f32-HIGHEST reference: allow bf16-level error
    max_err = float(jnp.max(jnp.abs(out - ref)))
    assert max_err < 7.5e-2, f"mismatch vs reference: {max_err}"

    print("KERNEL_OK")
</pallas_src>

<mosaic_0001>
module attributes {stable_mosaic.version = 11 : i64} {
  func.func @_bn_relu_kernel(%arg0: i32, %arg1: memref<64x32xf32, #tpu.memory_space<vmem>>, %arg2: memref<64x1xf32, #tpu.memory_space<vmem>>, %arg3: memref<64x1xf32, #tpu.memory_space<vmem>>, %arg4: memref<64x32xbf16, #tpu.memory_space<vmem>>) attributes {dimension_semantics = [#tpu.dimension_semantics<arbitrary>], iteration_bounds = array<i64: 1>, scalar_prefetch = 0 : i64, scratch_operands = 0 : i64, tpu.core_type = #tpu.core_type<tc>, window_params = [{pipeline_mode = #tpu.pipeline_mode<synchronous>, transform_indices = @transform_0, window_bounds = array<i64: 64, 32>}, {pipeline_mode = #tpu.pipeline_mode<synchronous>, transform_indices = @transform_1, window_bounds = array<i64: 64, 1>}, {pipeline_mode = #tpu.pipeline_mode<synchronous>, transform_indices = @transform_2, window_bounds = array<i64: 64, 1>}, {pipeline_mode = #tpu.pipeline_mode<synchronous>, transform_indices = @transform_3, window_bounds = array<i64: 64, 32>}]} {
    %c0 = arith.constant 0 : index
    %c0_0 = arith.constant 0 : index
    %0 = vector.load %arg1[%c0, %c0_0] : memref<64x32xf32, #tpu.memory_space<vmem>>, vector<64x32xf32>
    %c0_1 = arith.constant 0 : index
    %c0_2 = arith.constant 0 : index
    %1 = vector.load %arg2[%c0_1, %c0_2] : memref<64x1xf32, #tpu.memory_space<vmem>>, vector<64x1xf32>
    %2 = vector.broadcast %1 : vector<64x1xf32> to vector<64x32xf32>
    %3 = arith.mulf %0, %2 : vector<64x32xf32>
    %c0_3 = arith.constant 0 : index
    %c0_4 = arith.constant 0 : index
    %4 = vector.load %arg3[%c0_3, %c0_4] : memref<64x1xf32, #tpu.memory_space<vmem>>, vector<64x1xf32>
    %5 = vector.broadcast %4 : vector<64x1xf32> to vector<64x32xf32>
    %6 = arith.addf %3, %5 : vector<64x32xf32>
    %cst = arith.constant 0.000000e+00 : f32
    %7 = vector.broadcast %cst : f32 to vector<64x32xf32>
    %8 = arith.maximumf %6, %7 : vector<64x32xf32>
    %9 = arith.truncf %8 : vector<64x32xf32> to vector<64x32xbf16>
    %c0_5 = arith.constant 0 : index
    %c0_6 = arith.constant 0 : index
    %10 = vector.load %arg4[%c0_5, %c0_6] : memref<64x32xbf16, #tpu.memory_space<vmem>>, vector<64x32xbf16>
    tpu.vector_store %arg4[%c0_5, %c0_6], %9 {strides = array<i32>} : memref<64x32xbf16, #tpu.memory_space<vmem>>, vector<64x32xbf16>,
    return
  }
  func.func @transform_0(%arg0: i32) -> (i32, i32) {
    %c0_i32 = arith.constant 0 : i32
    %c0_i32_0 = arith.constant 0 : i32
    %c0_i32_1 = arith.constant 0 : i32
    return %c0_i32, %c0_i32_0 : i32, i32
  }
  func.func @transform_1(%arg0: i32) -> (i32, i32) {
    %c0_i32 = arith.constant 0 : i32
    %c0_i32_0 = arith.constant 0 : i32
    %c0_i32_1 = arith.constant 0 : i32
    return %c0_i32, %c0_i32_0 : i32, i32
  }
  func.func @transform_2(%arg0: i32) -> (i32, i32) {
    %c0_i32 = arith.constant 0 : i32
    %c0_i32_0 = arith.constant 0 : i32
    %c0_i32_1 = arith.constant 0 : i32
    return %c0_i32, %c0_i32_0 : i32, i32
  }
  func.func @transform_3(%arg0: i32) -> (i32, i32) {
    %c0_i32 = arith.constant 0 : i32
    %c0_i32_0 = arith.constant 0 : i32
    %c0_i32_1 = arith.constant 0 : i32
    return %c0_i32, %c0_i32_0 : i32, i32
  }
}

module attributes {stable_mosaic.version = 11 : i64} {
  func.func @_mm_kernel(%arg0: i32, %arg1: memref<64x256xbf16, #tpu.memory_space<vmem>>, %arg2: memref<256x32xbf16, #tpu.memory_space<vmem>>, %arg3: memref<64x32xf32, #tpu.memory_space<vmem>>, %arg4: memref<1x64x1xf32, #tpu.memory_space<vmem>>, %arg5: memref<1x64x1xf32, #tpu.memory_space<vmem>>) attributes {dimension_semantics = [#tpu.dimension_semantics<parallel>], iteration_bounds = array<i64: 1>, scalar_prefetch = 0 : i64, scratch_operands = 0 : i64, tpu.core_type = #tpu.core_type<tc>, window_params = [{pipeline_mode = #tpu.pipeline_mode<synchronous>, transform_indices = @transform_0, window_bounds = array<i64: 64, 256>}, {transform_indices = @transform_1, window_bounds = array<i64: 256, 32>}, {transform_indices = @transform_2, window_bounds = array<i64: 64, 32>}, {transform_indices = @transform_3, window_bounds = array<i64: 1, 64, 1>}, {transform_indices = @transform_4, window_bounds = array<i64: 1, 64, 1>}]} {
    %c0 = arith.constant 0 : index
    %c0_0 = arith.constant 0 : index
    %0 = vector.load %arg1[%c0, %c0_0] : memref<64x256xbf16, #tpu.memory_space<vmem>>, vector<64x256xbf16>
    %c0_1 = arith.constant 0 : index
    %c0_2 = arith.constant 0 : index
    %1 = vector.load %arg2[%c0_1, %c0_2] : memref<256x32xbf16, #tpu.memory_space<vmem>>, vector<256x32xbf16>
    %cst = arith.constant dense<0.000000e+00> : vector<64x32xf32>
    %2 = tpu.matmul %0, %1, %cst {dimension_numbers = #tpu.dot_dimension_numbers<[1], [0], [0], [1], [0, 0, 1, 1], [], []>} : vector<64x256xbf16>, vector<256x32xbf16>, vector<64x32xf32> -> vector<64x32xf32>
    %cst_3 = arith.constant dense<0.000000e+00> : vector<64xf32>
    %3 = vector.multi_reduction <add>, %2, %cst_3 [1] : vector<64x32xf32> to vector<64xf32>
    %4 = vector.shape_cast %3 : vector<64xf32> to vector<64x1xf32>
    %5 = vector.shape_cast %4 : vector<64x1xf32> to vector<1x64x1xf32>
    %c0_4 = arith.constant 0 : index
    %c0_5 = arith.constant 0 : index
    %c0_6 = arith.constant 0 : index
    %6 = vector.load %arg4[%c0_4, %c0_5, %c0_6] : memref<1x64x1xf32, #tpu.memory_space<vmem>>, vector<1x64x1xf32>
    tpu.vector_store %arg4[%c0_4, %c0_5, %c0_6], %5 {strides = array<i32>} : memref<1x64x1xf32, #tpu.memory_space<vmem>>, vector<1x64x1xf32>,
    %7 = arith.mulf %2, %2 : vector<64x32xf32>
    %cst_7 = arith.constant dense<0.000000e+00> : vector<64xf32>
    %8 = vector.multi_reduction <add>, %7, %cst_7 [1] : vector<64x32xf32> to vector<64xf32>
    %9 = vector.shape_cast %8 : vector<64xf32> to vector<64x1xf32>
    %10 = vector.shape_cast %9 : vector<64x1xf32> to vector<1x64x1xf32>
    %c0_8 = arith.constant 0 : index
    %c0_9 = arith.constant 0 : index
    %c0_10 = arith.constant 0 : index
    %11 = vector.load %arg5[%c0_8, %c0_9, %c0_10] : memref<1x64x1xf32, #tpu.memory_space<vmem>>, vector<1x64x1xf32>
    tpu.vector_store %arg5[%c0_8, %c0_9, %c0_10], %10 {strides = array<i32>} : memref<1x64x1xf32, #tpu.memory_space<vmem>>, vector<1x64x1xf32>,
    %c0_11 = arith.constant 0 : index
    %c0_12 = arith.constant 0 : index
    %12 = vector.load %arg3[%c0_11, %c0_12] : memref<64x32xf32, #tpu.memory_space<vmem>>, vector<64x32xf32>
    tpu.vector_store %arg3[%c0_11, %c0_12], %2 {strides = array<i32>} : memref<64x32xf32, #tpu.memory_space<vmem>>, vector<64x32xf32>,
    return
  }
  func.func @transform_0(%arg0: i32) -> (i32, i32) {
    %c0_i32 = arith.constant 0 : i32
    %c0_i32_0 = arith.constant 0 : i32
    %c0_i32_1 = arith.constant 0 : i32
    return %c0_i32, %c0_i32_0 : i32, i32
  }
  func.func @transform_1(%arg0: i32) -> (i32, i32) {
    %c0_i32 = arith.constant 0 : i32
    %c0_i32_0 = arith.constant 0 : i32
    return %c0_i32, %arg0 : i32, i32
  }
  func.func @transform_2(%arg0: i32) -> (i32, i32) {
    %c0_i32 = arith.constant 0 : i32
    %c0_i32_0 = arith.constant 0 : i32
    return %c0_i32, %arg0 : i32, i32
  }
  func.func @transform_3(%arg0: i32) -> (i32, i32, i32) {
    %c0_i32 = arith.constant 0 : i32
    %c0_i32_0 = arith.constant 0 : i32
    %c0_i32_1 = arith.constant 0 : i32
    return %arg0, %c0_i32, %c0_i32_0 : i32, i32, i32
  }
  func.func @transform_4(%arg0: i32) -> (i32, i32, i32) {
    %c0_i32 = arith.constant 0 : i32
    %c0_i32_0 = arith.constant 0 : i32
    %c0_i32_1 = arith.constant 0 : i32
    return %arg0, %c0_i32, %c0_i32_0 : i32, i32, i32
  }
}

module attributes {stable_mosaic.version = 11 : i64} {
  func.func @_bn_relu_kernel(%arg0: i32, %arg1: memref<32x128xf32, #tpu.memory_space<vmem>>, %arg2: memref<32x1xf32, #tpu.memory_space<vmem>>, %arg3: memref<32x1xf32, #tpu.memory_space<vmem>>, %arg4: memref<32x128xbf16, #tpu.memory_space<vmem>>) attributes {dimension_semantics = [#tpu.dimension_semantics<arbitrary>], iteration_bounds = array<i64: 1>, scalar_prefetch = 0 : i64, scratch_operands = 0 : i64, tpu.core_type = #tpu.core_type<tc>, window_params = [{pipeline_mode = #tpu.pipeline_mode<synchronous>, transform_indices = @transform_0, window_bounds = array<i64: 32, 128>}, {pipeline_mode = #tpu.pipeline_mode<synchronous>, transform_indices = @transform_1, window_bounds = array<i64: 32, 1>}, {pipeline_mode = #tpu.pipeline_mode<synchronous>, transform_indices = @transform_2, window_bounds = array<i64: 32, 1>}, {pipeline_mode = #tpu.pipeline_mode<synchronous>, transform_indices = @transform_3, window_bounds = array<i64: 32, 128>}]} {
    %c0 = arith.constant 0 : index
    %c0_0 = arith.constant 0 : index
    %0 = vector.load %arg1[%c0, %c0_0] : memref<32x128xf32, #tpu.memory_space<vmem>>, vector<32x128xf32>
    %c0_1 = arith.constant 0 : index
    %c0_2 = arith.constant 0 : index
    %1 = vector.load %arg2[%c0_1, %c0_2] : memref<32x1xf32, #tpu.memory_space<vmem>>, vector<32x1xf32>
    %2 = vector.broadcast %1 : vector<32x1xf32> to vector<32x128xf32>
    %3 = arith.mulf %0, %2 : vector<32x128xf32>
    %c0_3 = arith.constant 0 : index
    %c0_4 = arith.constant 0 : index
    %4 = vector.load %arg3[%c0_3, %c0_4] : memref<32x1xf32, #tpu.memory_space<vmem>>, vector<32x1xf32>
    %5 = vector.broadcast %4 : vector<32x1xf32> to vector<32x128xf32>
    %6 = arith.addf %3, %5 : vector<32x128xf32>
    %cst = arith.constant 0.000000e+00 : f32
    %7 = vector.broadcast %cst : f32 to vector<32x128xf32>
    %8 = arith.maximumf %6, %7 : vector<32x128xf32>
    %9 = arith.truncf %8 : vector<32x128xf32> to vector<32x128xbf16>
    %c0_5 = arith.constant 0 : index
    %c0_6 = arith.constant 0 : index
    %10 = vector.load %arg4[%c0_5, %c0_6] : memref<32x128xbf16, #tpu.memory_space<vmem>>, vector<32x128xbf16>
    tpu.vector_store %arg4[%c0_5, %c0_6], %9 {strides = array<i32>} : memref<32x128xbf16, #tpu.memory_space<vmem>>, vector<32x128xbf16>,
    return
  }
  func.func @transform_0(%arg0: i32) -> (i32, i32) {
    %c0_i32 = arith.constant 0 : i32
    %c0_i32_0 = arith.constant 0 : i32
    %c0_i32_1 = arith.constant 0 : i32
    return %c0_i32, %c0_i32_0 : i32, i32
  }
  func.func @transform_1(%arg0: i32) -> (i32, i32) {
    %c0_i32 = arith.constant 0 : i32
    %c0_i32_0 = arith.constant 0 : i32
    %c0_i32_1 = arith.constant 0 : i32
    return %c0_i32, %c0_i32_0 : i32, i32
  }
  func.func @transform_2(%arg0: i32) -> (i32, i32) {
    %c0_i32 = arith.constant 0 : i32
    %c0_i32_0 = arith.constant 0 : i32
    %c0_i32_1 = arith.constant 0 : i32
    return %c0_i32, %c0_i32_0 : i32, i32
  }
  func.func @transform_3(%arg0: i32) -> (i32, i32) {
    %c0_i32 = arith.constant 0 : i32
    %c0_i32_0 = arith.constant 0 : i32
    %c0_i32_1 = arith.constant 0 : i32
    return %c0_i32, %c0_i32_0 : i32, i32
  }
}

module attributes {stable_mosaic.version = 11 : i64} {
  func.func @_mm_kernel(%arg0: i32, %arg1: memref<32x1024xbf16, #tpu.memory_space<vmem>>, %arg2: memref<1024x128xbf16, #tpu.memory_space<vmem>>, %arg3: memref<32x128xf32, #tpu.memory_space<vmem>>, %arg4: memref<1x32x1xf32, #tpu.memory_space<vmem>>, %arg5: memref<1x32x1xf32, #tpu.memory_space<vmem>>) attributes {dimension_semantics = [#tpu.dimension_semantics<parallel>], iteration_bounds = array<i64: 1>, scalar_prefetch = 0 : i64, scratch_operands = 0 : i64, tpu.core_type = #tpu.core_type<tc>, window_params = [{pipeline_mode = #tpu.pipeline_mode<synchronous>, transform_indices = @transform_0, window_bounds = array<i64: 32, 1024>}, {transform_indices = @transform_1, window_bounds = array<i64: 1024, 128>}, {transform_indices = @transform_2, window_bounds = array<i64: 32, 128>}, {transform_indices = @transform_3, window_bounds = array<i64: 1, 32, 1>}, {transform_indices = @transform_4, window_bounds = array<i64: 1, 32, 1>}]} {
    %c0 = arith.constant 0 : index
    %c0_0 = arith.constant 0 : index
    %0 = vector.load %arg1[%c0, %c0_0] : memref<32x1024xbf16, #tpu.memory_space<vmem>>, vector<32x1024xbf16>
    %c0_1 = arith.constant 0 : index
    %c0_2 = arith.constant 0 : index
    %1 = vector.load %arg2[%c0_1, %c0_2] : memref<1024x128xbf16, #tpu.memory_space<vmem>>, vector<1024x128xbf16>
    %cst = arith.constant dense<0.000000e+00> : vector<32x128xf32>
    %2 = tpu.matmul %0, %1, %cst {dimension_numbers = #tpu.dot_dimension_numbers<[1], [0], [0], [1], [0, 0, 1, 1], [], []>} : vector<32x1024xbf16>, vector<1024x128xbf16>, vector<32x128xf32> -> vector<32x128xf32>
    %cst_3 = arith.constant dense<0.000000e+00> : vector<32xf32>
    %3 = vector.multi_reduction <add>, %2, %cst_3 [1] : vector<32x128xf32> to vector<32xf32>
    %4 = vector.shape_cast %3 : vector<32xf32> to vector<32x1xf32>
    %5 = vector.shape_cast %4 : vector<32x1xf32> to vector<1x32x1xf32>
    %c0_4 = arith.constant 0 : index
    %c0_5 = arith.constant 0 : index
    %c0_6 = arith.constant 0 : index
    %6 = vector.load %arg4[%c0_4, %c0_5, %c0_6] : memref<1x32x1xf32, #tpu.memory_space<vmem>>, vector<1x32x1xf32>
    tpu.vector_store %arg4[%c0_4, %c0_5, %c0_6], %5 {strides = array<i32>} : memref<1x32x1xf32, #tpu.memory_space<vmem>>, vector<1x32x1xf32>,
    %7 = arith.mulf %2, %2 : vector<32x128xf32>
    %cst_7 = arith.constant dense<0.000000e+00> : vector<32xf32>
    %8 = vector.multi_reduction <add>, %7, %cst_7 [1] : vector<32x128xf32> to vector<32xf32>
    %9 = vector.shape_cast %8 : vector<32xf32> to vector<32x1xf32>
    %10 = vector.shape_cast %9 : vector<32x1xf32> to vector<1x32x1xf32>
    %c0_8 = arith.constant 0 : index
    %c0_9 = arith.constant 0 : index
    %c0_10 = arith.constant 0 : index
    %11 = vector.load %arg5[%c0_8, %c0_9, %c0_10] : memref<1x32x1xf32, #tpu.memory_space<vmem>>, vector<1x32x1xf32>
    tpu.vector_store %arg5[%c0_8, %c0_9, %c0_10], %10 {strides = array<i32>} : memref<1x32x1xf32, #tpu.memory_space<vmem>>, vector<1x32x1xf32>,
    %c0_11 = arith.constant 0 : index
    %c0_12 = arith.constant 0 : index
    %12 = vector.load %arg3[%c0_11, %c0_12] : memref<32x128xf32, #tpu.memory_space<vmem>>, vector<32x128xf32>
    tpu.vector_store %arg3[%c0_11, %c0_12], %2 {strides = array<i32>} : memref<32x128xf32, #tpu.memory_space<vmem>>, vector<32x128xf32>,
    return
  }
  func.func @transform_0(%arg0: i32) -> (i32, i32) {
    %c0_i32 = arith.constant 0 : i32
    %c0_i32_0 = arith.constant 0 : i32
    %c0_i32_1 = arith.constant 0 : i32
    return %c0_i32, %c0_i32_0 : i32, i32
  }
  func.func @transform_1(%arg0: i32) -> (i32, i32) {
    %c0_i32 = arith.constant 0 : i32
    %c0_i32_0 = arith.constant 0 : i32
    return %c0_i32, %arg0 : i32, i32
  }
  func.func @transform_2(%arg0: i32) -> (i32, i32) {
    %c0_i32 = arith.constant 0 : i32
    %c0_i32_0 = arith.constant 0 : i32
    return %c0_i32, %arg0 : i32, i32
  }
  func.func @transform_3(%arg0: i32) -> (i32, i32, i32) {
    %c0_i32 = arith.constant 0 : i32
    %c0_i32_0 = arith.constant 0 : i32
    %c0_i32_1 = arith.constant 0 : i32
    return %arg0, %c0_i32, %c0_i32_0 : i32, i32, i32
  }
  func.func @transform_4(%arg0: i32) -> (i32, i32, i32) {
    %c0_i32 = arith.constant 0 : i32
    %c0_i32_0 = arith.constant 0 : i32
    %c0_i32_1 = arith.constant 0 : i32
    return %arg0, %c0_i32, %c0_i32_0 : i32, i32, i32
  }
}

module attributes {stable_mosaic.version = 11 : i64} {
  func.func @_mm_kernel(%arg0: i32, %arg1: memref<16x512xbf16, #tpu.memory_space<vmem>>, %arg2: memref<512x512xbf16, #tpu.memory_space<vmem>>, %arg3: memref<16x512xf32, #tpu.memory_space<vmem>>, %arg4: memref<1x16x1xf32, #tpu.memory_space<vmem>>, %arg5: memref<1x16x1xf32, #tpu.memory_space<vmem>>) attributes {dimension_semantics = [#tpu.dimension_semantics<parallel>], iteration_bounds = array<i64: 1>, scalar_prefetch = 0 : i64, scratch_operands = 0 : i64, tpu.core_type = #tpu.core_type<tc>, window_params = [{pipeline_mode = #tpu.pipeline_mode<synchronous>, transform_indices = @transform_0, window_bounds = array<i64: 16, 512>}, {transform_indices = @transform_1, window_bounds = array<i64: 512, 512>}, {transform_indices = @transform_2, window_bounds = array<i64: 16, 512>}, {transform_indices = @transform_3, window_bounds = array<i64: 1, 16, 1>}, {transform_indices = @transform_4, window_bounds = array<i64: 1, 16, 1>}]} {
    %c0 = arith.constant 0 : index
    %c0_0 = arith.constant 0 : index
    %0 = vector.load %arg1[%c0, %c0_0] : memref<16x512xbf16, #tpu.memory_space<vmem>>, vector<16x512xbf16>
    %c0_1 = arith.constant 0 : index
    %c0_2 = arith.constant 0 : index
    %1 = vector.load %arg2[%c0_1, %c0_2] : memref<512x512xbf16, #tpu.memory_space<vmem>>, vector<512x512xbf16>
    %cst = arith.constant dense<0.000000e+00> : vector<16x512xf32>
    %2 = tpu.matmul %0, %1, %cst {dimension_numbers = #tpu.dot_dimension_numbers<[1], [0], [0], [1], [0, 0, 1, 1], [], []>} : vector<16x512xbf16>, vector<512x512xbf16>, vector<16x512xf32> -> vector<16x512xf32>
    %cst_3 = arith.constant dense<0.000000e+00> : vector<16xf32>
    %3 = vector.multi_reduction <add>, %2, %cst_3 [1] : vector<16x512xf32> to vector<16xf32>
    %4 = vector.shape_cast %3 : vector<16xf32> to vector<16x1xf32>
    %5 = vector.shape_cast %4 : vector<16x1xf32> to vector<1x16x1xf32>
    %c0_4 = arith.constant 0 : index
    %c0_5 = arith.constant 0 : index
    %c0_6 = arith.constant 0 : index
    %6 = vector.load %arg4[%c0_4, %c0_5, %c0_6] : memref<1x16x1xf32, #tpu.memory_space<vmem>>, vector<1x16x1xf32>
    tpu.vector_store %arg4[%c0_4, %c0_5, %c0_6], %5 {strides = array<i32>} : memref<1x16x1xf32, #tpu.memory_space<vmem>>, vector<1x16x1xf32>,
    %7 = arith.mulf %2, %2 : vector<16x512xf32>
    %cst_7 = arith.constant dense<0.000000e+00> : vector<16xf32>
    %8 = vector.multi_reduction <add>, %7, %cst_7 [1] : vector<16x512xf32> to vector<16xf32>
    %9 = vector.shape_cast %8 : vector<16xf32> to vector<16x1xf32>
    %10 = vector.shape_cast %9 : vector<16x1xf32> to vector<1x16x1xf32>
    %c0_8 = arith.constant 0 : index
    %c0_9 = arith.constant 0 : index
    %c0_10 = arith.constant 0 : index
    %11 = vector.load %arg5[%c0_8, %c0_9, %c0_10] : memref<1x16x1xf32, #tpu.memory_space<vmem>>, vector<1x16x1xf32>
    tpu.vector_store %arg5[%c0_8, %c0_9, %c0_10], %10 {strides = array<i32>} : memref<1x16x1xf32, #tpu.memory_space<vmem>>, vector<1x16x1xf32>,
    %c0_11 = arith.constant 0 : index
    %c0_12 = arith.constant 0 : index
    %12 = vector.load %arg3[%c0_11, %c0_12] : memref<16x512xf32, #tpu.memory_space<vmem>>, vector<16x512xf32>
    tpu.vector_store %arg3[%c0_11, %c0_12], %2 {strides = array<i32>} : memref<16x512xf32, #tpu.memory_space<vmem>>, vector<16x512xf32>,
    return
  }
  func.func @transform_0(%arg0: i32) -> (i32, i32) {
    %c0_i32 = arith.constant 0 : i32
    %c0_i32_0 = arith.constant 0 : i32
    %c0_i32_1 = arith.constant 0 : i32
    return %c0_i32, %c0_i32_0 : i32, i32
  }
  func.func @transform_1(%arg0: i32) -> (i32, i32) {
    %c0_i32 = arith.constant 0 : i32
    %c0_i32_0 = arith.constant 0 : i32
    return %c0_i32, %arg0 : i32, i32
  }
  func.func @transform_2(%arg0: i32) -> (i32, i32) {
    %c0_i32 = arith.constant 0 : i32
    %c0_i32_0 = arith.constant 0 : i32
    return %c0_i32, %arg0 : i32, i32
  }
  func.func @transform_3(%arg0: i32) -> (i32, i32, i32) {
    %c0_i32 = arith.constant 0 : i32
    %c0_i32_0 = arith.constant 0 : i32
    %c0_i32_1 = arith.constant 0 : i32
    return %arg0, %c0_i32, %c0_i32_0 : i32, i32, i32
  }
  func.func @transform_4(%arg0: i32) -> (i32, i32, i32) {
    %c0_i32 = arith.constant 0 : i32
    %c0_i32_0 = arith.constant 0 : i32
    %c0_i32_1 = arith.constant 0 : i32
    return %arg0, %c0_i32, %c0_i32_0 : i32, i32, i32
  }
}

module attributes {stable_mosaic.version = 11 : i64} {
  func.func @_bn_relu_kernel(%arg0: i32, %arg1: memref<16x512xf32, #tpu.memory_space<vmem>>, %arg2: memref<16x1xf32, #tpu.memory_space<vmem>>, %arg3: memref<16x1xf32, #tpu.memory_space<vmem>>, %arg4: memref<16x512xbf16, #tpu.memory_space<vmem>>) attributes {dimension_semantics = [#tpu.dimension_semantics<arbitrary>], iteration_bounds = array<i64: 1>, scalar_prefetch = 0 : i64, scratch_operands = 0 : i64, tpu.core_type = #tpu.core_type<tc>, window_params = [{pipeline_mode = #tpu.pipeline_mode<synchronous>, transform_indices = @transform_0, window_bounds = array<i64: 16, 512>}, {pipeline_mode = #tpu.pipeline_mode<synchronous>, transform_indices = @transform_1, window_bounds = array<i64: 16, 1>}, {pipeline_mode = #tpu.pipeline_mode<synchronous>, transform_indices = @transform_2, window_bounds = array<i64: 16, 1>}, {pipeline_mode = #tpu.pipeline_mode<synchronous>, transform_indices = @transform_3, window_bounds = array<i64: 16, 512>}]} {
    %c0 = arith.constant 0 : index
    %c0_0 = arith.constant 0 : index
    %0 = vector.load %arg1[%c0, %c0_0] : memref<16x512xf32, #tpu.memory_space<vmem>>, vector<16x512xf32>
    %c0_1 = arith.constant 0 : index
    %c0_2 = arith.constant 0 : index
    %1 = vector.load %arg2[%c0_1, %c0_2] : memref<16x1xf32, #tpu.memory_space<vmem>>, vector<16x1xf32>
    %2 = vector.broadcast %1 : vector<16x1xf32> to vector<16x512xf32>
    %3 = arith.mulf %0, %2 : vector<16x512xf32>
    %c0_3 = arith.constant 0 : index
    %c0_4 = arith.constant 0 : index
    %4 = vector.load %arg3[%c0_3, %c0_4] : memref<16x1xf32, #tpu.memory_space<vmem>>, vector<16x1xf32>
    %5 = vector.broadcast %4 : vector<16x1xf32> to vector<16x512xf32>
    %6 = arith.addf %3, %5 : vector<16x512xf32>
    %cst = arith.constant 0.000000e+00 : f32
    %7 = vector.broadcast %cst : f32 to vector<16x512xf32>
    %8 = arith.maximumf %6, %7 : vector<16x512xf32>
    %9 = arith.truncf %8 : vector<16x512xf32> to vector<16x512xbf16>
    %c0_5 = arith.constant 0 : index
    %c0_6 = arith.constant 0 : index
    %10 = vector.load %arg4[%c0_5, %c0_6] : memref<16x512xbf16, #tpu.memory_space<vmem>>, vector<16x512xbf16>
    tpu.vector_store %arg4[%c0_5, %c0_6], %9 {strides = array<i32>} : memref<16x512xbf16, #tpu.memory_space<vmem>>, vector<16x512xbf16>,
    return
  }
  func.func @transform_0(%arg0: i32) -> (i32, i32) {
    %c0_i32 = arith.constant 0 : i32
    %c0_i32_0 = arith.constant 0 : i32
    %c0_i32_1 = arith.constant 0 : i32
    return %c0_i32, %c0_i32_0 : i32, i32
  }
  func.func @transform_1(%arg0: i32) -> (i32, i32) {
    %c0_i32 = arith.constant 0 : i32
    %c0_i32_0 = arith.constant 0 : i32
    %c0_i32_1 = arith.constant 0 : i32
    return %c0_i32, %c0_i32_0 : i32, i32
  }
  func.func @transform_2(%arg0: i32) -> (i32, i32) {
    %c0_i32 = arith.constant 0 : i32
    %c0_i32_0 = arith.constant 0 : i32
    %c0_i32_1 = arith.constant 0 : i32
    return %c0_i32, %c0_i32_0 : i32, i32
  }
  func.func @transform_3(%arg0: i32) -> (i32, i32) {
    %c0_i32 = arith.constant 0 : i32
    %c0_i32_0 = arith.constant 0 : i32
    %c0_i32_1 = arith.constant 0 : i32
    return %c0_i32, %c0_i32_0 : i32, i32
  }
}

module attributes {stable_mosaic.version = 11 : i64} {
  func.func @_mm_kernel(%arg0: i32, %arg1: memref<8x256xbf16, #tpu.memory_space<vmem>>, %arg2: memref<256x1024xbf16, #tpu.memory_space<vmem>>, %arg3: memref<8x1024xf32, #tpu.memory_space<vmem>>, %arg4: memref<1x8x1xf32, #tpu.memory_space<vmem>>, %arg5: memref<1x8x1xf32, #tpu.memory_space<vmem>>) attributes {dimension_semantics = [#tpu.dimension_semantics<parallel>], iteration_bounds = array<i64: 2>, scalar_prefetch = 0 : i64, scratch_operands = 0 : i64, tpu.core_type = #tpu.core_type<tc>, window_params = [{pipeline_mode = #tpu.pipeline_mode<synchronous>, transform_indices = @transform_0, window_bounds = array<i64: 8, 256>}, {transform_indices = @transform_1, window_bounds = array<i64: 256, 1024>}, {transform_indices = @transform_2, window_bounds = array<i64: 8, 1024>}, {transform_indices = @transform_3, window_bounds = array<i64: 1, 8, 1>}, {transform_indices = @transform_4, window_bounds = array<i64: 1, 8, 1>}]} {
    %c0 = arith.constant 0 : index
    %c0_0 = arith.constant 0 : index
    %0 = vector.load %arg1[%c0, %c0_0] : memref<8x256xbf16, #tpu.memory_space<vmem>>, vector<8x256xbf16>
    %c0_1 = arith.constant 0 : index
    %c0_2 = arith.constant 0 : index
    %1 = vector.load %arg2[%c0_1, %c0_2] : memref<256x1024xbf16, #tpu.memory_space<vmem>>, vector<256x1024xbf16>
    %cst = arith.constant dense<0.000000e+00> : vector<8x1024xf32>
    %2 = tpu.matmul %0, %1, %cst {dimension_numbers = #tpu.dot_dimension_numbers<[1], [0], [0], [1], [0, 0, 1, 1], [], []>} : vector<8x256xbf16>, vector<256x1024xbf16>, vector<8x1024xf32> -> vector<8x1024xf32>
    %cst_3 = arith.constant dense<0.000000e+00> : vector<8xf32>
    %3 = vector.multi_reduction <add>, %2, %cst_3 [1] : vector<8x1024xf32> to vector<8xf32>
    %4 = vector.shape_cast %3 : vector<8xf32> to vector<8x1xf32>
    %5 = vector.shape_cast %4 : vector<8x1xf32> to vector<1x8x1xf32>
    %c0_4 = arith.constant 0 : index
    %c0_5 = arith.constant 0 : index
    %c0_6 = arith.constant 0 : index
    %6 = vector.load %arg4[%c0_4, %c0_5, %c0_6] : memref<1x8x1xf32, #tpu.memory_space<vmem>>, vector<1x8x1xf32>
    tpu.vector_store %arg4[%c0_4, %c0_5, %c0_6], %5 {strides = array<i32>} : memref<1x8x1xf32, #tpu.memory_space<vmem>>, vector<1x8x1xf32>,
    %7 = arith.mulf %2, %2 : vector<8x1024xf32>
    %cst_7 = arith.constant dense<0.000000e+00> : vector<8xf32>
    %8 = vector.multi_reduction <add>, %7, %cst_7 [1] : vector<8x1024xf32> to vector<8xf32>
    %9 = vector.shape_cast %8 : vector<8xf32> to vector<8x1xf32>
    %10 = vector.shape_cast %9 : vector<8x1xf32> to vector<1x8x1xf32>
    %c0_8 = arith.constant 0 : index
    %c0_9 = arith.constant 0 : index
    %c0_10 = arith.constant 0 : index
    %11 = vector.load %arg5[%c0_8, %c0_9, %c0_10] : memref<1x8x1xf32, #tpu.memory_space<vmem>>, vector<1x8x1xf32>
    tpu.vector_store %arg5[%c0_8, %c0_9, %c0_10], %10 {strides = array<i32>} : memref<1x8x1xf32, #tpu.memory_space<vmem>>, vector<1x8x1xf32>,
    %c0_11 = arith.constant 0 : index
    %c0_12 = arith.constant 0 : index
    %12 = vector.load %arg3[%c0_11, %c0_12] : memref<8x1024xf32, #tpu.memory_space<vmem>>, vector<8x1024xf32>
    tpu.vector_store %arg3[%c0_11, %c0_12], %2 {strides = array<i32>} : memref<8x1024xf32, #tpu.memory_space<vmem>>, vector<8x1024xf32>,
    return
  }
  func.func @transform_0(%arg0: i32) -> (i32, i32) {
    %c0_i32 = arith.constant 0 : i32
    %c0_i32_0 = arith.constant 0 : i32
    %c0_i32_1 = arith.constant 0 : i32
    return %c0_i32, %c0_i32_0 : i32, i32
  }
  func.func @transform_1(%arg0: i32) -> (i32, i32) {
    %c0_i32 = arith.constant 0 : i32
    %c0_i32_0 = arith.constant 0 : i32
    return %c0_i32, %arg0 : i32, i32
  }
  func.func @transform_2(%arg0: i32) -> (i32, i32) {
    %c0_i32 = arith.constant 0 : i32
    %c0_i32_0 = arith.constant 0 : i32
    return %c0_i32, %arg0 : i32, i32
  }
  func.func @transform_3(%arg0: i32) -> (i32, i32, i32) {
    %c0_i32 = arith.constant 0 : i32
    %c0_i32_0 = arith.constant 0 : i32
    %c0_i32_1 = arith.constant 0 : i32
    return %arg0, %c0_i32, %c0_i32_0 : i32, i32, i32
  }
  func.func @transform_4(%arg0: i32) -> (i32, i32, i32) {
    %c0_i32 = arith.constant 0 : i32
    %c0_i32_0 = arith.constant 0 : i32
    %c0_i32_1 = arith.constant 0 : i32
    return %arg0, %c0_i32, %c0_i32_0 : i32, i32, i32
  }
}

module attributes {stable_mosaic.version = 11 : i64} {
  func.func @_bn_relu_kernel(%arg0: i32, %arg1: memref<8x2048xf32, #tpu.memory_space<vmem>>, %arg2: memref<8x1xf32, #tpu.memory_space<vmem>>, %arg3: memref<8x1xf32, #tpu.memory_space<vmem>>, %arg4: memref<8x2048xbf16, #tpu.memory_space<vmem>>) attributes {dimension_semantics = [#tpu.dimension_semantics<arbitrary>], iteration_bounds = array<i64: 1>, scalar_prefetch = 0 : i64, scratch_operands = 0 : i64, tpu.core_type = #tpu.core_type<tc>, window_params = [{pipeline_mode = #tpu.pipeline_mode<synchronous>, transform_indices = @transform_0, window_bounds = array<i64: 8, 2048>}, {pipeline_mode = #tpu.pipeline_mode<synchronous>, transform_indices = @transform_1, window_bounds = array<i64: 8, 1>}, {pipeline_mode = #tpu.pipeline_mode<synchronous>, transform_indices = @transform_2, window_bounds = array<i64: 8, 1>}, {pipeline_mode = #tpu.pipeline_mode<synchronous>, transform_indices = @transform_3, window_bounds = array<i64: 8, 2048>}]} {
    %c0 = arith.constant 0 : index
    %c0_0 = arith.constant 0 : index
    %0 = vector.load %arg1[%c0, %c0_0] : memref<8x2048xf32, #tpu.memory_space<vmem>>, vector<8x2048xf32>
    %c0_1 = arith.constant 0 : index
    %c0_2 = arith.constant 0 : index
    %1 = vector.load %arg2[%c0_1, %c0_2] : memref<8x1xf32, #tpu.memory_space<vmem>>, vector<8x1xf32>
    %2 = vector.broadcast %1 : vector<8x1xf32> to vector<8x2048xf32>
    %3 = arith.mulf %0, %2 : vector<8x2048xf32>
    %c0_3 = arith.constant 0 : index
    %c0_4 = arith.constant 0 : index
    %4 = vector.load %arg3[%c0_3, %c0_4] : memref<8x1xf32, #tpu.memory_space<vmem>>, vector<8x1xf32>
    %5 = vector.broadcast %4 : vector<8x1xf32> to vector<8x2048xf32>
    %6 = arith.addf %3, %5 : vector<8x2048xf32>
    %cst = arith.constant 0.000000e+00 : f32
    %7 = vector.broadcast %cst : f32 to vector<8x2048xf32>
    %8 = arith.maximumf %6, %7 : vector<8x2048xf32>
    %9 = arith.truncf %8 : vector<8x2048xf32> to vector<8x2048xbf16>
    %c0_5 = arith.constant 0 : index
    %c0_6 = arith.constant 0 : index
    %10 = vector.load %arg4[%c0_5, %c0_6] : memref<8x2048xbf16, #tpu.memory_space<vmem>>, vector<8x2048xbf16>
    tpu.vector_store %arg4[%c0_5, %c0_6], %9 {strides = array<i32>} : memref<8x2048xbf16, #tpu.memory_space<vmem>>, vector<8x2048xbf16>,
    return
  }
  func.func @transform_0(%arg0: i32) -> (i32, i32) {
    %c0_i32 = arith.constant 0 : i32
    %c0_i32_0 = arith.constant 0 : i32
    %c0_i32_1 = arith.constant 0 : i32
    return %c0_i32, %c0_i32_0 : i32, i32
  }
  func.func @transform_1(%arg0: i32) -> (i32, i32) {
    %c0_i32 = arith.constant 0 : i32
    %c0_i32_0 = arith.constant 0 : i32
    %c0_i32_1 = arith.constant 0 : i32
    return %c0_i32, %c0_i32_0 : i32, i32
  }
  func.func @transform_2(%arg0: i32) -> (i32, i32) {
    %c0_i32 = arith.constant 0 : i32
    %c0_i32_0 = arith.constant 0 : i32
    %c0_i32_1 = arith.constant 0 : i32
    return %c0_i32, %c0_i32_0 : i32, i32
  }
  func.func @transform_3(%arg0: i32) -> (i32, i32) {
    %c0_i32 = arith.constant 0 : i32
    %c0_i32_0 = arith.constant 0 : i32
    %c0_i32_1 = arith.constant 0 : i32
    return %c0_i32, %c0_i32_0 : i32, i32
  }
}

module attributes {stable_mosaic.version = 11 : i64} {
  func.func @_mm_kernel(%arg0: i32, %arg1: memref<8x128xbf16, #tpu.memory_space<vmem>>, %arg2: memref<128x2048xbf16, #tpu.memory_space<vmem>>, %arg3: memref<8x2048xf32, #tpu.memory_space<vmem>>) attributes {dimension_semantics = [#tpu.dimension_semantics<parallel>], iteration_bounds = array<i64: 4>, scalar_prefetch = 0 : i64, scratch_operands = 0 : i64, tpu.core_type = #tpu.core_type<tc>, window_params = [{pipeline_mode = #tpu.pipeline_mode<synchronous>, transform_indices = @transform_0, window_bounds = array<i64: 8, 128>}, {transform_indices = @transform_1, window_bounds = array<i64: 128, 2048>}, {transform_indices = @transform_2, window_bounds = array<i64: 8, 2048>}]} {
    %c0 = arith.constant 0 : index
    %c0_0 = arith.constant 0 : index
    %0 = vector.load %arg1[%c0, %c0_0] : memref<8x128xbf16, #tpu.memory_space<vmem>>, vector<8x128xbf16>
    %c0_1 = arith.constant 0 : index
    %c0_2 = arith.constant 0 : index
    %1 = vector.load %arg2[%c0_1, %c0_2] : memref<128x2048xbf16, #tpu.memory_space<vmem>>, vector<128x2048xbf16>
    %cst = arith.constant dense<0.000000e+00> : vector<8x2048xf32>
    %2 = tpu.matmul %0, %1, %cst {dimension_numbers = #tpu.dot_dimension_numbers<[1], [0], [0], [1], [0, 0, 1, 1], [], []>} : vector<8x128xbf16>, vector<128x2048xbf16>, vector<8x2048xf32> -> vector<8x2048xf32>
    %3 = math.tanh %2 : vector<8x2048xf32>
    %c0_3 = arith.constant 0 : index
    %c0_4 = arith.constant 0 : index
    %4 = vector.load %arg3[%c0_3, %c0_4] : memref<8x2048xf32, #tpu.memory_space<vmem>>, vector<8x2048xf32>
    tpu.vector_store %arg3[%c0_3, %c0_4], %3 {strides = array<i32>} : memref<8x2048xf32, #tpu.memory_space<vmem>>, vector<8x2048xf32>,
    return
  }
  func.func @transform_0(%arg0: i32) -> (i32, i32) {
    %c0_i32 = arith.constant 0 : i32
    %c0_i32_0 = arith.constant 0 : i32
    %c0_i32_1 = arith.constant 0 : i32
    return %c0_i32, %c0_i32_0 : i32, i32
  }
  func.func @transform_1(%arg0: i32) -> (i32, i32) {
    %c0_i32 = arith.constant 0 : i32
    %c0_i32_0 = arith.constant 0 : i32
    return %c0_i32, %arg0 : i32, i32
  }
  func.func @transform_2(%arg0: i32) -> (i32, i32) {
    %c0_i32 = arith.constant 0 : i32
    %c0_i32_0 = arith.constant 0 : i32
    return %c0_i32, %arg0 : i32, i32
  }
}

</mosaic_0001>

<bundles_post_ra>
// kernel: generator_forward.10
= control target key start
LH: loop header
LB: loop body
LE: loop exit
PB: predicated region body
PF: predicated region fallthrough
CT: control target
= control target key end

     0   :  { %v206_v0 = vmov 0   ;;  %vm174_vm0 = vcmask 257024   ;;  %s331_s1 = inlined_call_operand.vmem [shape: f32[64,1], index: 1, kind: input, shape index: {}]   ;;  %s332_s2 = inlined_call_operand.vmem [shape: f32[64,1], index: 2, kind: input, shape index: {}]   ;;  %s333_s0 = inlined_call_operand.vmem [shape: f32[64,32], index: 0, kind: input, shape index: {}]   ;;  %s334_s3 = inlined_call_operand.vmem [shape: bf16[64,32], index: 3, kind: output, shape index: {}]  }
   0x1   :  { %205 = vset.pattern.permute.xlu1 %v206_v0  ;;  %204 = vset.pattern.permute.xlu0 %v206_v0  ;;  %v24_v1 = vld [vmem:[%s331_s1 + $0x10] sm:$0xff]  ;;  %v22_v2 = vld [vmem:[%s331_s1] sm:$0xff]  ;;  %v25_v3 = vld [vmem:[%s331_s1 + $0x18] sm:$0xff] }
   0x2   :  { %42 = vperm.xlu1 %205, %v24_v1   ;;  %32 = vperm.xlu0 %204, %v22_v2   ;;  %v23_v4 = vld [vmem:[%s331_s1 + $0x8] sm:$0xff]  ;;  %v26_v6 = vld [vmem:[%s331_s1 + $0x20] sm:$0xff]  ;;  %v29_v7 = vld [vmem:[%s331_s1 + $0x38] sm:$0xff] }
   0x3   :  { %v27_v5 = vld [vmem:[%s331_s1 + $0x28] sm:$0xff]  ;;  %v28_v8 = vld [vmem:[%s331_s1 + $0x30] sm:$0xff]  ;;  %v78_v10 = vld [vmem:[%s332_s2] sm:$0xff] }
   0x4   :  { %v79_v9 = vld [vmem:[%s332_s2 + $0x8] sm:$0xff]  ;;  %v81_v11 = vld [vmem:[%s332_s2 + $0x18] sm:$0xff]  ;;  %v80_v12 = vld [vmem:[%s332_s2 + $0x10] sm:$0xff] }
   0x5   :  { %v83_v13 = vld [vmem:[%s332_s2 + $0x28] sm:$0xff]  ;;  %v82_v14 = vld [vmem:[%s332_s2 + $0x20] sm:$0xff]  ;;  %v85_v15 = vld [vmem:[%s332_s2 + $0x38] sm:$0xff] }
   0x6   :  { %47 = vperm.xlu1 %205, %v25_v3   ;;  %37 = vperm.xlu0 %204, %v23_v4   ;;  %v84_v16 = vld [vmem:[%s332_s2 + $0x30] sm:$0xff]  ;;  %v14_v23 = vld [vmem:[%s333_s0] sm:$0xff]  ;;  %v15_v24 = vld [vmem:[%s333_s0 + $0x8] sm:$0xff] }
   0x7   :  { %v16_v29 = vld [vmem:[%s333_s0 + $0x10] sm:$0xff]  ;;  %v17_v30 = vld [vmem:[%s333_s0 + $0x18] sm:$0xff]  ;;  %v19_v39 = vld [vmem:[%s333_s0 + $0x28] sm:$0xff] }
   0x8   :  { %v18_v40 = vld [vmem:[%s333_s0 + $0x20] sm:$0xff]  ;;  %v21_v51 = vld [vmem:[%s333_s0 + $0x38] sm:$0xff]  ;;  %v20_v52 = vld [vmem:[%s333_s0 + $0x30] sm:$0xff] }
   0xa   :  { %57 = vperm.xlu1 %205, %v27_v5   ;;  %52 = vperm.xlu0 %204, %v26_v6  }
   0xe   :  { %67 = vperm.xlu1 %205, %v29_v7   ;;  %62 = vperm.xlu0 %204, %v28_v8  }
  0x12   :  { %93 = vperm.xlu1 %205, %v79_v9   ;;  %88 = vperm.xlu0 %204, %v78_v10  }
  0x16   :  { %103 = vperm.xlu1 %205, %v81_v11   ;;  %98 = vperm.xlu0 %204, %v80_v12  }
  0x1a   :  { %113 = vperm.xlu1 %205, %v83_v13   ;;  %108 = vperm.xlu0 %204, %v82_v14  }
  0x1e   :  { %123 = vperm.xlu1 %205, %v85_v15   ;;  %118 = vperm.xlu0 %204, %v84_v16  }
  0x81   :  { %v43_v17 = vpop.permute.xlu1 %42  ;;  %v33_v18 = vpop.permute.xlu0 %32 }
  0x82   :  { %v70_v27 = vmul.f32 %v33_v18, %v14_v23  ;;  %v72_v35 = vmul.f32 %v43_v17, %v16_v29 }
  0x85   :  { %v48_v19 = vpop.permute.xlu1 %47  ;;  %v38_v20 = vpop.permute.xlu0 %37 }
  0x86   :  { %v71_v28 = vmul.f32 %v38_v20, %v15_v24  ;;  %v73_v36 = vmul.f32 %v48_v19, %v17_v30 }
  0x89   :  { %v58_v21 = vpop.permute.xlu1 %57  ;;  %v53_v22 = vpop.permute.xlu0 %52 }
  0x8a   :  { %v75_v47 = vmul.f32 %v58_v21, %v19_v39  ;;  %v74_v48 = vmul.f32 %v53_v22, %v18_v40 }
  0x8d   :  { %v68_v25 = vpop.permute.xlu1 %67  ;;  %v63_v26 = vpop.permute.xlu0 %62 }
  0x8e   :  { %v77_v59 = vmul.f32 %v68_v25, %v21_v51  ;;  %v76_v60 = vmul.f32 %v63_v26, %v20_v52 }
  0x91   :  { %v94_v31 = vpop.permute.xlu1 %93  ;;  %v89_v32 = vpop.permute.xlu0 %88 }
  0x92   :  { %v127_v33 = vadd.f32 %v94_v31, %v71_v28  ;;  %v126_v34 = vadd.f32 %v89_v32, %v70_v27 }
  0x94   :  { %v135_v37 = vmax.f32 %v127_v33, 0.0  ;;  %v134_v38 = vmax.f32 %v126_v34, 0.0 }
  0x95   :  { %v104_v41 = vpop.permute.xlu1 %103  ;;  %v99_v42 = vpop.permute.xlu0 %98 }
  0x96   :  { %v196_v43 = vpack.c.bf16 %v135_v37, %v135_v37  ;;  %v195_v44 = vpack.c.bf16 %v134_v38, %v134_v38  ;;  %v129_v45 = vadd.f32 %v104_v41, %v73_v36  ;;  %v128_v46 = vadd.f32 %v99_v42, %v72_v35 }
  0x98   :  { %176 = vst.msk [vmem:[%s334_s3 + $0x4] sm:$0xf] %vm174_vm0, %v196_v43  ;;  %175 = vst.msk [vmem:[%s334_s3] sm:$0xf] %vm174_vm0, %v195_v44  ;;  %v137_v49 = vmax.f32 %v129_v45, 0.0  ;;  %v136_v50 = vmax.f32 %v128_v46, 0.0 }
  0x99   :  { %v114_v53 = vpop.permute.xlu1 %113  ;;  %v109_v54 = vpop.permute.xlu0 %108 }
  0x9a   :  { %v198_v55 = vpack.c.bf16 %v137_v49, %v137_v49  ;;  %v197_v56 = vpack.c.bf16 %v136_v50, %v136_v50  ;;  %v131_v57 = vadd.f32 %v114_v53, %v75_v47  ;;  %v130_v58 = vadd.f32 %v109_v54, %v74_v48 }
  0x9c   :  { %178 = vst.msk [vmem:[%s334_s3 + $0xc] sm:$0xf] %vm174_vm0, %v198_v55  ;;  %177 = vst.msk [vmem:[%s334_s3 + $0x8] sm:$0xf] %vm174_vm0, %v197_v56  ;;  %v139_v61 = vmax.f32 %v131_v57, 0.0  ;;  %v138_v62 = vmax.f32 %v130_v58, 0.0 }
  0x9d   :  { %v124_v63 = vpop.permute.xlu1 %123  ;;  %v119_v0 = vpop.permute.xlu0 %118 }
  0x9e   :  { %v200_v1 = vpack.c.bf16 %v139_v61, %v139_v61  ;;  %v199_v2 = vpack.c.bf16 %v138_v62, %v138_v62  ;;  %v133_v3 = vadd.f32 %v124_v63, %v77_v59  ;;  %v132_v4 = vadd.f32 %v119_v0, %v76_v60 }
  0xa0   :  { %180 = vst.msk [vmem:[%s334_s3 + $0x14] sm:$0xf] %vm174_vm0, %v200_v1  ;;  %179 = vst.msk [vmem:[%s334_s3 + $0x10] sm:$0xf] %vm174_vm0, %v199_v2  ;;  %v141_v5 = vmax.f32 %v133_v3, 0.0  ;;  %v140_v6 = vmax.f32 %v132_v4, 0.0 }
  0xa2   :  { %v202_v7 = vpack.c.bf16 %v141_v5, %v141_v5  ;;  %v201_v8 = vpack.c.bf16 %v140_v6, %v140_v6 }
  0xa4   :  { %182 = vst.msk [vmem:[%s334_s3 + $0x1c] sm:$0xf] %vm174_vm0, %v202_v7  ;;  %181 = vst.msk [vmem:[%s334_s3 + $0x18] sm:$0xf] %vm174_vm0, %v201_v8 }

// kernel: generator_forward.9
= control target key start
LH: loop header
LB: loop body
LE: loop exit
PB: predicated region body
PF: predicated region fallthrough
CT: control target
= control target key end

     0   :  { %vm256_vm0 = vcmask 261120   ;;  %vm281_vm1 = vcmask 7168   ;;  %s667_s1 = inlined_call_operand.vmem [shape: bf16[256,32], index: 1, kind: input, shape index: {}]   ;;  %s668_s0 = inlined_call_operand.vmem [shape: bf16[64,256], index: 0, kind: input, shape index: {}]   ;;  %s669_s2 = inlined_call_operand.vmem [shape: f32[64,32], index: 2, kind: output, shape index: {0}]   ;;  %s670_s3 = inlined_call_operand.vmem [shape: f32[1,64,1], index: 3, kind: output, shape index: {1}]   ;;  %s671_s4 = inlined_call_operand.vmem [shape: f32[1,64,1], index: 4, kind: output, shape index: {2}]  }
   0x1   :  { %v430_v0 = vld [vmem:[%s667_s1 + $0x40] sm:$0xff]   ;;  %v432_v2 = vld [vmem:[%s667_s1 + $0x48] sm:$0xff]   ;;  %v434_v4 = vld [vmem:[%s667_s1 + $0x50] sm:$0xff]  }
   0x2   :  { %v431_v1 = vld [vmem:[%s667_s1] sm:$0xff]   ;;  %374 = vmatprep.subr.bf16.mxu0 %v430_v0  ;;  %414 = vmatprep.subr.bf16.mxu1 %v430_v0  ;;  %v433_v3 = vld [vmem:[%s667_s1 + $0x8] sm:$0xff]   ;;  %v435_v5 = vld [vmem:[%s667_s1 + $0x10] sm:$0xff]  }
   0x3   :  { %375 = vmatpush3.bf16.msra.mxu0 %v431_v1  ;;  %422 = vmatpush3.bf16.msra.mxu1 %v431_v1  ;;  %v436_v6 = vld [vmem:[%s667_s1 + $0x58] sm:$0xff]   ;;  %v438_v8 = vld [vmem:[%s667_s1 + $0x60] sm:$0xff]   ;;  %v440_v10 = vld [vmem:[%s667_s1 + $0x68] sm:$0xff]  }
   0x4   :  { %376 = vmatprep.subr.bf16.mxu0 %v432_v2  ;;  %415 = vmatprep.subr.bf16.mxu1 %v432_v2  ;;  %v437_v7 = vld [vmem:[%s667_s1 + $0x18] sm:$0xff]   ;;  %v439_v9 = vld [vmem:[%s667_s1 + $0x20] sm:$0xff]   ;;  %v441_v13 = vld [vmem:[%s667_s1 + $0x28] sm:$0xff]  }
   0x5   :  { %v448_v11 = vld [vmem:[%s668_s0 + $0x4] ss:$8 sps:$4 sm:$0xff]   ;;  %v442_v14 = vld [vmem:[%s667_s1 + $0x70] sm:$0xff]   ;;  %v444_v16 = vld [vmem:[%s667_s1 + $0x78] sm:$0xff]  }
   0x6   :  { %v451_v12 = vld [vmem:[%s668_s0 + $0x24] ss:$8 sps:$4 sm:$0xff]   ;;  %223 = vmatprep.mubr.bf16.mxu0 %v448_v11  ;;  %v443_v15 = vld [vmem:[%s667_s1 + $0x30] sm:$0xff]   ;;  %v445_v17 = vld [vmem:[%s667_s1 + $0x38] sm:$0xff]  }
   0x7   :  { %377 = vmatpush3.bf16.msra.mxu0 %v433_v3  ;;  %423 = vmatpush3.bf16.msra.mxu1 %v433_v3  ;;  %v446_v18 = vld [vmem:[%s668_s0] ss:$8 sps:$4 sm:$0xff]   ;;  %v452_v20 = vld [vmem:[%s668_s0 + $0x14] ss:$8 sps:$4 sm:$0xff]   ;;  %v454_v22 = vld [vmem:[%s668_s0 + $0x10] ss:$8 sps:$4 sm:$0xff]  }
   0x8   :  { %378 = vmatprep.subr.bf16.mxu0 %v434_v4  ;;  %416 = vmatprep.subr.bf16.mxu1 %v434_v4  ;;  %v449_v19 = vld [vmem:[%s668_s0 + $0x20] ss:$8 sps:$4 sm:$0xff]   ;;  %v455_v21 = vld [vmem:[%s668_s0 + $0x34] ss:$8 sps:$4 sm:$0xff]   ;;  %v457_v23 = vld [vmem:[%s668_s0 + $0x30] ss:$8 sps:$4 sm:$0xff]  }
   0x9   :  { %239 = vmatprep.mubr.bf16.mxu1 %v451_v12 }
   0xb   :  { %379 = vmatpush3.bf16.msra.mxu0 %v435_v5  ;;  %424 = vmatpush3.bf16.msra.mxu1 %v435_v5 }
   0xc   :  { %380 = vmatprep.subr.bf16.mxu0 %v436_v6  ;;  %417 = vmatprep.subr.bf16.mxu1 %v436_v6 }
   0xf   :  { %381 = vmatpush3.bf16.msra.mxu0 %v437_v7  ;;  %425 = vmatpush3.bf16.msra.mxu1 %v437_v7 }
  0x10   :  { %382 = vmatprep.subr.bf16.mxu0 %v438_v8  ;;  %418 = vmatprep.subr.bf16.mxu1 %v438_v8 }
  0x13   :  { %383 = vmatpush3.bf16.msra.mxu0 %v439_v9  ;;  %426 = vmatpush3.bf16.msra.mxu1 %v439_v9 }
  0x14   :  { %384 = vmatprep.subr.bf16.mxu0 %v440_v10  ;;  %419 = vmatprep.subr.bf16.mxu1 %v440_v10 }
  0x17   :  { %385 = vmatpush3.bf16.msra.mxu0 %v441_v13  ;;  %427 = vmatpush3.bf16.msra.mxu1 %v441_v13 }
  0x18   :  { %386 = vmatprep.subr.bf16.mxu0 %v442_v14  ;;  %420 = vmatprep.subr.bf16.mxu1 %v442_v14 }
  0x1b   :  { %387 = vmatpush3.bf16.msra.mxu0 %v443_v15  ;;  %428 = vmatpush3.bf16.msra.mxu1 %v443_v15 }
  0x1c   :  { %388 = vmatprep.subr.bf16.mxu0 %v444_v16  ;;  %421 = vmatprep.subr.bf16.mxu1 %v444_v16 }
  0x1f   :  { %389 = vmatpush3.bf16.msra.mxu0 %v445_v17  ;;  %429 = vmatpush3.bf16.msra.mxu1 %v445_v17 }
  0x22   :  { %224 = vmatmul.mubr.bf16.vlgmr.msra.gmra.mrb[0].mxu0 %v446_v18  ;;  %240 = vmatmul.mubr.bf16.vlgmr.msra.gmra.mrb[0].mxu1 %v449_v19 }
  0x23   :  { %231 = vmatprep.mubr.bf16.mxu0 %v452_v20  ;;  %247 = vmatprep.mubr.bf16.mxu1 %v455_v21 }
  0x2a   :  { %232 = vmatmul.mubr.bf16.gmra.mrb[4].mxu0 %v454_v22  ;;  %248 = vmatmul.mubr.bf16.gmra.mrb[4].mxu1 %v457_v23 }
  0xf5   :  { %v390_v24 = vpop.f32.mrb[0].mxu0  ;;  %v402_v25 = vpop.f32.mrb[0].mxu1 }
  0xf6   :  { %v391_v26 = vpop.f32.mrb[1].mxu0  ;;  %v403_v27 = vpop.f32.mrb[1].mxu1 }
  0xf7   :  { %v392_v28 = vadd.f32 %v391_v26, %v390_v24  ;;  %v404_v29 = vadd.f32 %v403_v27, %v402_v25  ;;  %v393_v30 = vpop.f32.mrb[2].mxu0  ;;  %v405_v31 = vpop.f32.mrb[2].mxu1 }
  0xf8   :  { %v394_v32 = vpop.f32.mrb[3].mxu0  ;;  %v406_v33 = vpop.f32.mrb[3].mxu1 }
  0xf9   :  { %330 = vst.msk [vmem:[%s669_s2] sm:$0xff] %vm256_vm0, %v392_v28  ;;  %334 = vst.msk [vmem:[%s669_s2 + $0x20] sm:$0xff] %vm256_vm0, %v404_v29  ;;  %v395_v34 = vadd.f32 %v394_v32, %v393_v30  ;;  %v407_v35 = vadd.f32 %v406_v33, %v405_v31  ;;  %v257_v36 = vsel %vm256_vm0, %v392_v28, 0.0  ;;  %v269_v39 = vsel %vm256_vm0, %v404_v29, 0.0 }
  0xfa   :  { %258 = vadd.xlane.f32.xlu0 %v257_v36  ;;  %v290_v54 = vmul.f32 %v392_v28, %v392_v28  ;;  %v294_v59 = vmul.f32 %v404_v29, %v404_v29 }
  0xfb   :  { %331 = vst.msk [vmem:[%s669_s2 + $0x8] sm:$0xff] %vm256_vm0, %v395_v34  ;;  %335 = vst.msk [vmem:[%s669_s2 + $0x28] sm:$0xff] %vm256_vm0, %v407_v35  ;;  %v272_v37 = vsel %vm256_vm0, %v407_v35, 0.0  ;;  %v291_v38 = vmul.f32 %v395_v34, %v395_v34  ;;  %v295_v47 = vmul.f32 %v407_v35, %v407_v35  ;;  %v260_v52 = vsel %vm256_vm0, %v395_v34, 0.0 }
  0xfc   :  { %273 = vadd.xlane.f32.xlu1 %v272_v37  ;;  %v298_v57 = vsel %vm256_vm0, %v290_v54, 0.0  ;;  %v310_v60 = vsel %vm256_vm0, %v294_v59, 0.0 }
  0xfd   :  { %v396_v40 = vpop.f32.mrb[4].mxu0  ;;  %v408_v41 = vpop.f32.mrb[4].mxu1  ;;  %v301_v44 = vsel %vm256_vm0, %v291_v38, 0.0  ;;  %v313_v56 = vsel %vm256_vm0, %v295_v47, 0.0 }
  0xfe   :  { %270 = vadd.xlane.f32.xlu0 %v269_v39  ;;  %v397_v42 = vpop.f32.mrb[5].mxu0  ;;  %v409_v43 = vpop.f32.mrb[5].mxu1 }
  0xff   :  { %v398_v45 = vadd.f32 %v397_v42, %v396_v40  ;;  %v399_v46 = vpop.f32.mrb[6].mxu0  ;;  %v410_v48 = vadd.f32 %v409_v43, %v408_v41  ;;  %v411_v49 = vpop.f32.mrb[6].mxu1 }
 0x100   :  { %302 = vadd.xlane.f32.xlu1 %v301_v44  ;;  %v400_v50 = vpop.f32.mrb[7].mxu0  ;;  %v412_v51 = vpop.f32.mrb[7].mxu1 }
 0x101   :  { %332 = vst.msk [vmem:[%s669_s2 + $0x10] sm:$0xff] %vm256_vm0, %v398_v45  ;;  %v401_v53 = vadd.f32 %v400_v50, %v399_v46  ;;  %336 = vst.msk [vmem:[%s669_s2 + $0x30] sm:$0xff] %vm256_vm0, %v410_v48  ;;  %v413_v55 = vadd.f32 %v412_v51, %v411_v49  ;;  %v263_v58 = vsel %vm256_vm0, %v398_v45, 0.0  ;;  %v275_v62 = vsel %vm256_vm0, %v410_v48, 0.0 }
 0x102   :  { %261 = vadd.xlane.f32.xlu0 %v260_v52  ;;  %v292_v63 = vmul.f32 %v398_v45, %v398_v45  ;;  %v296_v3 = vmul.f32 %v410_v48, %v410_v48 }
 0x103   :  { %333 = vst.msk [vmem:[%s669_s2 + $0x18] sm:$0xff] %vm256_vm0, %v401_v53  ;;  %337 = vst.msk [vmem:[%s669_s2 + $0x38] sm:$0xff] %vm256_vm0, %v413_v55  ;;  %v266_v61 = vsel %vm256_vm0, %v401_v53, 0.0  ;;  %v278_v0 = vsel %vm256_vm0, %v413_v55, 0.0  ;;  %v293_v1 = vmul.f32 %v401_v53, %v401_v53  ;;  %v297_v5 = vmul.f32 %v413_v55, %v413_v55 }
 0x104   :  { %314 = vadd.xlane.f32.xlu1 %v313_v56  ;;  %v304_v2 = vsel %vm256_vm0, %v292_v63, 0.0  ;;  %v316_v6 = vsel %vm256_vm0, %v296_v3, 0.0 }
 0x105   :  { %v307_v4 = vsel %vm256_vm0, %v293_v1, 0.0  ;;  %v319_v7 = vsel %vm256_vm0, %v297_v5, 0.0 }
 0x106   :  { %299 = vadd.xlane.f32.xlu0 %v298_v57 }
 0x108   :  { %264 = vadd.xlane.f32.xlu1 %v263_v58 }
 0x10a   :  { %311 = vadd.xlane.f32.xlu0 %v310_v60 }
 0x10c   :  { %267 = vadd.xlane.f32.xlu1 %v266_v61 }
 0x10e   :  { %276 = vadd.xlane.f32.xlu0 %v275_v62 }
 0x110   :  { %279 = vadd.xlane.f32.xlu1 %v278_v0 }
 0x112   :  { %305 = vadd.xlane.f32.xlu0 %v304_v2 }
 0x114   :  { %308 = vadd.xlane.f32.xlu1 %v307_v4 }
 0x116   :  { %317 = vadd.xlane.f32.xlu0 %v316_v6 }
 0x118   :  { %320 = vadd.xlane.f32.xlu1 %v319_v7 }
 0x187   :  { %v259_v8 = vpop.xlane.xlu0 %258 }
 0x188   :  { %282 = vst.msk [vmem:[%s670_s3] sm:$0xff] %vm281_vm1, %v259_v8 }
 0x189   :  { %v274_v9 = vpop.xlane.xlu1 %273 }
 0x18a   :  { %287 = vst.msk [vmem:[%s670_s3 + $0x28] sm:$0xff] %vm281_vm1, %v274_v9 }
 0x18b   :  { %v271_v10 = vpop.xlane.xlu0 %270 }
 0x18c   :  { %286 = vst.msk [vmem:[%s670_s3 + $0x20] sm:$0xff] %vm281_vm1, %v271_v10 }
 0x18d   :  { %v303_v11 = vpop.xlane.xlu1 %302 }
 0x18e   :  { %323 = vst.msk [vmem:[%s671_s4 + $0x8] sm:$0xff] %vm281_vm1, %v303_v11 }
 0x18f   :  { %v262_v12 = vpop.xlane.xlu0 %261 }
 0x190   :  { %283 = vst.msk [vmem:[%s670_s3 + $0x8] sm:$0xff] %vm281_vm1, %v262_v12 }
 0x191   :  { %v315_v13 = vpop.xlane.xlu1 %314 }
 0x192   :  { %327 = vst.msk [vmem:[%s671_s4 + $0x28] sm:$0xff] %vm281_vm1, %v315_v13 }
 0x193   :  { %v300_v14 = vpop.xlane.xlu0 %299 }
 0x194   :  { %322 = vst.msk [vmem:[%s671_s4] sm:$0xff] %vm281_vm1, %v300_v14 }
 0x195   :  { %v265_v15 = vpop.xlane.xlu1 %264 }
 0x196   :  { %284 = vst.msk [vmem:[%s670_s3 + $0x10] sm:$0xff] %vm281_vm1, %v265_v15 }
 0x197   :  { %v312_v16 = vpop.xlane.xlu0 %311 }
 0x198   :  { %326 = vst.msk [vmem:[%s671_s4 + $0x20] sm:$0xff] %vm281_vm1, %v312_v16 }
 0x199   :  { %v268_v17 = vpop.xlane.xlu1 %267 }
 0x19a   :  { %285 = vst.msk [vmem:[%s670_s3 + $0x18] sm:$0xff] %vm281_vm1, %v268_v17 }
 0x19b   :  { %v277_v18 = vpop.xlane.xlu0 %276 }
 0x19c   :  { %288 = vst.msk [vmem:[%s670_s3 + $0x30] sm:$0xff] %vm281_vm1, %v277_v18 }
 0x19d   :  { %v280_v19 = vpop.xlane.xlu1 %279 }
 0x19e   :  { %289 = vst.msk [vmem:[%s670_s3 + $0x38] sm:$0xff] %vm281_vm1, %v280_v19 }
 0x19f   :  { %v306_v20 = vpop.xlane.xlu0 %305 }
 0x1a0   :  { %324 = vst.msk [vmem:[%s671_s4 + $0x10] sm:$0xff] %vm281_vm1, %v306_v20 }
 0x1a1   :  { %v309_v21 = vpop.xlane.xlu1 %308 }
 0x1a2   :  { %325 = vst.msk [vmem:[%s671_s4 + $0x18] sm:$0xff] %vm281_vm1, %v309_v21 }
 0x1a3   :  { %v318_v22 = vpop.xlane.xlu0 %317 }
 0x1a4   :  { %328 = vst.msk [vmem:[%s671_s4 + $0x30] sm:$0xff] %vm281_vm1, %v318_v22 }
 0x1a5   :  { %v321_v23 = vpop.xlane.xlu1 %320 }
 0x1a6   :  { %329 = vst.msk [vmem:[%s671_s4 + $0x38] sm:$0xff] %vm281_vm1, %v321_v23 }

// kernel: generator_forward.12
= control target key start
LH: loop header
LB: loop body
LE: loop exit
PB: predicated region body
PF: predicated region fallthrough
CT: control target
= control target key end

     0   :  { %v124_v0 = vmov 0   ;;  %s187_s1 = inlined_call_operand.vmem [shape: f32[32,1], index: 1, kind: input, shape index: {}]   ;;  %s188_s2 = inlined_call_operand.vmem [shape: f32[32,1], index: 2, kind: input, shape index: {}]   ;;  %s189_s0 = inlined_call_operand.vmem [shape: f32[32,128], index: 0, kind: input, shape index: {}]   ;;  %s190_s3 = inlined_call_operand.vmem [shape: bf16[32,128], index: 3, kind: output, shape index: {}]  }
   0x1   :  { %123 = vset.pattern.permute.xlu1 %v124_v0  ;;  %122 = vset.pattern.permute.xlu0 %v124_v0  ;;  %v20_v1 = vld [vmem:[%s187_s1 + $0x10] sm:$0xff]  ;;  %v18_v2 = vld [vmem:[%s187_s1] sm:$0xff]  ;;  %v21_v3 = vld [vmem:[%s187_s1 + $0x18] sm:$0xff] }
   0x2   :  { %34 = vperm.xlu1 %123, %v20_v1   ;;  %24 = vperm.xlu0 %122, %v18_v2   ;;  %v19_v4 = vld [vmem:[%s187_s1 + $0x8] sm:$0xff]  ;;  %v46_v6 = vld [vmem:[%s188_s2] sm:$0xff]  ;;  %v49_v7 = vld [vmem:[%s188_s2 + $0x18] sm:$0xff] }
   0x3   :  { %v47_v5 = vld [vmem:[%s188_s2 + $0x8] sm:$0xff]  ;;  %v48_v8 = vld [vmem:[%s188_s2 + $0x10] sm:$0xff]  ;;  %v14_v11 = vld [vmem:[%s189_s0] sm:$0xff] }
   0x4   :  { %v15_v14 = vld [vmem:[%s189_s0 + $0x8] sm:$0xff]  ;;  %v16_v17 = vld [vmem:[%s189_s0 + $0x10] sm:$0xff]  ;;  %v17_v18 = vld [vmem:[%s189_s0 + $0x18] sm:$0xff] }
   0x6   :  { %39 = vperm.xlu1 %123, %v21_v3   ;;  %29 = vperm.xlu0 %122, %v19_v4  }
   0xa   :  { %57 = vperm.xlu1 %123, %v47_v5   ;;  %52 = vperm.xlu0 %122, %v46_v6  }
   0xe   :  { %67 = vperm.xlu1 %123, %v49_v7   ;;  %62 = vperm.xlu0 %122, %v48_v8  }
  0x81   :  { %v35_v9 = vpop.permute.xlu1 %34  ;;  %v25_v10 = vpop.permute.xlu0 %24 }
  0x82   :  { %v42_v15 = vmul.f32 %v25_v10, %v14_v11  ;;  %v44_v23 = vmul.f32 %v35_v9, %v16_v17 }
  0x85   :  { %v40_v12 = vpop.permute.xlu1 %39  ;;  %v30_v13 = vpop.permute.xlu0 %29 }
  0x86   :  { %v43_v16 = vmul.f32 %v30_v13, %v15_v14  ;;  %v45_v24 = vmul.f32 %v40_v12, %v17_v18 }
  0x89   :  { %v58_v19 = vpop.permute.xlu1 %57  ;;  %v53_v20 = vpop.permute.xlu0 %52 }
  0x8a   :  { %v71_v21 = vadd.f32 %v58_v19, %v43_v16  ;;  %v70_v22 = vadd.f32 %v53_v20, %v42_v15 }
  0x8c   :  { %v75_v25 = vmax.f32 %v71_v21, 0.0  ;;  %v74_v26 = vmax.f32 %v70_v22, 0.0 }
  0x8d   :  { %v68_v27 = vpop.permute.xlu1 %67  ;;  %v63_v28 = vpop.permute.xlu0 %62 }
  0x8e   :  { %v113_v29 = vpack.c.bf16 %v75_v25, %v74_v26  ;;  %v73_v30 = vadd.f32 %v68_v27, %v45_v24  ;;  %v72_v31 = vadd.f32 %v63_v28, %v44_v23 }
  0x90   :  { %114 = vst [vmem:[%s190_s3] sm:$0xff] %v113_v29   ;;  %v77_v32 = vmax.f32 %v73_v30, 0.0  ;;  %v76_v33 = vmax.f32 %v72_v31, 0.0 }
  0x92   :  { %v118_v34 = vpack.c.bf16 %v77_v32, %v76_v33 }
  0x94   :  { %120 = vst [vmem:[%s190_s3 + $0x8] sm:$0xff] %v118_v34  }

// kernel: generator_forward.11
= control target key start
LH: loop header
LB: loop body
LE: loop exit
PB: predicated region body
PF: predicated region fallthrough
CT: control target
= control target key end

     0   :  { %vm827_vm0 = vcmask 7168   ;;  %s1429_s1 = inlined_call_operand.vmem [shape: bf16[1024,128], index: 1, kind: input, shape index: {}]   ;;  %s1430_s0 = inlined_call_operand.vmem [shape: bf16[32,1024], index: 0, kind: input, shape index: {}]   ;;  %s1431_s2 = inlined_call_operand.vmem [shape: f32[32,128], index: 2, kind: output, shape index: {0}]   ;;  %s1432_s3 = inlined_call_operand.vmem [shape: f32[1,32,1], index: 3, kind: output, shape index: {1}]   ;;  %s1433_s4 = inlined_call_operand.vmem [shape: f32[1,32,1], index: 4, kind: output, shape index: {2}]  }
   0x1   :  { %v1056_v0 = vld [vmem:[%s1429_s1 + $0x40] sm:$0xff]   ;;  %v1060_v4 = vld [vmem:[%s1429_s1 + $0x48] sm:$0xff]   ;;  %v1064_v8 = vld [vmem:[%s1429_s1 + $0x50] sm:$0xff]  }
   0x2   :  { %v1057_v1 = vld [vmem:[%s1429_s1 + $0xc0] sm:$0xff]   ;;  %944 = vmatprep.subr.bf16.mxu0 %v1056_v0  ;;  %v1061_v5 = vld [vmem:[%s1429_s1 + $0xc8] sm:$0xff]   ;;  %v1065_v9 = vld [vmem:[%s1429_s1 + $0xd0] sm:$0xff]  }
   0x3   :  { %v1058_v2 = vld [vmem:[%s1429_s1] sm:$0xff]   ;;  %972 = vmatprep.subr.bf16.mxu1 %v1057_v1  ;;  %v1062_v6 = vld [vmem:[%s1429_s1 + $0x8] sm:$0xff]   ;;  %v1066_v10 = vld [vmem:[%s1429_s1 + $0x10] sm:$0xff]  }
   0x4   :  { %v1059_v3 = vld [vmem:[%s1429_s1 + $0x80] sm:$0xff]   ;;  %945 = vmatpush3.bf16.msra.mxu0 %v1058_v2  ;;  %v1063_v7 = vld [vmem:[%s1429_s1 + $0x88] sm:$0xff]   ;;  %v1067_v11 = vld [vmem:[%s1429_s1 + $0x90] sm:$0xff]  }
   0x5   :  { %973 = vmatpush3.bf16.msra.mxu1 %v1059_v3  ;;  %946 = vmatprep.subr.bf16.mxu0 %v1060_v4  ;;  %v1068_v12 = vld [vmem:[%s1429_s1 + $0x58] sm:$0xff]   ;;  %v1072_v16 = vld [vmem:[%s1429_s1 + $0x60] sm:$0xff]   ;;  %v1076_v20 = vld [vmem:[%s1429_s1 + $0x68] sm:$0xff]  }
   0x6   :  { %974 = vmatprep.subr.bf16.mxu1 %v1061_v5  ;;  %v1069_v13 = vld [vmem:[%s1429_s1 + $0xd8] sm:$0xff]   ;;  %v1073_v17 = vld [vmem:[%s1429_s1 + $0xe0] sm:$0xff]   ;;  %v1077_v21 = vld [vmem:[%s1429_s1 + $0xe8] sm:$0xff]  }
   0x7   :  { %v1070_v14 = vld [vmem:[%s1429_s1 + $0x18] sm:$0xff]   ;;  %v1074_v18 = vld [vmem:[%s1429_s1 + $0x20] sm:$0xff]   ;;  %v1078_v22 = vld [vmem:[%s1429_s1 + $0x28] sm:$0xff]  }
   0x8   :  { %947 = vmatpush3.bf16.msra.mxu0 %v1062_v6  ;;  %v1071_v15 = vld [vmem:[%s1429_s1 + $0x98] sm:$0xff]   ;;  %v1075_v19 = vld [vmem:[%s1429_s1 + $0xa0] sm:$0xff]   ;;  %v1079_v23 = vld [vmem:[%s1429_s1 + $0xa8] sm:$0xff]  }
   0x9   :  { %975 = vmatpush3.bf16.msra.mxu1 %v1063_v7  ;;  %948 = vmatprep.subr.bf16.mxu0 %v1064_v8  ;;  %v1080_v24 = vld [vmem:[%s1429_s1 + $0x70] sm:$0xff]   ;;  %v1084_v28 = vld [vmem:[%s1429_s1 + $0x78] sm:$0xff]   ;;  %v15_v32 = vld [vmem:[%s1430_s0] sm:$0xff] }
   0xa   :  { %976 = vmatprep.subr.bf16.mxu1 %v1065_v9  ;;  %v1081_v25 = vld [vmem:[%s1429_s1 + $0xf0] sm:$0xff]   ;;  %v1085_v29 = vld [vmem:[%s1429_s1 + $0xf8] sm:$0xff]   ;;  %v19_v33 = vld [vmem:[%s1430_s0 + $0x20] sm:$0xff] }
   0xb   :  { %v1082_v26 = vld [vmem:[%s1429_s1 + $0x30] sm:$0xff]   ;;  %v1086_v30 = vld [vmem:[%s1429_s1 + $0x38] sm:$0xff]   ;;  %v16_v34 = vld [vmem:[%s1430_s0 + $0x8] sm:$0xff]  ;;  %v864_v35 = vcombine.low %v15_v32, %v19_v33  ;;  %v865_v36 = vcombine.high %v15_v32, %v19_v33 }
   0xc   :  { %949 = vmatpush3.bf16.msra.mxu0 %v1066_v10  ;;  %v1083_v27 = vld [vmem:[%s1429_s1 + $0xb0] sm:$0xff]   ;;  %v1087_v31 = vld [vmem:[%s1429_s1 + $0xb8] sm:$0xff]   ;;  %v20_v37 = vld [vmem:[%s1430_s0 + $0x28] sm:$0xff] }
   0xd   :  { %977 = vmatpush3.bf16.msra.mxu1 %v1067_v11  ;;  %950 = vmatprep.subr.bf16.mxu0 %v1068_v12  ;;  %v866_v38 = vcombine.low %v16_v34, %v20_v37  ;;  %v867_v39 = vcombine.high %v16_v34, %v20_v37  ;;  %v1088_v40 = vld [vmem:[%s1429_s1 + $0x140] sm:$0xff]   ;;  %v1092_v44 = vld [vmem:[%s1429_s1 + $0x148] sm:$0xff]   ;;  %v1096_v48 = vld [vmem:[%s1429_s1 + $0x150] sm:$0xff]  }
   0xe   :  { %978 = vmatprep.subr.bf16.mxu1 %v1069_v13  ;;  %655 = vmatprep.mubr.bf16.mxu0 %v865_v36  ;;  %v1089_v41 = vld [vmem:[%s1429_s1 + $0x1c0] sm:$0xff]   ;;  %v1093_v45 = vld [vmem:[%s1429_s1 + $0x1c8] sm:$0xff]   ;;  %v1097_v49 = vld [vmem:[%s1429_s1 + $0x1d0] sm:$0xff]  }
   0xf   :  { %704 = vmatprep.mubr.bf16.mxu1 %v867_v39  ;;  %v1090_v42 = vld [vmem:[%s1429_s1 + $0x100] sm:$0xff]   ;;  %v1094_v46 = vld [vmem:[%s1429_s1 + $0x108] sm:$0xff]   ;;  %v1098_v50 = vld [vmem:[%s1429_s1 + $0x110] sm:$0xff]  }
  0x10   :  { %951 = vmatpush3.bf16.msra.mxu0 %v1070_v14  ;;  %v1091_v43 = vld [vmem:[%s1429_s1 + $0x180] sm:$0xff]   ;;  %v1095_v47 = vld [vmem:[%s1429_s1 + $0x188] sm:$0xff]   ;;  %v1099_v51 = vld [vmem:[%s1429_s1 + $0x190] sm:$0xff]  }
  0x11   :  { %979 = vmatpush3.bf16.msra.mxu1 %v1071_v15  ;;  %952 = vmatprep.subr.bf16.mxu0 %v1072_v16  ;;  %v1100_v52 = vld [vmem:[%s1429_s1 + $0x158] sm:$0xff]   ;;  %v1104_v56 = vld [vmem:[%s1429_s1 + $0x160] sm:$0xff]   ;;  %v24_v63 = vld [vmem:[%s1430_s0 + $0x48] sm:$0xff] }
  0x12   :  { %980 = vmatprep.subr.bf16.mxu1 %v1073_v17  ;;  %v1101_v53 = vld [vmem:[%s1429_s1 + $0x1d8] sm:$0xff]   ;;  %v1105_v57 = vld [vmem:[%s1429_s1 + $0x1e0] sm:$0xff]   ;;  %v28_v0 = vld [vmem:[%s1430_s0 + $0x68] sm:$0xff] }
  0x13   :  { %v1102_v54 = vld [vmem:[%s1429_s1 + $0x118] sm:$0xff]   ;;  %v1106_v58 = vld [vmem:[%s1429_s1 + $0x120] sm:$0xff]   ;;  %v875_v2 = vcombine.high %v24_v63, %v28_v0  ;;  %v1108_v3 = vld [vmem:[%s1429_s1 + $0x168] sm:$0xff]   ;;  %v874_v4 = vcombine.low %v24_v63, %v28_v0 }
  0x14   :  { %953 = vmatpush3.bf16.msra.mxu0 %v1074_v18  ;;  %v1103_v55 = vld [vmem:[%s1429_s1 + $0x198] sm:$0xff]   ;;  %v1107_v59 = vld [vmem:[%s1429_s1 + $0x1a0] sm:$0xff]   ;;  %v1109_v5 = vld [vmem:[%s1429_s1 + $0x1e8] sm:$0xff]  }
  0x15   :  { %981 = vmatpush3.bf16.msra.mxu1 %v1075_v19  ;;  %954 = vmatprep.subr.bf16.mxu0 %v1076_v20  ;;  %v23_v60 = vld [vmem:[%s1430_s0 + $0x40] sm:$0xff]  ;;  %v1110_v6 = vld [vmem:[%s1429_s1 + $0x128] sm:$0xff]   ;;  %v1112_v8 = vld [vmem:[%s1429_s1 + $0x170] sm:$0xff]  }
  0x16   :  { %982 = vmatprep.subr.bf16.mxu1 %v1077_v21  ;;  %v27_v61 = vld [vmem:[%s1430_s0 + $0x60] sm:$0xff]  ;;  %v1111_v7 = vld [vmem:[%s1429_s1 + $0x1a8] sm:$0xff]   ;;  %v1113_v9 = vld [vmem:[%s1429_s1 + $0x1f0] sm:$0xff]  }
  0x17   :  { %v873_v62 = vcombine.high %v23_v60, %v27_v61  ;;  %v872_v1 = vcombine.low %v23_v60, %v27_v61  ;;  %v1114_v10 = vld [vmem:[%s1429_s1 + $0x130] sm:$0xff]   ;;  %v1116_v12 = vld [vmem:[%s1429_s1 + $0x178] sm:$0xff]  }
  0x18   :  { %955 = vmatpush3.bf16.msra.mxu0 %v1078_v22  ;;  %v1115_v11 = vld [vmem:[%s1429_s1 + $0x1b0] sm:$0xff]   ;;  %v1117_v13 = vld [vmem:[%s1429_s1 + $0x1f8] sm:$0xff]  }
  0x19   :  { %983 = vmatpush3.bf16.msra.mxu1 %v1079_v23  ;;  %956 = vmatprep.subr.bf16.mxu0 %v1080_v24  ;;  %v1118_v14 = vld [vmem:[%s1429_s1 + $0x138] sm:$0xff]   ;;  %v17_v16 = vld [vmem:[%s1430_s0 + $0x10] sm:$0xff] }
  0x1a   :  { %984 = vmatprep.subr.bf16.mxu1 %v1081_v25  ;;  %v1119_v15 = vld [vmem:[%s1429_s1 + $0x1b8] sm:$0xff]   ;;  %v21_v17 = vld [vmem:[%s1430_s0 + $0x30] sm:$0xff] }
  0x1b   :  { %v18_v18 = vld [vmem:[%s1430_s0 + $0x18] sm:$0xff]  ;;  %v868_v20 = vcombine.low %v17_v16, %v21_v17  ;;  %v869_v21 = vcombine.high %v17_v16, %v21_v17  ;;  %v25_v24 = vld [vmem:[%s1430_s0 + $0x50] sm:$0xff] }
  0x1c   :  { %957 = vmatpush3.bf16.msra.mxu0 %v1082_v26  ;;  %v22_v19 = vld [vmem:[%s1430_s0 + $0x38] sm:$0xff]  ;;  %v29_v25 = vld [vmem:[%s1430_s0 + $0x70] sm:$0xff] }
  0x1d   :  { %985 = vmatpush3.bf16.msra.mxu1 %v1083_v27  ;;  %958 = vmatprep.subr.bf16.mxu0 %v1084_v28  ;;  %v870_v22 = vcombine.low %v18_v18, %v22_v19  ;;  %v871_v23 = vcombine.high %v18_v18, %v22_v19  ;;  %v26_v26 = vld [vmem:[%s1430_s0 + $0x58] sm:$0xff]  ;;  %v877_v27 = vcombine.high %v25_v24, %v29_v25 }
  0x1e   :  { %986 = vmatprep.subr.bf16.mxu1 %v1085_v29  ;;  %v30_v28 = vld [vmem:[%s1430_s0 + $0x78] sm:$0xff] }
  0x1f   :  { %v879_v29 = vcombine.high %v26_v26, %v30_v28 }
  0x20   :  { %959 = vmatpush3.bf16.msra.mxu0 %v1086_v30  ;;  %v876_v30 = vcombine.low %v25_v24, %v29_v25 }
  0x21   :  { %987 = vmatpush3.bf16.msra.mxu1 %v1087_v31  ;;  %1000 = vmatprep.subr.bf16.mxu0 %v1088_v40  ;;  %v878_v31 = vcombine.low %v26_v26, %v30_v28 }
  0x22   :  { %1028 = vmatprep.subr.bf16.mxu1 %v1089_v41 }
  0x23   :  { %656 = vmatmul.mubr.bf16.vlgmr.msra.gmra.mrb[0].mxu0 %v864_v35 }
  0x24   :  { %705 = vmatmul.mubr.bf16.vlgmr.msra.gmra.mrb[0].mxu1 %v866_v38  ;;  %1001 = vmatpush3.bf16.msra.mxu0 %v1090_v42 }
  0x25   :  { %1029 = vmatpush3.bf16.msra.mxu1 %v1091_v43  ;;  %1002 = vmatprep.subr.bf16.mxu0 %v1092_v44 }
  0x26   :  { %1030 = vmatprep.subr.bf16.mxu1 %v1093_v45  ;;  %663 = vmatprep.mubr.bf16.mxu0 %v873_v62 }
  0x27   :  { %712 = vmatprep.mubr.bf16.mxu1 %v875_v2 }
  0x28   :  { %1003 = vmatpush3.bf16.msra.mxu0 %v1094_v46 }
  0x29   :  { %1031 = vmatpush3.bf16.msra.mxu1 %v1095_v47  ;;  %1004 = vmatprep.subr.bf16.mxu0 %v1096_v48 }
  0x2a   :  { %1032 = vmatprep.subr.bf16.mxu1 %v1097_v49 }
  0x2b   :  { %664 = vmatmul.mubr.bf16.gmra.mrb[4].mxu0 %v872_v1 }
  0x2c   :  { %1005 = vmatpush3.bf16.msra.mxu0 %v1098_v50  ;;  %713 = vmatmul.mubr.bf16.gmra.mrb[4].mxu1 %v874_v4 }
  0x2d   :  { %1033 = vmatpush3.bf16.msra.mxu1 %v1099_v51  ;;  %1006 = vmatprep.subr.bf16.mxu0 %v1100_v52 }
  0x2e   :  { %1034 = vmatprep.subr.bf16.mxu1 %v1101_v53  ;;  %753 = vmatprep.mubr.bf16.mxu0 %v869_v21 }
  0x2f   :  { %802 = vmatprep.mubr.bf16.mxu1 %v871_v23 }
  0x30   :  { %1007 = vmatpush3.bf16.msra.mxu0 %v1102_v54 }
  0x31   :  { %1035 = vmatpush3.bf16.msra.mxu1 %v1103_v55  ;;  %1008 = vmatprep.subr.bf16.mxu0 %v1104_v56 }
  0x32   :  { %1036 = vmatprep.subr.bf16.mxu1 %v1105_v57 }
  0x34   :  { %1009 = vmatpush3.bf16.msra.mxu0 %v1106_v58 }
  0x35   :  { %1037 = vmatpush3.bf16.msra.mxu1 %v1107_v59  ;;  %1010 = vmatprep.subr.bf16.mxu0 %v1108_v3 }
  0x36   :  { %1038 = vmatprep.subr.bf16.mxu1 %v1109_v5 }
  0x38   :  { %1011 = vmatpush3.bf16.msra.mxu0 %v1110_v6 }
  0x39   :  { %1039 = vmatpush3.bf16.msra.mxu1 %v1111_v7  ;;  %1012 = vmatprep.subr.bf16.mxu0 %v1112_v8 }
  0x3a   :  { %1040 = vmatprep.subr.bf16.mxu1 %v1113_v9 }
  0x3c   :  { %1013 = vmatpush3.bf16.msra.mxu0 %v1114_v10 }
  0x3d   :  { %1041 = vmatpush3.bf16.msra.mxu1 %v1115_v11  ;;  %1014 = vmatprep.subr.bf16.mxu0 %v1116_v12 }
  0x3e   :  { %1042 = vmatprep.subr.bf16.mxu1 %v1117_v13 }
  0x40   :  { %1015 = vmatpush3.bf16.msra.mxu0 %v1118_v14 }
  0x41   :  { %1043 = vmatpush3.bf16.msra.mxu1 %v1119_v15 }
  0x43   :  { %754 = vmatmul.mubr.bf16.vlgmr.msra.gmra.mrb[8].mxu0 %v868_v20 }
  0x44   :  { %803 = vmatmul.mubr.bf16.vlgmr.msra.gmra.mrb[8].mxu1 %v870_v22  ;;  %761 = vmatprep.mubr.bf16.mxu0 %v877_v27 }
  0x45   :  { %810 = vmatprep.mubr.bf16.mxu1 %v879_v29 }
  0x4b   :  { %762 = vmatmul.mubr.bf16.gmra.mrb[12].mxu0 %v876_v30 }
  0x4c   :  { %811 = vmatmul.mubr.bf16.gmra.mrb[12].mxu1 %v878_v31 }
  0xf6   :  { %v960_v32 = vpop.f32.mrb[0].mxu0 }
  0xf7   :  { %v988_v33 = vpop.f32.mrb[0].mxu1  ;;  %v961_v34 = vpop.f32.mrb[1].mxu0 }
  0xf8   :  { %v962_v35 = vadd.f32 %v961_v34, %v960_v32  ;;  %v989_v36 = vpop.f32.mrb[1].mxu1  ;;  %v963_v37 = vpop.f32.mrb[2].mxu0 }
  0xf9   :  { %v990_v38 = vadd.f32 %v989_v36, %v988_v33  ;;  %v991_v39 = vpop.f32.mrb[2].mxu1  ;;  %v964_v40 = vpop.f32.mrb[3].mxu0 }
  0xfa   :  { %v965_v41 = vadd.f32 %v964_v40, %v963_v37  ;;  %v992_v42 = vpop.f32.mrb[3].mxu1 }
  0xfb   :  { %v707_v43 = vadd.f32 %v990_v38, %v962_v35  ;;  %v993_v44 = vadd.f32 %v992_v42, %v991_v39 }
  0xfd   :  { %v710_v45 = vadd.f32 %v993_v44, %v965_v41 }
  0xfe   :  { %v966_v46 = vpop.f32.mrb[4].mxu0 }
  0xff   :  { %v994_v47 = vpop.f32.mrb[4].mxu1  ;;  %v967_v48 = vpop.f32.mrb[5].mxu0 }
 0x100   :  { %v968_v49 = vadd.f32 %v967_v48, %v966_v46  ;;  %v995_v50 = vpop.f32.mrb[5].mxu1  ;;  %v969_v51 = vpop.f32.mrb[6].mxu0 }
 0x101   :  { %v996_v52 = vadd.f32 %v995_v50, %v994_v47  ;;  %v997_v53 = vpop.f32.mrb[6].mxu1  ;;  %v970_v54 = vpop.f32.mrb[7].mxu0 }
 0x102   :  { %v971_v55 = vadd.f32 %v970_v54, %v969_v51  ;;  %v998_v56 = vpop.f32.mrb[7].mxu1 }
 0x103   :  { %v715_v57 = vadd.f32 %v996_v52, %v968_v49  ;;  %v999_v58 = vadd.f32 %v998_v56, %v997_v53 }
 0x105   :  { %v718_v59 = vadd.f32 %v999_v58, %v971_v55 }
 0x116   :  { %v1016_v60 = vpop.f32.mrb[8].mxu0 }
 0x117   :  { %v1044_v61 = vpop.f32.mrb[8].mxu1  ;;  %v1017_v62 = vpop.f32.mrb[9].mxu0 }
 0x118   :  { %v1045_v63 = vpop.f32.mrb[9].mxu1  ;;  %v1018_v0 = vadd.f32 %v1017_v62, %v1016_v60  ;;  %v1019_v2 = vpop.f32.mrb[10].mxu0 }
 0x119   :  { %v1046_v1 = vadd.f32 %v1045_v63, %v1044_v61  ;;  %v1047_v3 = vpop.f32.mrb[10].mxu1  ;;  %v1020_v4 = vpop.f32.mrb[11].mxu0 }
 0x11a   :  { %v1048_v5 = vpop.f32.mrb[11].mxu1  ;;  %v756_v6 = vadd.f32 %v1018_v0, %v707_v43  ;;  %v1021_v7 = vadd.f32 %v1020_v4, %v1019_v2 }
 0x11b   :  { %v1049_v8 = vadd.f32 %v1048_v5, %v1047_v3 }
 0x11c   :  { %v805_v9 = vadd.f32 %v1046_v1, %v756_v6  ;;  %v759_v10 = vadd.f32 %v1021_v7, %v710_v45 }
 0x11e   :  { %848 = vst [vmem:[%s1431_s2] sm:$0xff] %v805_v9  ;;  %v808_v11 = vadd.f32 %v1049_v8, %v759_v10  ;;  %v1022_v12 = vpop.f32.mrb[12].mxu0  ;;  %819 = vadd.xlane.f32.xlu0 %v805_v9  ;;  %v832_v28 = vmul.f32 %v805_v9, %v805_v9 }
 0x11f   :  { %v1050_v13 = vpop.f32.mrb[12].mxu1  ;;  %v1023_v14 = vpop.f32.mrb[13].mxu0 }
 0x120   :  { %v1051_v15 = vpop.f32.mrb[13].mxu1  ;;  %849 = vst [vmem:[%s1431_s2 + $0x8] sm:$0xff] %v808_v11  ;;  %v1024_v16 = vadd.f32 %v1023_v14, %v1022_v12  ;;  %v1025_v18 = vpop.f32.mrb[14].mxu0  ;;  %v833_v20 = vmul.f32 %v808_v11, %v808_v11 }
 0x121   :  { %v1052_v17 = vadd.f32 %v1051_v15, %v1050_v13  ;;  %v1053_v19 = vpop.f32.mrb[14].mxu1  ;;  %v1026_v21 = vpop.f32.mrb[15].mxu0 }
 0x122   :  { %v1054_v22 = vpop.f32.mrb[15].mxu1  ;;  %v764_v23 = vadd.f32 %v1024_v16, %v715_v57  ;;  %v1027_v24 = vadd.f32 %v1026_v21, %v1025_v18  ;;  %838 = vadd.xlane.f32.xlu1 %v833_v20  ;;  %821 = vadd.xlane.f32.xlu0 %v808_v11 }
 0x123   :  { %v1055_v25 = vadd.f32 %v1054_v22, %v1053_v19 }
 0x124   :  { %v813_v26 = vadd.f32 %v1052_v17, %v764_v23  ;;  %v767_v27 = vadd.f32 %v1027_v24, %v718_v59 }
 0x126   :  { %850 = vst [vmem:[%s1431_s2 + $0x10] sm:$0xff] %v813_v26  ;;  %v816_v29 = vadd.f32 %v1055_v25, %v767_v27  ;;  %823 = vadd.xlane.f32.xlu1 %v813_v26  ;;  %836 = vadd.xlane.f32.xlu0 %v832_v28  ;;  %v834_v30 = vmul.f32 %v813_v26, %v813_v26 }
 0x128   :  { %851 = vst [vmem:[%s1431_s2 + $0x18] sm:$0xff] %v816_v29  ;;  %v835_v31 = vmul.f32 %v816_v29, %v816_v29 }
 0x12a   :  { %825 = vadd.xlane.f32.xlu1 %v816_v29  ;;  %840 = vadd.xlane.f32.xlu0 %v834_v30 }
 0x12e   :  { %842 = vadd.xlane.f32.xlu1 %v835_v31 }
 0x1ab   :  { %v820_v32 = vpop.xlane.xlu0 %819 }
 0x1ac   :  { %828 = vst.msk [vmem:[%s1432_s3] sm:$0xff] %vm827_vm0, %v820_v32 }
 0x1af   :  { %v839_v33 = vpop.xlane.xlu1 %838  ;;  %v822_v34 = vpop.xlane.xlu0 %821 }
 0x1b0   :  { %845 = vst.msk [vmem:[%s1433_s4 + $0x8] sm:$0xff] %vm827_vm0, %v839_v33  ;;  %829 = vst.msk [vmem:[%s1432_s3 + $0x8] sm:$0xff] %vm827_vm0, %v822_v34 }
 0x1b3   :  { %v824_v35 = vpop.xlane.xlu1 %823  ;;  %v837_v36 = vpop.xlane.xlu0 %836 }
 0x1b4   :  { %830 = vst.msk [vmem:[%s1432_s3 + $0x10] sm:$0xff] %vm827_vm0, %v824_v35  ;;  %844 = vst.msk [vmem:[%s1433_s4] sm:$0xff] %vm827_vm0, %v837_v36 }
 0x1b7   :  { %v826_v37 = vpop.xlane.xlu1 %825  ;;  %v841_v38 = vpop.xlane.xlu0 %840 }
 0x1b8   :  { %831 = vst.msk [vmem:[%s1432_s3 + $0x18] sm:$0xff] %vm827_vm0, %v826_v37  ;;  %846 = vst.msk [vmem:[%s1433_s4 + $0x10] sm:$0xff] %vm827_vm0, %v841_v38 }
 0x1bb   :  { %v843_v39 = vpop.xlane.xlu1 %842 }
 0x1bc   :  { %847 = vst.msk [vmem:[%s1433_s4 + $0x18] sm:$0xff] %vm827_vm0, %v843_v39 }

// kernel: generator_forward.14
= control target key start
LH: loop header
LB: loop body
LE: loop exit
PB: predicated region body
PF: predicated region fallthrough
CT: control target
= control target key end

     0   :  { %v113_v0 = vmov 0   ;;  %s182_s2 = inlined_call_operand.vmem [shape: f32[16,1], index: 2, kind: input, shape index: {}]   ;;  %s183_s1 = inlined_call_operand.vmem [shape: f32[16,1], index: 1, kind: input, shape index: {}]   ;;  %s184_s0 = inlined_call_operand.vmem [shape: f32[16,512], index: 0, kind: input, shape index: {}]   ;;  %s185_s3 = inlined_call_operand.vmem [shape: bf16[16,512], index: 3, kind: output, shape index: {}]  }
   0x1   :  { %112 = vset.pattern.permute.xlu1 %v113_v0  ;;  %111 = vset.pattern.permute.xlu0 %v113_v0  ;;  %v42_v1 = vld [vmem:[%s182_s2] sm:$0xff]  ;;  %v43_v3 = vld [vmem:[%s182_s2 + $0x8] sm:$0xff]  ;;  %v16_v7 = vld [vmem:[%s184_s0 + $0x10] sm:$0xff] }
   0x2   :  { %v22_v2 = vld [vmem:[%s183_s1] sm:$0xff]  ;;  %46 = vperm.xlu1 %112, %v42_v1   ;;  %v23_v4 = vld [vmem:[%s183_s1 + $0x8] sm:$0xff]  ;;  %v17_v8 = vld [vmem:[%s184_s0 + $0x18] sm:$0xff] }
   0x3   :  { %26 = vperm.xlu0 %111, %v22_v2   ;;  %v14_v5 = vld [vmem:[%s184_s0] sm:$0xff]  ;;  %v15_v6 = vld [vmem:[%s184_s0 + $0x8] sm:$0xff]  ;;  %v20_v21 = vld [vmem:[%s184_s0 + $0x30] sm:$0xff] }
   0x4   :  { %v18_v15 = vld [vmem:[%s184_s0 + $0x20] sm:$0xff]  ;;  %v19_v20 = vld [vmem:[%s184_s0 + $0x28] sm:$0xff]  ;;  %v21_v22 = vld [vmem:[%s184_s0 + $0x38] sm:$0xff] }
   0x6   :  { %51 = vperm.xlu1 %112, %v43_v3  }
   0x7   :  { %31 = vperm.xlu0 %111, %v23_v4  }
  0x81   :  { %v47_v10 = vpop.permute.xlu1 %46 }
  0x82   :  { %v27_v9 = vpop.permute.xlu0 %26 }
  0x83   :  { %v34_v11 = vmul.f32 %v27_v9, %v14_v5  ;;  %v35_v12 = vmul.f32 %v27_v9, %v15_v6  ;;  %v36_v13 = vmul.f32 %v27_v9, %v16_v7  ;;  %v37_v14 = vmul.f32 %v27_v9, %v17_v8 }
  0x85   :  { %v54_v16 = vadd.f32 %v47_v10, %v34_v11  ;;  %v55_v17 = vadd.f32 %v47_v10, %v35_v12  ;;  %v56_v18 = vadd.f32 %v47_v10, %v36_v13  ;;  %v57_v19 = vadd.f32 %v47_v10, %v37_v14  ;;  %v52_v34 = vpop.permute.xlu1 %51 }
  0x86   :  { %v32_v23 = vpop.permute.xlu0 %31 }
  0x87   :  { %v62_v24 = vmax.f32 %v54_v16, 0.0  ;;  %v63_v25 = vmax.f32 %v55_v17, 0.0  ;;  %v64_v26 = vmax.f32 %v56_v18, 0.0  ;;  %v65_v27 = vmax.f32 %v57_v19, 0.0 }
  0x88   :  { %v38_v28 = vmul.f32 %v32_v23, %v18_v15  ;;  %v39_v29 = vmul.f32 %v32_v23, %v19_v20  ;;  %v40_v30 = vmul.f32 %v32_v23, %v20_v21  ;;  %v41_v31 = vmul.f32 %v32_v23, %v21_v22 }
  0x89   :  { %v106_v32 = vpack.c.bf16 %v63_v25, %v62_v24  ;;  %v107_v33 = vpack.c.bf16 %v65_v27, %v64_v26 }
  0x8a   :  { %v58_v35 = vadd.f32 %v52_v34, %v38_v28  ;;  %v59_v36 = vadd.f32 %v52_v34, %v39_v29  ;;  %v60_v37 = vadd.f32 %v52_v34, %v40_v30  ;;  %v61_v38 = vadd.f32 %v52_v34, %v41_v31 }
  0x8b   :  { %94 = vst [vmem:[%s185_s3] sm:$0xff] %v106_v32  ;;  %95 = vst [vmem:[%s185_s3 + $0x8] sm:$0xff] %v107_v33 }
  0x8c   :  { %v66_v39 = vmax.f32 %v58_v35, 0.0  ;;  %v67_v40 = vmax.f32 %v59_v36, 0.0  ;;  %v68_v41 = vmax.f32 %v60_v37, 0.0  ;;  %v69_v42 = vmax.f32 %v61_v38, 0.0 }
  0x8e   :  { %v108_v43 = vpack.c.bf16 %v67_v40, %v66_v39  ;;  %v109_v44 = vpack.c.bf16 %v69_v42, %v68_v41 }
  0x90   :  { %96 = vst [vmem:[%s185_s3 + $0x10] sm:$0xff] %v108_v43  ;;  %97 = vst [vmem:[%s185_s3 + $0x18] sm:$0xff] %v109_v44 }

// kernel: generator_forward.13
= control target key start
LH: loop header
LB: loop body
LE: loop exit
PB: predicated region body
PF: predicated region fallthrough
CT: control target
= control target key end

     0   :  { %vm988_vm0 = vcmask 7168   ;;  %s1826_s1 = inlined_call_operand.vmem [shape: bf16[512,512], index: 1, kind: input, shape index: {}]   ;;  %s1827_s0 = inlined_call_operand.vmem [shape: bf16[16,512], index: 0, kind: input, shape index: {}]   ;;  %s1828_s2 = inlined_call_operand.vmem [shape: f32[16,512], index: 2, kind: output, shape index: {0}]   ;;  %s1829_s3 = inlined_call_operand.vmem [shape: f32[1,16,1], index: 3, kind: output, shape index: {1}]   ;;  %s1830_s4 = inlined_call_operand.vmem [shape: f32[1,16,1], index: 4, kind: output, shape index: {2}]  }
   0x1   :  { %v1171_v0 = vld [vmem:[%s1826_s1 + $0x4] ss:$16 sps:$4 sm:$0xff]   ;;  %v1173_v1 = vld [vmem:[%s1826_s1 + $0xc] ss:$16 sps:$4 sm:$0xff]   ;;  %v1175_v2 = vld [vmem:[%s1826_s1] ss:$16 sps:$4 sm:$0xff]  }
   0x2   :  { %806 = vmatprep.subr.bf16.mxu0 %v1171_v0  ;;  %v1176_v3 = vld [vmem:[%s1826_s1 + $0x8] ss:$16 sps:$4 sm:$0xff]   ;;  %892 = vmatprep.subr.bf16.mxu1 %v1173_v1  ;;  %v1177_v4 = vld [vmem:[%s1826_s1 + $0x24] ss:$16 sps:$4 sm:$0xff]   ;;  %v1179_v5 = vld [vmem:[%s1826_s1 + $0x2c] ss:$16 sps:$4 sm:$0xff]  }
   0x3   :  { %807 = vmatpush1.bf16.msra.mxu0 %v1175_v2  ;;  %893 = vmatpush1.bf16.msra.mxu1 %v1176_v3  ;;  %v1181_v6 = vld [vmem:[%s1826_s1 + $0x20] ss:$16 sps:$4 sm:$0xff]   ;;  %v1182_v7 = vld [vmem:[%s1826_s1 + $0x28] ss:$16 sps:$4 sm:$0xff]   ;;  %v1183_v8 = vld [vmem:[%s1826_s1 + $0x44] ss:$16 sps:$4 sm:$0xff]  }
   0x4   :  { %808 = vmatprep.subr.bf16.mxu0 %v1177_v4  ;;  %894 = vmatprep.subr.bf16.mxu1 %v1179_v5  ;;  %v1185_v9 = vld [vmem:[%s1826_s1 + $0x4c] ss:$16 sps:$4 sm:$0xff]   ;;  %v1187_v10 = vld [vmem:[%s1826_s1 + $0x40] ss:$16 sps:$4 sm:$0xff]   ;;  %v1188_v11 = vld [vmem:[%s1826_s1 + $0x48] ss:$16 sps:$4 sm:$0xff]  }
   0x5   :  { %v1189_v12 = vld [vmem:[%s1826_s1 + $0x64] ss:$16 sps:$4 sm:$0xff]   ;;  %v1191_v13 = vld [vmem:[%s1826_s1 + $0x6c] ss:$16 sps:$4 sm:$0xff]   ;;  %v1193_v14 = vld [vmem:[%s1826_s1 + $0x60] ss:$16 sps:$4 sm:$0xff]  }
   0x6   :  { %v1194_v15 = vld [vmem:[%s1826_s1 + $0x68] ss:$16 sps:$4 sm:$0xff]   ;;  %v1195_v16 = vld [vmem:[%s1826_s1 + $0x84] ss:$16 sps:$4 sm:$0xff]   ;;  %v1197_v17 = vld [vmem:[%s1826_s1 + $0x8c] ss:$16 sps:$4 sm:$0xff]  }
   0x7   :  { %809 = vmatpush1.bf16.msra.mxu0 %v1181_v6  ;;  %895 = vmatpush1.bf16.msra.mxu1 %v1182_v7  ;;  %v1199_v18 = vld [vmem:[%s1826_s1 + $0x80] ss:$16 sps:$4 sm:$0xff]   ;;  %v1200_v19 = vld [vmem:[%s1826_s1 + $0x88] ss:$16 sps:$4 sm:$0xff]   ;;  %v1201_v20 = vld [vmem:[%s1826_s1 + $0xa4] ss:$16 sps:$4 sm:$0xff]  }
   0x8   :  { %810 = vmatprep.subr.bf16.mxu0 %v1183_v8  ;;  %896 = vmatprep.subr.bf16.mxu1 %v1185_v9  ;;  %v1203_v21 = vld [vmem:[%s1826_s1 + $0xac] ss:$16 sps:$4 sm:$0xff]   ;;  %v1205_v22 = vld [vmem:[%s1826_s1 + $0xa0] ss:$16 sps:$4 sm:$0xff]   ;;  %v1206_v23 = vld [vmem:[%s1826_s1 + $0xa8] ss:$16 sps:$4 sm:$0xff]  }
   0x9   :  { %v1207_v24 = vld [vmem:[%s1826_s1 + $0xc4] ss:$16 sps:$4 sm:$0xff]   ;;  %v1209_v25 = vld [vmem:[%s1826_s1 + $0xcc] ss:$16 sps:$4 sm:$0xff]   ;;  %v1211_v26 = vld [vmem:[%s1826_s1 + $0xc0] ss:$16 sps:$4 sm:$0xff]  }
   0xa   :  { %v1212_v27 = vld [vmem:[%s1826_s1 + $0xc8] ss:$16 sps:$4 sm:$0xff]   ;;  %v1213_v28 = vld [vmem:[%s1826_s1 + $0xe4] ss:$16 sps:$4 sm:$0xff]   ;;  %v1215_v29 = vld [vmem:[%s1826_s1 + $0xec] ss:$16 sps:$4 sm:$0xff]  }
   0xb   :  { %811 = vmatpush1.bf16.msra.mxu0 %v1187_v10  ;;  %897 = vmatpush1.bf16.msra.mxu1 %v1188_v11  ;;  %v1217_v30 = vld [vmem:[%s1826_s1 + $0xe0] ss:$16 sps:$4 sm:$0xff]   ;;  %v1218_v31 = vld [vmem:[%s1826_s1 + $0xe8] ss:$16 sps:$4 sm:$0xff]   ;;  %v1219_v32 = vld [vmem:[%s1826_s1 + $0x104] ss:$16 sps:$4 sm:$0xff]  }
   0xc   :  { %812 = vmatprep.subr.bf16.mxu0 %v1189_v12  ;;  %898 = vmatprep.subr.bf16.mxu1 %v1191_v13  ;;  %v1221_v33 = vld [vmem:[%s1826_s1 + $0x10c] ss:$16 sps:$4 sm:$0xff]   ;;  %v1223_v34 = vld [vmem:[%s1826_s1 + $0x100] ss:$16 sps:$4 sm:$0xff]   ;;  %v1224_v35 = vld [vmem:[%s1826_s1 + $0x108] ss:$16 sps:$4 sm:$0xff]  }
   0xd   :  { %v1225_v36 = vld [vmem:[%s1826_s1 + $0x124] ss:$16 sps:$4 sm:$0xff]   ;;  %v1227_v37 = vld [vmem:[%s1826_s1 + $0x12c] ss:$16 sps:$4 sm:$0xff]   ;;  %v1229_v38 = vld [vmem:[%s1826_s1 + $0x120] ss:$16 sps:$4 sm:$0xff]  }
   0xe   :  { %v1230_v39 = vld [vmem:[%s1826_s1 + $0x128] ss:$16 sps:$4 sm:$0xff]   ;;  %v1231_v40 = vld [vmem:[%s1826_s1 + $0x144] ss:$16 sps:$4 sm:$0xff]   ;;  %v1233_v41 = vld [vmem:[%s1826_s1 + $0x14c] ss:$16 sps:$4 sm:$0xff]  }
   0xf   :  { %813 = vmatpush1.bf16.msra.mxu0 %v1193_v14  ;;  %899 = vmatpush1.bf16.msra.mxu1 %v1194_v15  ;;  %v1235_v42 = vld [vmem:[%s1826_s1 + $0x140] ss:$16 sps:$4 sm:$0xff]   ;;  %v1236_v43 = vld [vmem:[%s1826_s1 + $0x148] ss:$16 sps:$4 sm:$0xff]   ;;  %v1237_v44 = vld [vmem:[%s1826_s1 + $0x164] ss:$16 sps:$4 sm:$0xff]  }
  0x10   :  { %814 = vmatprep.subr.bf16.mxu0 %v1195_v16  ;;  %900 = vmatprep.subr.bf16.mxu1 %v1197_v17  ;;  %v1239_v45 = vld [vmem:[%s1826_s1 + $0x16c] ss:$16 sps:$4 sm:$0xff]   ;;  %v1241_v46 = vld [vmem:[%s1826_s1 + $0x160] ss:$16 sps:$4 sm:$0xff]   ;;  %v1242_v47 = vld [vmem:[%s1826_s1 + $0x168] ss:$16 sps:$4 sm:$0xff]  }
  0x11   :  { %v1269_v48 = vld [vmem:[%s1827_s0 + $0x4] ss:$16 sps:$4 sm:$0xff]   ;;  %v1245_v50 = vld [vmem:[%s1826_s1 + $0x18c] ss:$16 sps:$4 sm:$0xff]   ;;  %v1247_v51 = vld [vmem:[%s1826_s1 + $0x180] ss:$16 sps:$4 sm:$0xff]  }
  0x12   :  { %v1243_v49 = vld [vmem:[%s1826_s1 + $0x184] ss:$16 sps:$4 sm:$0xff]   ;;  %838 = vmatprep.mubr.bf16.mxu0 %v1269_v48  ;;  %924 = vmatprep.mubr.bf16.mxu1 %v1269_v48  ;;  %v1248_v52 = vld [vmem:[%s1826_s1 + $0x188] ss:$16 sps:$4 sm:$0xff]   ;;  %v1251_v54 = vld [vmem:[%s1826_s1 + $0x1ac] ss:$16 sps:$4 sm:$0xff]  }
  0x13   :  { %815 = vmatpush1.bf16.msra.mxu0 %v1199_v18  ;;  %901 = vmatpush1.bf16.msra.mxu1 %v1200_v19  ;;  %v1249_v53 = vld [vmem:[%s1826_s1 + $0x1a4] ss:$16 sps:$4 sm:$0xff]   ;;  %v1253_v55 = vld [vmem:[%s1826_s1 + $0x1a0] ss:$16 sps:$4 sm:$0xff]   ;;  %v1254_v56 = vld [vmem:[%s1826_s1 + $0x1a8] ss:$16 sps:$4 sm:$0xff]  }
  0x14   :  { %816 = vmatprep.subr.bf16.mxu0 %v1201_v20  ;;  %902 = vmatprep.subr.bf16.mxu1 %v1203_v21  ;;  %v1255_v57 = vld [vmem:[%s1826_s1 + $0x1c4] ss:$16 sps:$4 sm:$0xff]   ;;  %v1257_v58 = vld [vmem:[%s1826_s1 + $0x1cc] ss:$16 sps:$4 sm:$0xff]   ;;  %v1259_v59 = vld [vmem:[%s1826_s1 + $0x1c0] ss:$16 sps:$4 sm:$0xff]  }
  0x15   :  { %v1260_v60 = vld [vmem:[%s1826_s1 + $0x1c8] ss:$16 sps:$4 sm:$0xff]   ;;  %v1261_v61 = vld [vmem:[%s1826_s1 + $0x1e4] ss:$16 sps:$4 sm:$0xff]   ;;  %v1263_v62 = vld [vmem:[%s1826_s1 + $0x1ec] ss:$16 sps:$4 sm:$0xff]  }
  0x16   :  { %v1265_v63 = vld [vmem:[%s1826_s1 + $0x1e0] ss:$16 sps:$4 sm:$0xff]   ;;  %v1266_v0 = vld [vmem:[%s1826_s1 + $0x1e8] ss:$16 sps:$4 sm:$0xff]   ;;  %v1272_v1 = vld [vmem:[%s1826_s1 + $0x204] ss:$16 sps:$4 sm:$0xff]  }
  0x17   :  { %817 = vmatpush1.bf16.msra.mxu0 %v1205_v22  ;;  %903 = vmatpush1.bf16.msra.mxu1 %v1206_v23  ;;  %v1275_v2 = vld [vmem:[%s1826_s1 + $0x20c] ss:$16 sps:$4 sm:$0xff]   ;;  %v1267_v3 = vld [vmem:[%s1827_s0] ss:$16 sps:$4 sm:$0xff]   ;;  %v1273_v5 = vld [vmem:[%s1826_s1 + $0x208] ss:$16 sps:$4 sm:$0xff]  }
  0x18   :  { %818 = vmatprep.subr.bf16.mxu0 %v1207_v24  ;;  %904 = vmatprep.subr.bf16.mxu1 %v1209_v25  ;;  %v1270_v4 = vld [vmem:[%s1826_s1 + $0x200] ss:$16 sps:$4 sm:$0xff]   ;;  %v1278_v6 = vld [vmem:[%s1826_s1 + $0x224] ss:$16 sps:$4 sm:$0xff]   ;;  %v1281_v7 = vld [vmem:[%s1826_s1 + $0x22c] ss:$16 sps:$4 sm:$0xff]  }
  0x19   :  { %v1276_v8 = vld [vmem:[%s1826_s1 + $0x220] ss:$16 sps:$4 sm:$0xff]   ;;  %v1279_v9 = vld [vmem:[%s1826_s1 + $0x228] ss:$16 sps:$4 sm:$0xff]   ;;  %v1284_v10 = vld [vmem:[%s1826_s1 + $0x244] ss:$16 sps:$4 sm:$0xff]  }
  0x1a   :  { %v1287_v11 = vld [vmem:[%s1826_s1 + $0x24c] ss:$16 sps:$4 sm:$0xff]   ;;  %v1282_v12 = vld [vmem:[%s1826_s1 + $0x240] ss:$16 sps:$4 sm:$0xff]   ;;  %v1285_v13 = vld [vmem:[%s1826_s1 + $0x248] ss:$16 sps:$4 sm:$0xff]  }
  0x1b   :  { %819 = vmatpush1.bf16.msra.mxu0 %v1211_v26  ;;  %905 = vmatpush1.bf16.msra.mxu1 %v1212_v27  ;;  %v1290_v14 = vld [vmem:[%s1826_s1 + $0x264] ss:$16 sps:$4 sm:$0xff]   ;;  %v1293_v15 = vld [vmem:[%s1826_s1 + $0x26c] ss:$16 sps:$4 sm:$0xff]   ;;  %v1288_v16 = vld [vmem:[%s1826_s1 + $0x260] ss:$16 sps:$4 sm:$0xff]  }
  0x1c   :  { %820 = vmatprep.subr.bf16.mxu0 %v1213_v28  ;;  %906 = vmatprep.subr.bf16.mxu1 %v1215_v29  ;;  %v1291_v17 = vld [vmem:[%s1826_s1 + $0x268] ss:$16 sps:$4 sm:$0xff]   ;;  %v1296_v18 = vld [vmem:[%s1826_s1 + $0x284] ss:$16 sps:$4 sm:$0xff]   ;;  %v1299_v19 = vld [vmem:[%s1826_s1 + $0x28c] ss:$16 sps:$4 sm:$0xff]  }
  0x1d   :  { %v1294_v20 = vld [vmem:[%s1826_s1 + $0x280] ss:$16 sps:$4 sm:$0xff]   ;;  %v1297_v21 = vld [vmem:[%s1826_s1 + $0x288] ss:$16 sps:$4 sm:$0xff]   ;;  %v1302_v22 = vld [vmem:[%s1826_s1 + $0x2a4] ss:$16 sps:$4 sm:$0xff]  }
  0x1e   :  { %v1305_v23 = vld [vmem:[%s1826_s1 + $0x2ac] ss:$16 sps:$4 sm:$0xff]   ;;  %v1300_v24 = vld [vmem:[%s1826_s1 + $0x2a0] ss:$16 sps:$4 sm:$0xff]   ;;  %v1303_v25 = vld [vmem:[%s1826_s1 + $0x2a8] ss:$16 sps:$4 sm:$0xff]  }
  0x1f   :  { %821 = vmatpush1.bf16.msra.mxu0 %v1217_v30  ;;  %907 = vmatpush1.bf16.msra.mxu1 %v1218_v31  ;;  %v1308_v26 = vld [vmem:[%s1826_s1 + $0x2c4] ss:$16 sps:$4 sm:$0xff]   ;;  %v1311_v27 = vld [vmem:[%s1826_s1 + $0x2cc] ss:$16 sps:$4 sm:$0xff]   ;;  %v1306_v29 = vld [vmem:[%s1826_s1 + $0x2c0] ss:$16 sps:$4 sm:$0xff]  }
  0x20   :  { %822 = vmatprep.subr.bf16.mxu0 %v1219_v32  ;;  %908 = vmatprep.subr.bf16.mxu1 %v1221_v33  ;;  %v1368_v28 = vld [vmem:[%s1827_s0 + $0xc] ss:$16 sps:$4 sm:$0xff]   ;;  %v1309_v30 = vld [vmem:[%s1826_s1 + $0x2c8] ss:$16 sps:$4 sm:$0xff]   ;;  %v1314_v31 = vld [vmem:[%s1826_s1 + $0x2e4] ss:$16 sps:$4 sm:$0xff]  }
  0x21   :  { %v1317_v32 = vld [vmem:[%s1826_s1 + $0x2ec] ss:$16 sps:$4 sm:$0xff]   ;;  %v1312_v33 = vld [vmem:[%s1826_s1 + $0x2e0] ss:$16 sps:$4 sm:$0xff]  }
  0x22   :  { %v1341_v48 = vld [vmem:[%s1826_s1 + $0x36c] ss:$16 sps:$4 sm:$0xff]  }
  0x23   :  { %823 = vmatpush1.bf16.msra.mxu0 %v1223_v34  ;;  %909 = vmatpush1.bf16.msra.mxu1 %v1224_v35  ;;  %v1315_v34 = vld [vmem:[%s1826_s1 + $0x2e8] ss:$16 sps:$4 sm:$0xff]   ;;  %v1320_v35 = vld [vmem:[%s1826_s1 + $0x304] ss:$16 sps:$4 sm:$0xff]  }
  0x24   :  { %824 = vmatprep.subr.bf16.mxu0 %v1225_v36  ;;  %910 = vmatprep.subr.bf16.mxu1 %v1227_v37  ;;  %v1323_v36 = vld [vmem:[%s1826_s1 + $0x30c] ss:$16 sps:$4 sm:$0xff]   ;;  %v1318_v37 = vld [vmem:[%s1826_s1 + $0x300] ss:$16 sps:$4 sm:$0xff]  }
  0x27   :  { %825 = vmatpush1.bf16.msra.mxu0 %v1229_v38  ;;  %911 = vmatpush1.bf16.msra.mxu1 %v1230_v39  ;;  %v1321_v38 = vld [vmem:[%s1826_s1 + $0x308] ss:$16 sps:$4 sm:$0xff]   ;;  %v1326_v39 = vld [vmem:[%s1826_s1 + $0x324] ss:$16 sps:$4 sm:$0xff]  }
  0x28   :  { %826 = vmatprep.subr.bf16.mxu0 %v1231_v40  ;;  %912 = vmatprep.subr.bf16.mxu1 %v1233_v41  ;;  %v1329_v40 = vld [vmem:[%s1826_s1 + $0x32c] ss:$16 sps:$4 sm:$0xff]   ;;  %v1324_v41 = vld [vmem:[%s1826_s1 + $0x320] ss:$16 sps:$4 sm:$0xff]  }
  0x2b   :  { %827 = vmatpush1.bf16.msra.mxu0 %v1235_v42  ;;  %913 = vmatpush1.bf16.msra.mxu1 %v1236_v43  ;;  %v1327_v42 = vld [vmem:[%s1826_s1 + $0x328] ss:$16 sps:$4 sm:$0xff]   ;;  %v1332_v43 = vld [vmem:[%s1826_s1 + $0x344] ss:$16 sps:$4 sm:$0xff]  }
  0x2c   :  { %828 = vmatprep.subr.bf16.mxu0 %v1237_v44  ;;  %914 = vmatprep.subr.bf16.mxu1 %v1239_v45  ;;  %v1335_v44 = vld [vmem:[%s1826_s1 + $0x34c] ss:$16 sps:$4 sm:$0xff]   ;;  %v1330_v45 = vld [vmem:[%s1826_s1 + $0x340] ss:$16 sps:$4 sm:$0xff]  }
  0x2f   :  { %829 = vmatpush1.bf16.msra.mxu0 %v1241_v46  ;;  %915 = vmatpush1.bf16.msra.mxu1 %v1242_v47  ;;  %v1333_v46 = vld [vmem:[%s1826_s1 + $0x348] ss:$16 sps:$4 sm:$0xff]   ;;  %v1338_v47 = vld [vmem:[%s1826_s1 + $0x364] ss:$16 sps:$4 sm:$0xff]  }
  0x30   :  { %830 = vmatprep.subr.bf16.mxu0 %v1243_v49  ;;  %916 = vmatprep.subr.bf16.mxu1 %v1245_v50  ;;  %v1336_v49 = vld [vmem:[%s1826_s1 + $0x360] ss:$16 sps:$4 sm:$0xff]   ;;  %v1339_v50 = vld [vmem:[%s1826_s1 + $0x368] ss:$16 sps:$4 sm:$0xff]  }
  0x33   :  { %831 = vmatpush1.bf16.msra.mxu0 %v1247_v51  ;;  %917 = vmatpush1.bf16.msra.mxu1 %v1248_v52  ;;  %v1344_v51 = vld [vmem:[%s1826_s1 + $0x384] ss:$16 sps:$4 sm:$0xff]   ;;  %v1347_v52 = vld [vmem:[%s1826_s1 + $0x38c] ss:$16 sps:$4 sm:$0xff]  }
  0x34   :  { %832 = vmatprep.subr.bf16.mxu0 %v1249_v53  ;;  %918 = vmatprep.subr.bf16.mxu1 %v1251_v54  ;;  %v1342_v53 = vld [vmem:[%s1826_s1 + $0x380] ss:$16 sps:$4 sm:$0xff]   ;;  %v1345_v54 = vld [vmem:[%s1826_s1 + $0x388] ss:$16 sps:$4 sm:$0xff]  }
  0x37   :  { %833 = vmatpush1.bf16.msra.mxu0 %v1253_v55  ;;  %919 = vmatpush1.bf16.msra.mxu1 %v1254_v56  ;;  %v1350_v55 = vld [vmem:[%s1826_s1 + $0x3a4] ss:$16 sps:$4 sm:$0xff]   ;;  %v1353_v56 = vld [vmem:[%s1826_s1 + $0x3ac] ss:$16 sps:$4 sm:$0xff]  }
  0x38   :  { %834 = vmatprep.subr.bf16.mxu0 %v1255_v57  ;;  %920 = vmatprep.subr.bf16.mxu1 %v1257_v58  ;;  %v1348_v57 = vld [vmem:[%s1826_s1 + $0x3a0] ss:$16 sps:$4 sm:$0xff]   ;;  %v1351_v58 = vld [vmem:[%s1826_s1 + $0x3a8] ss:$16 sps:$4 sm:$0xff]  }
  0x3b   :  { %835 = vmatpush1.bf16.msra.mxu0 %v1259_v59  ;;  %921 = vmatpush1.bf16.msra.mxu1 %v1260_v60  ;;  %v1356_v59 = vld [vmem:[%s1826_s1 + $0x3c4] ss:$16 sps:$4 sm:$0xff]   ;;  %v1359_v60 = vld [vmem:[%s1826_s1 + $0x3cc] ss:$16 sps:$4 sm:$0xff]  }
  0x3c   :  { %836 = vmatprep.subr.bf16.mxu0 %v1261_v61  ;;  %922 = vmatprep.subr.bf16.mxu1 %v1263_v62  ;;  %v1354_v61 = vld [vmem:[%s1826_s1 + $0x3c0] ss:$16 sps:$4 sm:$0xff]   ;;  %v1357_v62 = vld [vmem:[%s1826_s1 + $0x3c8] ss:$16 sps:$4 sm:$0xff]  }
  0x3f   :  { %837 = vmatpush1.bf16.msra.mxu0 %v1265_v63  ;;  %923 = vmatpush1.bf16.msra.mxu1 %v1266_v0  ;;  %v1362_v63 = vld [vmem:[%s1826_s1 + $0x3e4] ss:$16 sps:$4 sm:$0xff]   ;;  %v1365_v0 = vld [vmem:[%s1826_s1 + $0x3ec] ss:$16 sps:$4 sm:$0xff]  }
  0x40   :  { %849 = vmatprep.subr.bf16.mxu0 %v1272_v1  ;;  %935 = vmatprep.subr.bf16.mxu1 %v1275_v2  ;;  %v1360_v1 = vld [vmem:[%s1826_s1 + $0x3e0] ss:$16 sps:$4 sm:$0xff]   ;;  %v1363_v2 = vld [vmem:[%s1826_s1 + $0x3e8] ss:$16 sps:$4 sm:$0xff]  }
  0x42   :  { %839 = vmatmul.mubr.bf16.vlgmr.msra.gmra.mrb[0].mxu0 %v1267_v3  ;;  %925 = vmatmul.mubr.bf16.vlgmr.msra.gmra.mrb[0].mxu1 %v1267_v3  ;;  %v1366_v3 = vld [vmem:[%s1827_s0 + $0x8] ss:$16 sps:$4 sm:$0xff]  }
  0x43   :  { %850 = vmatpush1.bf16.msra.mxu0 %v1270_v4  ;;  %936 = vmatpush1.bf16.msra.mxu1 %v1273_v5 }
  0x44   :  { %851 = vmatprep.subr.bf16.mxu0 %v1278_v6  ;;  %937 = vmatprep.subr.bf16.mxu1 %v1281_v7 }
  0x45   :  { %881 = vmatprep.mubr.bf16.mxu0 %v1368_v28  ;;  %967 = vmatprep.mubr.bf16.mxu1 %v1368_v28 }
  0x47   :  { %852 = vmatpush1.bf16.msra.mxu0 %v1276_v8  ;;  %938 = vmatpush1.bf16.msra.mxu1 %v1279_v9 }
  0x48   :  { %853 = vmatprep.subr.bf16.mxu0 %v1284_v10  ;;  %939 = vmatprep.subr.bf16.mxu1 %v1287_v11 }
  0x4b   :  { %854 = vmatpush1.bf16.msra.mxu0 %v1282_v12  ;;  %940 = vmatpush1.bf16.msra.mxu1 %v1285_v13 }
  0x4c   :  { %855 = vmatprep.subr.bf16.mxu0 %v1290_v14  ;;  %941 = vmatprep.subr.bf16.mxu1 %v1293_v15 }
  0x4f   :  { %856 = vmatpush1.bf16.msra.mxu0 %v1288_v16  ;;  %942 = vmatpush1.bf16.msra.mxu1 %v1291_v17 }
  0x50   :  { %857 = vmatprep.subr.bf16.mxu0 %v1296_v18  ;;  %943 = vmatprep.subr.bf16.mxu1 %v1299_v19 }
  0x53   :  { %858 = vmatpush1.bf16.msra.mxu0 %v1294_v20  ;;  %944 = vmatpush1.bf16.msra.mxu1 %v1297_v21 }
  0x54   :  { %859 = vmatprep.subr.bf16.mxu0 %v1302_v22  ;;  %945 = vmatprep.subr.bf16.mxu1 %v1305_v23 }
  0x57   :  { %860 = vmatpush1.bf16.msra.mxu0 %v1300_v24  ;;  %946 = vmatpush1.bf16.msra.mxu1 %v1303_v25 }
  0x58   :  { %861 = vmatprep.subr.bf16.mxu0 %v1308_v26  ;;  %947 = vmatprep.subr.bf16.mxu1 %v1311_v27 }
  0x5b   :  { %862 = vmatpush1.bf16.msra.mxu0 %v1306_v29  ;;  %948 = vmatpush1.bf16.msra.mxu1 %v1309_v30 }
  0x5c   :  { %863 = vmatprep.subr.bf16.mxu0 %v1314_v31  ;;  %949 = vmatprep.subr.bf16.mxu1 %v1317_v32 }
  0x5f   :  { %864 = vmatpush1.bf16.msra.mxu0 %v1312_v33  ;;  %950 = vmatpush1.bf16.msra.mxu1 %v1315_v34 }
  0x60   :  { %865 = vmatprep.subr.bf16.mxu0 %v1320_v35  ;;  %951 = vmatprep.subr.bf16.mxu1 %v1323_v36 }
  0x63   :  { %866 = vmatpush1.bf16.msra.mxu0 %v1318_v37  ;;  %952 = vmatpush1.bf16.msra.mxu1 %v1321_v38 }
  0x64   :  { %867 = vmatprep.subr.bf16.mxu0 %v1326_v39  ;;  %953 = vmatprep.subr.bf16.mxu1 %v1329_v40 }
  0x67   :  { %868 = vmatpush1.bf16.msra.mxu0 %v1324_v41  ;;  %954 = vmatpush1.bf16.msra.mxu1 %v1327_v42 }
  0x68   :  { %869 = vmatprep.subr.bf16.mxu0 %v1332_v43  ;;  %955 = vmatprep.subr.bf16.mxu1 %v1335_v44 }
  0x6b   :  { %870 = vmatpush1.bf16.msra.mxu0 %v1330_v45  ;;  %956 = vmatpush1.bf16.msra.mxu1 %v1333_v46 }
  0x6c   :  { %871 = vmatprep.subr.bf16.mxu0 %v1338_v47  ;;  %957 = vmatprep.subr.bf16.mxu1 %v1341_v48 }
  0x6f   :  { %872 = vmatpush1.bf16.msra.mxu0 %v1336_v49  ;;  %958 = vmatpush1.bf16.msra.mxu1 %v1339_v50 }
  0x70   :  { %873 = vmatprep.subr.bf16.mxu0 %v1344_v51  ;;  %959 = vmatprep.subr.bf16.mxu1 %v1347_v52 }
  0x73   :  { %874 = vmatpush1.bf16.msra.mxu0 %v1342_v53  ;;  %960 = vmatpush1.bf16.msra.mxu1 %v1345_v54 }
  0x74   :  { %875 = vmatprep.subr.bf16.mxu0 %v1350_v55  ;;  %961 = vmatprep.subr.bf16.mxu1 %v1353_v56 }
  0x77   :  { %876 = vmatpush1.bf16.msra.mxu0 %v1348_v57  ;;  %962 = vmatpush1.bf16.msra.mxu1 %v1351_v58 }
  0x78   :  { %877 = vmatprep.subr.bf16.mxu0 %v1356_v59  ;;  %963 = vmatprep.subr.bf16.mxu1 %v1359_v60 }
  0x7b   :  { %878 = vmatpush1.bf16.msra.mxu0 %v1354_v61  ;;  %964 = vmatpush1.bf16.msra.mxu1 %v1357_v62 }
  0x7c   :  { %879 = vmatprep.subr.bf16.mxu0 %v1362_v63  ;;  %965 = vmatprep.subr.bf16.mxu1 %v1365_v0 }
  0x7f   :  { %880 = vmatpush1.bf16.msra.mxu0 %v1360_v1  ;;  %966 = vmatpush1.bf16.msra.mxu1 %v1363_v2 }
  0x82   :  { %882 = vmatmul.mubr.bf16.vlgmr.msra.gmra.mrb[0].mxu0 %v1366_v3  ;;  %968 = vmatmul.mubr.bf16.vlgmr.msra.gmra.mrb[0].mxu1 %v1366_v3 }
 0x155   :  { %v883_v4 = vpop.f32.mrb[0].mxu0  ;;  %v969_v5 = vpop.f32.mrb[0].mxu1 }
 0x156   :  { %v991_v6 = vmul.f32 %v883_v4, %v883_v4  ;;  %1011 = vst [vmem:[%s1828_s2] sm:$0xff] %v883_v4  ;;  %1013 = vst [vmem:[%s1828_s2 + $0x10] sm:$0xff] %v969_v5  ;;  %v885_v7 = vpop.f32.mrb[1].mxu0  ;;  %v971_v8 = vpop.f32.mrb[1].mxu1  ;;  %v993_v19 = vmul.f32 %v969_v5, %v969_v5 }
 0x157   :  { %v978_v9 = vadd.f32 %v885_v7, %v883_v4  ;;  %v992_v10 = vmul.f32 %v885_v7, %v885_v7  ;;  %1012 = vst [vmem:[%s1828_s2 + $0x8] sm:$0xff] %v885_v7  ;;  %1014 = vst [vmem:[%s1828_s2 + $0x18] sm:$0xff] %v971_v8  ;;  %v887_v11 = vpop.f32.mrb[2].mxu0  ;;  %v973_v12 = vpop.f32.mrb[2].mxu1  ;;  %v994_v25 = vmul.f32 %v971_v8, %v971_v8 }
 0x158   :  { %v995_v13 = vmul.f32 %v887_v11, %v887_v11  ;;  %1015 = vst [vmem:[%s1828_s2 + $0x20] sm:$0xff] %v887_v11  ;;  %1017 = vst [vmem:[%s1828_s2 + $0x30] sm:$0xff] %v973_v12  ;;  %v889_v14 = vpop.f32.mrb[3].mxu0  ;;  %v975_v15 = vpop.f32.mrb[3].mxu1  ;;  %v997_v21 = vmul.f32 %v973_v12, %v973_v12 }
 0x159   :  { %v983_v16 = vadd.f32 %v889_v14, %v887_v11  ;;  %v996_v17 = vmul.f32 %v889_v14, %v889_v14  ;;  %1016 = vst [vmem:[%s1828_s2 + $0x28] sm:$0xff] %v889_v14  ;;  %1018 = vst [vmem:[%s1828_s2 + $0x38] sm:$0xff] %v975_v15  ;;  %v979_v18 = vadd.f32 %v978_v9, %v969_v5 }
 0x15a   :  { %v999_v20 = vadd.f32 %v992_v10, %v991_v6  ;;  %v998_v27 = vmul.f32 %v975_v15, %v975_v15 }
 0x15b   :  { %v1004_v22 = vadd.f32 %v996_v17, %v995_v13  ;;  %v980_v23 = vadd.f32 %v979_v18, %v971_v8  ;;  %v984_v24 = vadd.f32 %v983_v16, %v973_v12 }
 0x15c   :  { %v1000_v26 = vadd.f32 %v999_v20, %v993_v19 }
 0x15d   :  { %981 = vadd.xlane.f32.xlu0 %v980_v23  ;;  %v985_v28 = vadd.f32 %v984_v24, %v975_v15  ;;  %v1005_v29 = vadd.f32 %v1004_v22, %v997_v21 }
 0x15e   :  { %v1001_v30 = vadd.f32 %v1000_v26, %v994_v25 }
 0x15f   :  { %v1006_v31 = vadd.f32 %v1005_v29, %v998_v27 }
 0x160   :  { %1002 = vadd.xlane.f32.xlu1 %v1001_v30 }
 0x161   :  { %986 = vadd.xlane.f32.xlu0 %v985_v28 }
 0x164   :  { %1007 = vadd.xlane.f32.xlu1 %v1006_v31 }
 0x1ea   :  { %v982_v32 = vpop.xlane.xlu0 %981 }
 0x1eb   :  { %989 = vst.msk [vmem:[%s1829_s3] sm:$0xff] %vm988_vm0, %v982_v32 }
 0x1ed   :  { %v1003_v33 = vpop.xlane.xlu1 %1002 }
 0x1ee   :  { %1009 = vst.msk [vmem:[%s1830_s4] sm:$0xff] %vm988_vm0, %v1003_v33  ;;  %v987_v34 = vpop.xlane.xlu0 %986 }
 0x1ef   :  { %990 = vst.msk [vmem:[%s1829_s3 + $0x8] sm:$0xff] %vm988_vm0, %v987_v34 }
 0x1f1   :  { %v1008_v35 = vpop.xlane.xlu1 %1007 }
 0x1f2   :  { %1010 = vst.msk [vmem:[%s1830_s4 + $0x8] sm:$0xff] %vm988_vm0, %v1008_v35 }

// kernel: generator_forward.15
= control target key start
LH: loop header
LB: loop body
LE: loop exit
PB: predicated region body
PF: predicated region fallthrough
CT: control target
= control target key end

     0   :  { %s1817_s15 = smov 0   ;;  %s1819_s16 = smov 0   ;;  %s2299_s0 = inlined_call_operand.vmem [shape: bf16[8,256], index: 0, kind: input, shape index: {}]   ;;  %s2300_s1 = inlined_call_operand.vmem [shape: bf16[256,2048], index: 1, kind: input, shape index: {}]   ;;  %s2301_s2 = inlined_call_operand.vmem [shape: f32[8,2048], index: 2, kind: output, shape index: {0}]   ;;  %s2302_s3 = inlined_call_operand.vmem [shape: f32[2,8,1], index: 3, kind: output, shape index: {1}]   ;;  %s2303_s4 = inlined_call_operand.vmem [shape: f32[2,8,1], index: 4, kind: output, shape index: {2}]  }
   0x1   :  { %s1821_s17 = smov 0  }
   0x2 LB: > { %s1833_s18 = sadd.s32 4294967295, %s1790_s17   ;;  %s1836_s19 = sadd.s32 1, %s1790_s17   ;;  %s1790_s17 = sphi %s1821_s17, %s2306_s17   ;;  %s1786_s16 = sphi %s1819_s16, %s2305_s16   ;;  %s1782_s15 = sphi %s1817_s15, %s2304_s15  }
   0x3   : > { %s40_s20 = ssub.s32 %s1790_s17, %s1836_s19  ;;  %s43_s21 = sadd.s32 1, %s1786_s16 }
   0x4   : > { %p41_p0 = scmp.eq.s32.totalorder %s40_s20, 0  ;;  %p50_p1 = scmp.ne.s32.totalorder %s1786_s16, %s1782_s15 }
   0x5   : > { %p51_p2 = scmp.eq.s32.totalorder %s1790_s17, 0  ;;  %p1599_p4 = scmp.ge.s32.totalorder %s1790_s17, 2 }
   0x6   : > { %s1845_s22 = scalar_select %p41_p0, %s1786_s16, %s43_s21  }
   0x7   : > { %p52_p3 = por %p51_p2, %p50_p1  ;;  %157 = sbr.rel (%p1599_p4) target bundleno = 82 (0x52), region = 20 }
   0xe   : > { %160 = sbr.rel (!%p52_p3) target bundleno = 82 (0x52), region = 24  ;;  %s162_s23 = sand.u32 (%p52_p3), 1, %s1786_s16  }
   0xf   : > { %s1741_s24 = sshll.u32 (%p52_p3), %s1790_s17, 5  ;;  %s1600_s25 = sshll.u32 (%p52_p3), %s162_s23, 10 }
  0x10   : > { %s1853_s28 = scalar_lea.vmem (%p52_p3), %s2300_s1, %s1741_s24  ;;  %s1858_s29 = scalar_lea.vmem (%p52_p3), [#allocation2], %s1600_s25 }
  0x11   : > { %v180_v0 = vld [vmem:[%s1853_s28] sm:$0xff] (%p52_p3)  ;;  %v182_v1 = vld [vmem:[%s1853_s28 + $0x8] sm:$0xff] (%p52_p3)  ;;  %v184_v2 = vld [vmem:[%s1853_s28 + $0x10] sm:$0xff] (%p52_p3) }
  0x12   : > { %181 = vst [vmem:[%s1858_s29] sm:$0xff] (%p52_p3), %v180_v0  ;;  %183 = vst [vmem:[%s1858_s29 + $0x8] sm:$0xff] (%p52_p3), %v182_v1  ;;  %v186_v3 = vld [vmem:[%s1853_s28 + $0x18] sm:$0xff] (%p52_p3)  ;;  %v188_v4 = vld [vmem:[%s1853_s28 + $0x40] sm:$0xff] (%p52_p3) }
  0x13   : > { %185 = vst [vmem:[%s1858_s29 + $0x10] sm:$0xff] (%p52_p3), %v184_v2  ;;  %v190_v5 = vld [vmem:[%s1853_s28 + $0x48] sm:$0xff] (%p52_p3)  ;;  %187 = vst [vmem:[%s1858_s29 + $0x18] sm:$0xff] (%p52_p3), %v186_v3  ;;  %v192_v6 = vld [vmem:[%s1853_s28 + $0x50] sm:$0xff] (%p52_p3) }
  0x14   : > { %189 = vst [vmem:[%s1858_s29 + $0x20] sm:$0xff] (%p52_p3), %v188_v4  ;;  %191 = vst [vmem:[%s1858_s29 + $0x28] sm:$0xff] (%p52_p3), %v190_v5  ;;  %v194_v7 = vld [vmem:[%s1853_s28 + $0x58] sm:$0xff] (%p52_p3)  ;;  %v196_v8 = vld [vmem:[%s1853_s28 + $0x80] sm:$0xff] (%p52_p3) }
  0x15   : > { %193 = vst [vmem:[%s1858_s29 + $0x30] sm:$0xff] %v192_v6  ;;  %195 = vst [vmem:[%s1858_s29 + $0x38] sm:$0xff] %v194_v7  ;;  %v198_v9 = vld [vmem:[%s1853_s28 + $0x88] sm:$0xff]  ;;  %v200_v10 = vld [vmem:[%s1853_s28 + $0x90] sm:$0xff] }
  0x16   : > { %197 = vst [vmem:[%s1858_s29 + $0x40] sm:$0xff] %v196_v8  ;;  %v202_v11 = vld [vmem:[%s1853_s28 + $0x98] sm:$0xff]  ;;  %199 = vst [vmem:[%s1858_s29 + $0x48] sm:$0xff] %v198_v9  ;;  %v204_v12 = vld [vmem:[%s1853_s28 + $0xc0] sm:$0xff] }
  0x17   : > { %201 = vst [vmem:[%s1858_s29 + $0x50] sm:$0xff] %v200_v10  ;;  %203 = vst [vmem:[%s1858_s29 + $0x58] sm:$0xff] %v202_v11  ;;  %v206_v13 = vld [vmem:[%s1853_s28 + $0xc8] sm:$0xff]  ;;  %v208_v14 = vld [vmem:[%s1853_s28 + $0xd0] sm:$0xff] }
  0x18   : > { %205 = vst [vmem:[%s1858_s29 + $0x60] sm:$0xff] %v204_v12  ;;  %207 = vst [vmem:[%s1858_s29 + $0x68] sm:$0xff] %v206_v13  ;;  %v210_v15 = vld [vmem:[%s1853_s28 + $0xd8] sm:$0xff]  ;;  %v212_v16 = vld [vmem:[%s1853_s28 + $0x100] sm:$0xff] }
  0x19   : > { %209 = vst [vmem:[%s1858_s29 + $0x70] sm:$0xff] %v208_v14  ;;  %v214_v17 = vld [vmem:[%s1853_s28 + $0x108] sm:$0xff]  ;;  %211 = vst [vmem:[%s1858_s29 + $0x78] sm:$0xff] %v210_v15  ;;  %v216_v18 = vld [vmem:[%s1853_s28 + $0x110] sm:$0xff] }
  0x1a   : > { %213 = vst [vmem:[%s1858_s29 + $0x80] sm:$0xff] %v212_v16  ;;  %215 = vst [vmem:[%s1858_s29 + $0x88] sm:$0xff] %v214_v17  ;;  %v218_v19 = vld [vmem:[%s1853_s28 + $0x118] sm:$0xff]  ;;  %v220_v20 = vld [vmem:[%s1853_s28 + $0x140] sm:$0xff] }
  0x1b   : > { %217 = vst [vmem:[%s1858_s29 + $0x90] sm:$0xff] %v216_v18  ;;  %219 = vst [vmem:[%s1858_s29 + $0x98] sm:$0xff] %v218_v19  ;;  %v222_v21 = vld [vmem:[%s1853_s28 + $0x148] sm:$0xff]  ;;  %v224_v22 = vld [vmem:[%s1853_s28 + $0x150] sm:$0xff] }
  0x1c   : > { %221 = vst [vmem:[%s1858_s29 + $0xa0] sm:$0xff] %v220_v20  ;;  %v226_v23 = vld [vmem:[%s1853_s28 + $0x158] sm:$0xff]  ;;  %223 = vst [vmem:[%s1858_s29 + $0xa8] sm:$0xff] %v222_v21  ;;  %v228_v24 = vld [vmem:[%s1853_s28 + $0x180] sm:$0xff] }
  0x1d   : > { %225 = vst [vmem:[%s1858_s29 + $0xb0] sm:$0xff] %v224_v22  ;;  %227 = vst [vmem:[%s1858_s29 + $0xb8] sm:$0xff] %v226_v23  ;;  %v230_v25 = vld [vmem:[%s1853_s28 + $0x188] sm:$0xff]  ;;  %v232_v26 = vld [vmem:[%s1853_s28 + $0x190] sm:$0xff] }
  0x1e   : > { %229 = vst [vmem:[%s1858_s29 + $0xc0] sm:$0xff] %v228_v24  ;;  %231 = vst [vmem:[%s1858_s29 + $0xc8] sm:$0xff] %v230_v25  ;;  %v234_v27 = vld [vmem:[%s1853_s28 + $0x198] sm:$0xff]  ;;  %v236_v28 = vld [vmem:[%s1853_s28 + $0x1c0] sm:$0xff] }
  0x1f   : > { %233 = vst [vmem:[%s1858_s29 + $0xd0] sm:$0xff] %v232_v26  ;;  %v238_v29 = vld [vmem:[%s1853_s28 + $0x1c8] sm:$0xff]  ;;  %235 = vst [vmem:[%s1858_s29 + $0xd8] sm:$0xff] %v234_v27  ;;  %v240_v30 = vld [vmem:[%s1853_s28 + $0x1d0] sm:$0xff] }
  0x20   : > { %237 = vst [vmem:[%s1858_s29 + $0xe0] sm:$0xff] %v236_v28  ;;  %239 = vst [vmem:[%s1858_s29 + $0xe8] sm:$0xff] %v238_v29  ;;  %v242_v31 = vld [vmem:[%s1853_s28 + $0x1d8] sm:$0xff]  ;;  %v244_v32 = vld [vmem:[%s1853_s28 + $0x200] sm:$0xff] }
  0x21   : > { %241 = vst [vmem:[%s1858_s29 + $0xf0] sm:$0xff] %v240_v30  ;;  %243 = vst [vmem:[%s1858_s29 + $0xf8] sm:$0xff] %v242_v31  ;;  %v246_v33 = vld [vmem:[%s1853_s28 + $0x208] sm:$0xff]  ;;  %v248_v34 = vld [vmem:[%s1853_s28 + $0x210] sm:$0xff] }
  0x22   : > { %245 = vst [vmem:[%s1858_s29 + $0x100] sm:$0xff] %v244_v32  ;;  %v250_v35 = vld [vmem:[%s1853_s28 + $0x218] sm:$0xff]  ;;  %247 = vst [vmem:[%s1858_s29 + $0x108] sm:$0xff] %v246_v33  ;;  %v252_v36 = vld [vmem:[%s1853_s28 + $0x240] sm:$0xff] }
  0x23   : > { %249 = vst [vmem:[%s1858_s29 + $0x110] sm:$0xff] %v248_v34  ;;  %251 = vst [vmem:[%s1858_s29 + $0x118] sm:$0xff] %v250_v35  ;;  %v254_v37 = vld [vmem:[%s1853_s28 + $0x248] sm:$0xff]  ;;  %v256_v38 = vld [vmem:[%s1853_s28 + $0x250] sm:$0xff] }
  0x24   : > { %253 = vst [vmem:[%s1858_s29 + $0x120] sm:$0xff] %v252_v36  ;;  %255 = vst [vmem:[%s1858_s29 + $0x128] sm:$0xff] %v254_v37  ;;  %v258_v39 = vld [vmem:[%s1853_s28 + $0x258] sm:$0xff]  ;;  %v260_v40 = vld [vmem:[%s1853_s28 + $0x280] sm:$0xff] }
  0x25   : > { %257 = vst [vmem:[%s1858_s29 + $0x130] sm:$0xff] %v256_v38  ;;  %v262_v41 = vld [vmem:[%s1853_s28 + $0x288] sm:$0xff]  ;;  %259 = vst [vmem:[%s1858_s29 + $0x138] sm:$0xff] %v258_v39  ;;  %v264_v42 = vld [vmem:[%s1853_s28 + $0x290] sm:$0xff] }
  0x26   : > { %261 = vst [vmem:[%s1858_s29 + $0x140] sm:$0xff] %v260_v40  ;;  %263 = vst [vmem:[%s1858_s29 + $0x148] sm:$0xff] %v262_v41  ;;  %v266_v43 = vld [vmem:[%s1853_s28 + $0x298] sm:$0xff]  ;;  %v268_v44 = vld [vmem:[%s1853_s28 + $0x2c0] sm:$0xff] }
  0x27   : > { %265 = vst [vmem:[%s1858_s29 + $0x150] sm:$0xff] %v264_v42  ;;  %267 = vst [vmem:[%s1858_s29 + $0x158] sm:$0xff] %v266_v43  ;;  %v270_v45 = vld [vmem:[%s1853_s28 + $0x2c8] sm:$0xff]  ;;  %v272_v46 = vld [vmem:[%s1853_s28 + $0x2d0] sm:$0xff] }
  0x28   : > { %269 = vst [vmem:[%s1858_s29 + $0x160] sm:$0xff] %v268_v44  ;;  %v274_v47 = vld [vmem:[%s1853_s28 + $0x2d8] sm:$0xff]  ;;  %271 = vst [vmem:[%s1858_s29 + $0x168] sm:$0xff] %v270_v45  ;;  %v276_v48 = vld [vmem:[%s1853_s28 + $0x300] sm:$0xff] }
  0x29   : > { %273 = vst [vmem:[%s1858_s29 + $0x170] sm:$0xff] %v272_v46  ;;  %275 = vst [vmem:[%s1858_s29 + $0x178] sm:$0xff] %v274_v47  ;;  %v278_v49 = vld [vmem:[%s1853_s28 + $0x308] sm:$0xff]  ;;  %v280_v50 = vld [vmem:[%s1853_s28 + $0x310] sm:$0xff] }
  0x2a   : > { %277 = vst [vmem:[%s1858_s29 + $0x180] sm:$0xff] %v276_v48  ;;  %279 = vst [vmem:[%s1858_s29 + $0x188] sm:$0xff] %v278_v49  ;;  %v282_v51 = vld [vmem:[%s1853_s28 + $0x318] sm:$0xff]  ;;  %v284_v52 = vld [vmem:[%s1853_s28 + $0x340] sm:$0xff] }
  0x2b   : > { %281 = vst [vmem:[%s1858_s29 + $0x190] sm:$0xff] %v280_v50  ;;  %v286_v53 = vld [vmem:[%s1853_s28 + $0x348] sm:$0xff]  ;;  %283 = vst [vmem:[%s1858_s29 + $0x198] sm:$0xff] %v282_v51  ;;  %v288_v54 = vld [vmem:[%s1853_s28 + $0x350] sm:$0xff] }
  0x2c   : > { %285 = vst [vmem:[%s1858_s29 + $0x1a0] sm:$0xff] %v284_v52  ;;  %287 = vst [vmem:[%s1858_s29 + $0x1a8] sm:$0xff] %v286_v53  ;;  %v290_v55 = vld [vmem:[%s1853_s28 + $0x358] sm:$0xff]  ;;  %v292_v56 = vld [vmem:[%s1853_s28 + $0x380] sm:$0xff] }
  0x2d   : > { %289 = vst [vmem:[%s1858_s29 + $0x1b0] sm:$0xff] %v288_v54  ;;  %291 = vst [vmem:[%s1858_s29 + $0x1b8] sm:$0xff] %v290_v55  ;;  %v294_v57 = vld [vmem:[%s1853_s28 + $0x388] sm:$0xff]  ;;  %v296_v58 = vld [vmem:[%s1853_s28 + $0x390] sm:$0xff] }
  0x2e   : > { %293 = vst [vmem:[%s1858_s29 + $0x1c0] sm:$0xff] %v292_v56  ;;  %v298_v59 = vld [vmem:[%s1853_s28 + $0x398] sm:$0xff]  ;;  %295 = vst [vmem:[%s1858_s29 + $0x1c8] sm:$0xff] %v294_v57  ;;  %v300_v60 = vld [vmem:[%s1853_s28 + $0x3c0] sm:$0xff] }
  0x2f   : > { %297 = vst [vmem:[%s1858_s29 + $0x1d0] sm:$0xff] %v296_v58  ;;  %299 = vst [vmem:[%s1858_s29 + $0x1d8] sm:$0xff] %v298_v59  ;;  %v302_v61 = vld [vmem:[%s1853_s28 + $0x3c8] sm:$0xff]  ;;  %v304_v62 = vld [vmem:[%s1853_s28 + $0x3d0] sm:$0xff] }
  0x30   : > { %301 = vst [vmem:[%s1858_s29 + $0x1e0] sm:$0xff] %v300_v60  ;;  %303 = vst [vmem:[%s1858_s29 + $0x1e8] sm:$0xff] %v302_v61  ;;  %v306_v63 = vld [vmem:[%s1853_s28 + $0x3d8] sm:$0xff]  ;;  %v308_v0 = vld [vmem:[%s1853_s28 + $0x400] sm:$0xff] }
  0x31   : > { %305 = vst [vmem:[%s1858_s29 + $0x1f0] sm:$0xff] %v304_v62  ;;  %v310_v1 = vld [vmem:[%s1853_s28 + $0x408] sm:$0xff]  ;;  %307 = vst [vmem:[%s1858_s29 + $0x1f8] sm:$0xff] %v306_v63  ;;  %v312_v2 = vld [vmem:[%s1853_s28 + $0x410] sm:$0xff] }
  0x32   : > { %309 = vst [vmem:[%s1858_s29 + $0x200] sm:$0xff] %v308_v0  ;;  %311 = vst [vmem:[%s1858_s29 + $0x208] sm:$0xff] %v310_v1  ;;  %v314_v3 = vld [vmem:[%s1853_s28 + $0x418] sm:$0xff]  ;;  %v316_v4 = vld [vmem:[%s1853_s28 + $0x440] sm:$0xff] }
  0x33   : > { %313 = vst [vmem:[%s1858_s29 + $0x210] sm:$0xff] %v312_v2  ;;  %315 = vst [vmem:[%s1858_s29 + $0x218] sm:$0xff] %v314_v3  ;;  %v318_v5 = vld [vmem:[%s1853_s28 + $0x448] sm:$0xff]  ;;  %v320_v6 = vld [vmem:[%s1853_s28 + $0x450] sm:$0xff] }
  0x34   : > { %317 = vst [vmem:[%s1858_s29 + $0x220] sm:$0xff] %v316_v4  ;;  %v322_v7 = vld [vmem:[%s1853_s28 + $0x458] sm:$0xff]  ;;  %319 = vst [vmem:[%s1858_s29 + $0x228] sm:$0xff] %v318_v5  ;;  %v324_v8 = vld [vmem:[%s1853_s28 + $0x480] sm:$0xff] }
  0x35   : > { %321 = vst [vmem:[%s1858_s29 + $0x230] sm:$0xff] %v320_v6  ;;  %323 = vst [vmem:[%s1858_s29 + $0x238] sm:$0xff] %v322_v7  ;;  %v326_v9 = vld [vmem:[%s1853_s28 + $0x488] sm:$0xff]  ;;  %v328_v10 = vld [vmem:[%s1853_s28 + $0x490] sm:$0xff] }
  0x36   : > { %325 = vst [vmem:[%s1858_s29 + $0x240] sm:$0xff] %v324_v8  ;;  %327 = vst [vmem:[%s1858_s29 + $0x248] sm:$0xff] %v326_v9  ;;  %v330_v11 = vld [vmem:[%s1853_s28 + $0x498] sm:$0xff]  ;;  %v332_v12 = vld [vmem:[%s1853_s28 + $0x4c0] sm:$0xff] }
  0x37   : > { %329 = vst [vmem:[%s1858_s29 + $0x250] sm:$0xff] %v328_v10  ;;  %v334_v13 = vld [vmem:[%s1853_s28 + $0x4c8] sm:$0xff]  ;;  %331 = vst [vmem:[%s1858_s29 + $0x258] sm:$0xff] %v330_v11  ;;  %v336_v14 = vld [vmem:[%s1853_s28 + $0x4d0] sm:$0xff] }
  0x38   : > { %333 = vst [vmem:[%s1858_s29 + $0x260] sm:$0xff] %v332_v12  ;;  %335 = vst [vmem:[%s1858_s29 + $0x268] sm:$0xff] %v334_v13  ;;  %v338_v15 = vld [vmem:[%s1853_s28 + $0x4d8] sm:$0xff]  ;;  %v340_v16 = vld [vmem:[%s1853_s28 + $0x500] sm:$0xff] }
  0x39   : > { %337 = vst [vmem:[%s1858_s29 + $0x270] sm:$0xff] %v336_v14  ;;  %339 = vst [vmem:[%s1858_s29 + $0x278] sm:$0xff] %v338_v15  ;;  %v342_v17 = vld [vmem:[%s1853_s28 + $0x508] sm:$0xff]  ;;  %v344_v18 = vld [vmem:[%s1853_s28 + $0x510] sm:$0xff] }
  0x3a   : > { %341 = vst [vmem:[%s1858_s29 + $0x280] sm:$0xff] %v340_v16  ;;  %v346_v19 = vld [vmem:[%s1853_s28 + $0x518] sm:$0xff]  ;;  %343 = vst [vmem:[%s1858_s29 + $0x288] sm:$0xff] %v342_v17  ;;  %v348_v20 = vld [vmem:[%s1853_s28 + $0x540] sm:$0xff] }
  0x3b   : > { %345 = vst [vmem:[%s1858_s29 + $0x290] sm:$0xff] %v344_v18  ;;  %347 = vst [vmem:[%s1858_s29 + $0x298] sm:$0xff] %v346_v19  ;;  %v350_v21 = vld [vmem:[%s1853_s28 + $0x548] sm:$0xff]  ;;  %v352_v22 = vld [vmem:[%s1853_s28 + $0x550] sm:$0xff] }
  0x3c   : > { %349 = vst [vmem:[%s1858_s29 + $0x2a0] sm:$0xff] %v348_v20  ;;  %351 = vst [vmem:[%s1858_s29 + $0x2a8] sm:$0xff] %v350_v21  ;;  %v354_v23 = vld [vmem:[%s1853_s28 + $0x558] sm:$0xff]  ;;  %v356_v24 = vld [vmem:[%s1853_s28 + $0x580] sm:$0xff] }
  0x3d   : > { %353 = vst [vmem:[%s1858_s29 + $0x2b0] sm:$0xff] %v352_v22  ;;  %v358_v25 = vld [vmem:[%s1853_s28 + $0x588] sm:$0xff]  ;;  %355 = vst [vmem:[%s1858_s29 + $0x2b8] sm:$0xff] %v354_v23  ;;  %v360_v26 = vld [vmem:[%s1853_s28 + $0x590] sm:$0xff] }
  0x3e   : > { %357 = vst [vmem:[%s1858_s29 + $0x2c0] sm:$0xff] %v356_v24  ;;  %359 = vst [vmem:[%s1858_s29 + $0x2c8] sm:$0xff] %v358_v25  ;;  %v362_v27 = vld [vmem:[%s1853_s28 + $0x598] sm:$0xff]  ;;  %v364_v28 = vld [vmem:[%s1853_s28 + $0x5c0] sm:$0xff] }
  0x3f   : > { %361 = vst [vmem:[%s1858_s29 + $0x2d0] sm:$0xff] %v360_v26  ;;  %363 = vst [vmem:[%s1858_s29 + $0x2d8] sm:$0xff] %v362_v27  ;;  %v366_v29 = vld [vmem:[%s1853_s28 + $0x5c8] sm:$0xff]  ;;  %v368_v30 = vld [vmem:[%s1853_s28 + $0x5d0] sm:$0xff] }
  0x40   : > { %365 = vst [vmem:[%s1858_s29 + $0x2e0] sm:$0xff] %v364_v28  ;;  %v370_v31 = vld [vmem:[%s1853_s28 + $0x5d8] sm:$0xff]  ;;  %367 = vst [vmem:[%s1858_s29 + $0x2e8] sm:$0xff] %v366_v29  ;;  %v372_v32 = vld [vmem:[%s1853_s28 + $0x600] sm:$0xff] }
  0x41   : > { %369 = vst [vmem:[%s1858_s29 + $0x2f0] sm:$0xff] %v368_v30  ;;  %371 = vst [vmem:[%s1858_s29 + $0x2f8] sm:$0xff] %v370_v31  ;;  %v374_v33 = vld [vmem:[%s1853_s28 + $0x608] sm:$0xff]  ;;  %v376_v34 = vld [vmem:[%s1853_s28 + $0x610] sm:$0xff] }
  0x42   : > { %373 = vst [vmem:[%s1858_s29 + $0x300] sm:$0xff] %v372_v32  ;;  %375 = vst [vmem:[%s1858_s29 + $0x308] sm:$0xff] %v374_v33  ;;  %v378_v35 = vld [vmem:[%s1853_s28 + $0x618] sm:$0xff]  ;;  %v380_v36 = vld [vmem:[%s1853_s28 + $0x640] sm:$0xff] }
  0x43   : > { %377 = vst [vmem:[%s1858_s29 + $0x310] sm:$0xff] %v376_v34  ;;  %v382_v37 = vld [vmem:[%s1853_s28 + $0x648] sm:$0xff]  ;;  %379 = vst [vmem:[%s1858_s29 + $0x318] sm:$0xff] %v378_v35  ;;  %v384_v38 = vld [vmem:[%s1853_s28 + $0x650] sm:$0xff] }
  0x44   : > { %381 = vst [vmem:[%s1858_s29 + $0x320] sm:$0xff] %v380_v36  ;;  %383 = vst [vmem:[%s1858_s29 + $0x328] sm:$0xff] %v382_v37  ;;  %v386_v39 = vld [vmem:[%s1853_s28 + $0x658] sm:$0xff]  ;;  %v388_v40 = vld [vmem:[%s1853_s28 + $0x680] sm:$0xff] }
  0x45   : > { %385 = vst [vmem:[%s1858_s29 + $0x330] sm:$0xff] %v384_v38  ;;  %387 = vst [vmem:[%s1858_s29 + $0x338] sm:$0xff] %v386_v39  ;;  %v390_v41 = vld [vmem:[%s1853_s28 + $0x688] sm:$0xff]  ;;  %v392_v42 = vld [vmem:[%s1853_s28 + $0x690] sm:$0xff] }
  0x46   : > { %389 = vst [vmem:[%s1858_s29 + $0x340] sm:$0xff] %v388_v40  ;;  %v394_v43 = vld [vmem:[%s1853_s28 + $0x698] sm:$0xff]  ;;  %391 = vst [vmem:[%s1858_s29 + $0x348] sm:$0xff] %v390_v41  ;;  %v396_v44 = vld [vmem:[%s1853_s28 + $0x6c0] sm:$0xff] }
  0x47   : > { %393 = vst [vmem:[%s1858_s29 + $0x350] sm:$0xff] %v392_v42  ;;  %395 = vst [vmem:[%s1858_s29 + $0x358] sm:$0xff] %v394_v43  ;;  %v398_v45 = vld [vmem:[%s1853_s28 + $0x6c8] sm:$0xff]  ;;  %v400_v46 = vld [vmem:[%s1853_s28 + $0x6d0] sm:$0xff] }
  0x48   : > { %397 = vst [vmem:[%s1858_s29 + $0x360] sm:$0xff] %v396_v44  ;;  %399 = vst [vmem:[%s1858_s29 + $0x368] sm:$0xff] %v398_v45  ;;  %v402_v47 = vld [vmem:[%s1853_s28 + $0x6d8] sm:$0xff]  ;;  %v404_v48 = vld [vmem:[%s1853_s28 + $0x700] sm:$0xff] }
  0x49   : > { %401 = vst [vmem:[%s1858_s29 + $0x370] sm:$0xff] %v400_v46  ;;  %v406_v49 = vld [vmem:[%s1853_s28 + $0x708] sm:$0xff]  ;;  %403 = vst [vmem:[%s1858_s29 + $0x378] sm:$0xff] %v402_v47  ;;  %v408_v50 = vld [vmem:[%s1853_s28 + $0x710] sm:$0xff] }
  0x4a   : > { %405 = vst [vmem:[%s1858_s29 + $0x380] sm:$0xff] %v404_v48  ;;  %407 = vst [vmem:[%s1858_s29 + $0x388] sm:$0xff] %v406_v49  ;;  %v410_v51 = vld [vmem:[%s1853_s28 + $0x718] sm:$0xff]  ;;  %v412_v52 = vld [vmem:[%s1853_s28 + $0x740] sm:$0xff] }
  0x4b   : > { %409 = vst [vmem:[%s1858_s29 + $0x390] sm:$0xff] %v408_v50  ;;  %411 = vst [vmem:[%s1858_s29 + $0x398] sm:$0xff] %v410_v51  ;;  %v414_v53 = vld [vmem:[%s1853_s28 + $0x748] sm:$0xff]  ;;  %v416_v54 = vld [vmem:[%s1853_s28 + $0x750] sm:$0xff] }
  0x4c   : > { %413 = vst [vmem:[%s1858_s29 + $0x3a0] sm:$0xff] %v412_v52  ;;  %v418_v55 = vld [vmem:[%s1853_s28 + $0x758] sm:$0xff]  ;;  %415 = vst [vmem:[%s1858_s29 + $0x3a8] sm:$0xff] %v414_v53  ;;  %v420_v56 = vld [vmem:[%s1853_s28 + $0x780] sm:$0xff] }
  0x4d   : > { %417 = vst [vmem:[%s1858_s29 + $0x3b0] sm:$0xff] %v416_v54  ;;  %419 = vst [vmem:[%s1858_s29 + $0x3b8] sm:$0xff] %v418_v55  ;;  %v422_v57 = vld [vmem:[%s1853_s28 + $0x788] sm:$0xff]  ;;  %v424_v58 = vld [vmem:[%s1853_s28 + $0x790] sm:$0xff] }
  0x4e   : > { %421 = vst [vmem:[%s1858_s29 + $0x3c0] sm:$0xff] %v420_v56  ;;  %423 = vst [vmem:[%s1858_s29 + $0x3c8] sm:$0xff] %v422_v57  ;;  %v426_v59 = vld [vmem:[%s1853_s28 + $0x798] sm:$0xff]  ;;  %v428_v60 = vld [vmem:[%s1853_s28 + $0x7c0] sm:$0xff] }
  0x4f   : > { %425 = vst [vmem:[%s1858_s29 + $0x3d0] sm:$0xff] %v424_v58  ;;  %v430_v61 = vld [vmem:[%s1853_s28 + $0x7c8] sm:$0xff]  ;;  %427 = vst [vmem:[%s1858_s29 + $0x3d8] sm:$0xff] %v426_v59  ;;  %v432_v62 = vld [vmem:[%s1853_s28 + $0x7d0] sm:$0xff] }
  0x50   : > { %429 = vst [vmem:[%s1858_s29 + $0x3e0] sm:$0xff] %v428_v60  ;;  %431 = vst [vmem:[%s1858_s29 + $0x3e8] sm:$0xff] %v430_v61  ;;  %v434_v63 = vld [vmem:[%s1853_s28 + $0x7d8] sm:$0xff] }
  0x51   : > { %433 = vst [vmem:[%s1858_s29 + $0x3f0] sm:$0xff] %v432_v62  ;;  %435 = vst [vmem:[%s1858_s29 + $0x3f8] sm:$0xff] %v434_v63 }
  0x52 PF: > { %p1603_p5 = scmp.ge.s32.totalorder %s1790_s17, 1  ;;  %p440_p6 = scmp.lt.s32.totalorder %s1790_s17, 3 }
  0x54   : > { %p441_p7 = pnand %p1603_p5, %p440_p6 }
  0x55   : > { %s447_s30 = sand.u32 (!%p441_p7), 1, %s1782_s15   ;;  %v2119_v0 = vld [vmem:[%s2299_s0] sm:$0xff] (!%p441_p7)  ;;  %s1605_s9 = sshll.u32 (!%p441_p7), %s1833_s18, 3  ;;  %vm1444_vm0 = vcmask (!%p441_p7), 7168  }
  0x56   : > { %444 = sbr.rel (%p441_p7) target bundleno = 587 (0x24b), region = 47  ;;  %s1604_s7 = sshll.u32 (!%p441_p7), %s447_s30, 10  ;;  %v2123_v1 = vcombine.high (!%p441_p7), %v2119_v0, %v2119_v0 }
  0x57   : > { %s2125_s8 = scalar_lea.vmem (!%p441_p7), [#allocation2], %s1604_s7  ;;  %p482_p8 = scmp.lt.s32.totalorder (!%p441_p7), %s1605_s9, 15 }
  0x58   : > { %v496_v2 = vld [vmem:[%s2125_s8] sm:$0xff] (!%p441_p7)  ;;  %v497_v4 = vld [vmem:[%s2125_s8 + $0x8] sm:$0xff] (!%p441_p7)  ;;  %1303 = vmatprep.mubr.bf16.mxu0 (!%p441_p7), %v2123_v1  ;;  %1344 = vmatprep.mubr.bf16.mxu1 (!%p441_p7), %v2123_v1  ;;  %p487_p9 = scmp.lt.s32.totalorder (!%p441_p7), %s1833_s18, 1 }
  0x59   : > { %v500_v3 = vld [vmem:[%s2125_s8 + $0x20] sm:$0xff] (!%p441_p7)  ;;  %v501_v7 = vld [vmem:[%s2125_s8 + $0x28] sm:$0xff] (!%p441_p7) }
  0x5a   : > { %v1612_v5 = vcombine.high (!%p441_p7), %v496_v2, %v500_v3  ;;  %v1611_v6 = vcombine.low (!%p441_p7), %v496_v2, %v500_v3  ;;  %v504_v8 = vld [vmem:[%s2125_s8 + $0x40] sm:$0xff] (!%p441_p7)  ;;  %v1614_v10 = vcombine.high (!%p441_p7), %v497_v4, %v501_v7  ;;  %v1613_v11 = vcombine.low (!%p441_p7), %v497_v4, %v501_v7  ;;  %v505_v13 = vld [vmem:[%s2125_s8 + $0x48] sm:$0xff] (!%p441_p7) }
  0x5b   : > { %v508_v9 = vld [vmem:[%s2125_s8 + $0x60] sm:$0xff] (!%p441_p7)  ;;  %v509_v14 = vld [vmem:[%s2125_s8 + $0x68] sm:$0xff] (!%p441_p7) }
  0x5c   : > { %v1620_v12 = vcombine.high (!%p441_p7), %v504_v8, %v508_v9  ;;  %v512_v15 = vld [vmem:[%s2125_s8 + $0x80] sm:$0xff] (!%p441_p7)  ;;  %1271 = vmatprep.subr.bf16.mxu0 (!%p441_p7), %v1612_v5  ;;  %v1622_v16 = vcombine.high (!%p441_p7), %v505_v13, %v509_v14  ;;  %v513_v18 = vld [vmem:[%s2125_s8 + $0x88] sm:$0xff] (!%p441_p7)  ;;  %1312 = vmatprep.subr.bf16.mxu1 (!%p441_p7), %v1614_v10  ;;  %v1619_v20 = vcombine.low (!%p441_p7), %v504_v8, %v508_v9 }
  0x5d   : > { %v516_v17 = vld [vmem:[%s2125_s8 + $0xa0] sm:$0xff]  ;;  %v517_v19 = vld [vmem:[%s2125_s8 + $0xa8] sm:$0xff]  ;;  %1272 = vmatpush1.bf16.msra.mxu0 %v1611_v6  ;;  %1313 = vmatpush1.bf16.msra.mxu1 %v1613_v11  ;;  %v1621_v21 = vcombine.low %v505_v13, %v509_v14  ;;  %s2308_s9 = smov (!%p482_p8, %s1605_s9), 15  ;;  %s2310_s18 = smov (!%p487_p9, %s1833_s18), 1 }
  0x5e   : > { %1273 = vmatprep.subr.bf16.mxu0 %v1620_v12  ;;  %v1628_v22 = vcombine.high %v512_v15, %v516_v17  ;;  %1314 = vmatprep.subr.bf16.mxu1 %v1622_v16  ;;  %v1630_v23 = vcombine.high %v513_v18, %v517_v19  ;;  %v520_v24 = vld [vmem:[%s2125_s8 + $0xc0] sm:$0xff]  ;;  %v521_v26 = vld [vmem:[%s2125_s8 + $0xc8] sm:$0xff]  ;;  %v1627_v28 = vcombine.low %v512_v15, %v516_v17  ;;  %s1606_s10 = sshll.u32 %s2308_s9, 3  ;;  %s1607_s14 = sshll.u32 %s2310_s18, 3 }
  0x5f   : > { %v524_v25 = vld [vmem:[%s2125_s8 + $0xe0] sm:$0xff]  ;;  %v525_v27 = vld [vmem:[%s2125_s8 + $0xe8] sm:$0xff]  ;;  %v1629_v29 = vcombine.low %v513_v18, %v517_v19  ;;  %s2271_s13 = scalar_lea.vmem %s2301_s2, %s1606_s10  ;;  %s490_s20 = scalar_lea.vmem %s2302_s3, %s1607_s14 }
  0x60   : > { %v1636_v30 = vcombine.high %v520_v24, %v524_v25  ;;  %v1638_v31 = vcombine.high %v521_v26, %v525_v27  ;;  %v528_v32 = vld [vmem:[%s2125_s8 + $0x100] sm:$0xff]  ;;  %v529_v34 = vld [vmem:[%s2125_s8 + $0x108] sm:$0xff]  ;;  %v1635_v36 = vcombine.low %v520_v24, %v524_v25  ;;  %v1637_v37 = vcombine.low %v521_v26, %v525_v27  ;;  %s494_s24 = scalar_lea.vmem %s2303_s4, %s1607_s14 }
  0x61   : > { %1274 = vmatpush1.bf16.msra.mxu0 %v1619_v20  ;;  %1315 = vmatpush1.bf16.msra.mxu1 %v1621_v21  ;;  %v532_v33 = vld [vmem:[%s2125_s8 + $0x120] sm:$0xff]  ;;  %v533_v35 = vld [vmem:[%s2125_s8 + $0x128] sm:$0xff] }
  0x62   : > { %1275 = vmatprep.subr.bf16.mxu0 %v1628_v22  ;;  %1316 = vmatprep.subr.bf16.mxu1 %v1630_v23  ;;  %v1644_v38 = vcombine.high %v528_v32, %v532_v33  ;;  %v1646_v39 = vcombine.high %v529_v34, %v533_v35  ;;  %v536_v40 = vld [vmem:[%s2125_s8 + $0x140] sm:$0xff]  ;;  %v537_v42 = vld [vmem:[%s2125_s8 + $0x148] sm:$0xff]  ;;  %v1643_v44 = vcombine.low %v528_v32, %v532_v33 }
  0x63   : > { %v540_v41 = vld [vmem:[%s2125_s8 + $0x160] sm:$0xff]  ;;  %v541_v43 = vld [vmem:[%s2125_s8 + $0x168] sm:$0xff]  ;;  %v1645_v45 = vcombine.low %v529_v34, %v533_v35 }
  0x64   : > { %v1652_v46 = vcombine.high %v536_v40, %v540_v41  ;;  %v1654_v47 = vcombine.high %v537_v42, %v541_v43  ;;  %v544_v48 = vld [vmem:[%s2125_s8 + $0x180] sm:$0xff]  ;;  %v545_v50 = vld [vmem:[%s2125_s8 + $0x188] sm:$0xff]  ;;  %v1651_v52 = vcombine.low %v536_v40, %v540_v41  ;;  %v1653_v53 = vcombine.low %v537_v42, %v541_v43 }
  0x65   : > { %1276 = vmatpush1.bf16.msra.mxu0 %v1627_v28  ;;  %1317 = vmatpush1.bf16.msra.mxu1 %v1629_v29  ;;  %v548_v49 = vld [vmem:[%s2125_s8 + $0x1a0] sm:$0xff]  ;;  %v549_v51 = vld [vmem:[%s2125_s8 + $0x1a8] sm:$0xff] }
  0x66   : > { %1277 = vmatprep.subr.bf16.mxu0 %v1636_v30  ;;  %1318 = vmatprep.subr.bf16.mxu1 %v1638_v31  ;;  %v1660_v54 = vcombine.high %v544_v48, %v548_v49  ;;  %v1662_v55 = vcombine.high %v545_v50, %v549_v51  ;;  %v552_v56 = vld [vmem:[%s2125_s8 + $0x1c0] sm:$0xff]  ;;  %v553_v58 = vld [vmem:[%s2125_s8 + $0x1c8] sm:$0xff]  ;;  %v1659_v60 = vcombine.low %v544_v48, %v548_v49 }
  0x67   : > { %v556_v57 = vld [vmem:[%s2125_s8 + $0x1e0] sm:$0xff]  ;;  %v557_v59 = vld [vmem:[%s2125_s8 + $0x1e8] sm:$0xff]  ;;  %v1661_v61 = vcombine.low %v545_v50, %v549_v51 }
  0x68   : > { %v1668_v62 = vcombine.high %v552_v56, %v556_v57  ;;  %v1670_v63 = vcombine.high %v553_v58, %v557_v59  ;;  %v560_v2 = vld [vmem:[%s2125_s8 + $0x200] sm:$0xff]  ;;  %v561_v4 = vld [vmem:[%s2125_s8 + $0x208] sm:$0xff]  ;;  %v1667_v6 = vcombine.low %v552_v56, %v556_v57  ;;  %v1669_v7 = vcombine.low %v553_v58, %v557_v59 }
  0x69   : > { %1278 = vmatpush1.bf16.msra.mxu0 %v1635_v36  ;;  %1319 = vmatpush1.bf16.msra.mxu1 %v1637_v37  ;;  %v564_v3 = vld [vmem:[%s2125_s8 + $0x220] sm:$0xff]  ;;  %v565_v5 = vld [vmem:[%s2125_s8 + $0x228] sm:$0xff] }
  0x6a   : > { %1279 = vmatprep.subr.bf16.mxu0 %v1644_v38  ;;  %1320 = vmatprep.subr.bf16.mxu1 %v1646_v39  ;;  %v1676_v8 = vcombine.high %v560_v2, %v564_v3  ;;  %v1678_v9 = vcombine.high %v561_v4, %v565_v5  ;;  %v568_v10 = vld [vmem:[%s2125_s8 + $0x240] sm:$0xff]  ;;  %v569_v12 = vld [vmem:[%s2125_s8 + $0x248] sm:$0xff]  ;;  %v1675_v14 = vcombine.low %v560_v2, %v564_v3 }
  0x6b   : > { %v572_v11 = vld [vmem:[%s2125_s8 + $0x260] sm:$0xff]  ;;  %v573_v13 = vld [vmem:[%s2125_s8 + $0x268] sm:$0xff]  ;;  %v1677_v15 = vcombine.low %v561_v4, %v565_v5  ;;  %v498_v4 = vld [vmem:[%s2125_s8 + $0x10] sm:$0xff] }
  0x6c   : > { %v1684_v16 = vcombine.high %v568_v10, %v572_v11  ;;  %v1686_v17 = vcombine.high %v569_v12, %v573_v13  ;;  %v576_v18 = vld [vmem:[%s2125_s8 + $0x280] sm:$0xff]  ;;  %v577_v20 = vld [vmem:[%s2125_s8 + $0x288] sm:$0xff]  ;;  %v1683_v22 = vcombine.low %v568_v10, %v572_v11  ;;  %v1685_v23 = vcombine.low %v569_v12, %v573_v13  ;;  %v502_v5 = vld [vmem:[%s2125_s8 + $0x30] sm:$0xff] }
  0x6d   : > { %1280 = vmatpush1.bf16.msra.mxu0 %v1643_v44  ;;  %1321 = vmatpush1.bf16.msra.mxu1 %v1645_v45  ;;  %v580_v19 = vld [vmem:[%s2125_s8 + $0x2a0] sm:$0xff]  ;;  %v581_v21 = vld [vmem:[%s2125_s8 + $0x2a8] sm:$0xff]  ;;  %v1616_v10 = vcombine.high %v498_v4, %v502_v5  ;;  %v506_v12 = vld [vmem:[%s2125_s8 + $0x50] sm:$0xff] }
  0x6e   : > { %1281 = vmatprep.subr.bf16.mxu0 %v1652_v46  ;;  %1322 = vmatprep.subr.bf16.mxu1 %v1654_v47  ;;  %v1692_v24 = vcombine.high %v576_v18, %v580_v19  ;;  %v1694_v25 = vcombine.high %v577_v20, %v581_v21  ;;  %v584_v26 = vld [vmem:[%s2125_s8 + $0x2c0] sm:$0xff]  ;;  %v585_v28 = vld [vmem:[%s2125_s8 + $0x2c8] sm:$0xff]  ;;  %v1691_v30 = vcombine.low %v576_v18, %v580_v19  ;;  %v510_v13 = vld [vmem:[%s2125_s8 + $0x70] sm:$0xff] }
  0x6f   : > { %v588_v27 = vld [vmem:[%s2125_s8 + $0x2e0] sm:$0xff]  ;;  %v589_v29 = vld [vmem:[%s2125_s8 + $0x2e8] sm:$0xff]  ;;  %v1693_v31 = vcombine.low %v577_v20, %v581_v21  ;;  %v1624_v19 = vcombine.high %v506_v12, %v510_v13  ;;  %v514_v21 = vld [vmem:[%s2125_s8 + $0x90] sm:$0xff] }
  0x70   : > { %v1700_v32 = vcombine.high %v584_v26, %v588_v27  ;;  %v1702_v33 = vcombine.high %v585_v28, %v589_v29  ;;  %v592_v34 = vld [vmem:[%s2125_s8 + $0x300] sm:$0xff]  ;;  %v593_v36 = vld [vmem:[%s2125_s8 + $0x308] sm:$0xff]  ;;  %v1699_v38 = vcombine.low %v584_v26, %v588_v27  ;;  %v1701_v39 = vcombine.low %v585_v28, %v589_v29  ;;  %v522_v28 = vld [vmem:[%s2125_s8 + $0xd0] sm:$0xff] }
  0x71   : > { %1282 = vmatpush1.bf16.msra.mxu0 %v1651_v52  ;;  %1323 = vmatpush1.bf16.msra.mxu1 %v1653_v53  ;;  %v596_v35 = vld [vmem:[%s2125_s8 + $0x320] sm:$0xff]  ;;  %v597_v37 = vld [vmem:[%s2125_s8 + $0x328] sm:$0xff]  ;;  %v526_v29 = vld [vmem:[%s2125_s8 + $0xf0] sm:$0xff] }
  0x72   : > { %1283 = vmatprep.subr.bf16.mxu0 %v1660_v54  ;;  %1324 = vmatprep.subr.bf16.mxu1 %v1662_v55  ;;  %v1708_v40 = vcombine.high %v592_v34, %v596_v35  ;;  %v1710_v41 = vcombine.high %v593_v36, %v597_v37  ;;  %v600_v42 = vld [vmem:[%s2125_s8 + $0x340] sm:$0xff]  ;;  %v601_v44 = vld [vmem:[%s2125_s8 + $0x348] sm:$0xff]  ;;  %v1707_v46 = vcombine.low %v592_v34, %v596_v35 }
  0x73   : > { %v604_v43 = vld [vmem:[%s2125_s8 + $0x360] sm:$0xff]  ;;  %v605_v45 = vld [vmem:[%s2125_s8 + $0x368] sm:$0xff]  ;;  %v1709_v47 = vcombine.low %v593_v36, %v597_v37  ;;  %v1640_v34 = vcombine.high %v522_v28, %v526_v29  ;;  %v530_v36 = vld [vmem:[%s2125_s8 + $0x110] sm:$0xff] }
  0x74   : > { %v1716_v48 = vcombine.high %v600_v42, %v604_v43  ;;  %v1718_v49 = vcombine.high %v601_v44, %v605_v45  ;;  %v608_v50 = vld [vmem:[%s2125_s8 + $0x380] sm:$0xff]  ;;  %v609_v52 = vld [vmem:[%s2125_s8 + $0x388] sm:$0xff]  ;;  %v1715_v54 = vcombine.low %v600_v42, %v604_v43  ;;  %v1717_v55 = vcombine.low %v601_v44, %v605_v45  ;;  %v534_v37 = vld [vmem:[%s2125_s8 + $0x130] sm:$0xff] }
  0x75   : > { %1284 = vmatpush1.bf16.msra.mxu0 %v1659_v60  ;;  %1325 = vmatpush1.bf16.msra.mxu1 %v1661_v61  ;;  %v612_v51 = vld [vmem:[%s2125_s8 + $0x3a0] sm:$0xff]  ;;  %v613_v53 = vld [vmem:[%s2125_s8 + $0x3a8] sm:$0xff]  ;;  %v538_v43 = vld [vmem:[%s2125_s8 + $0x150] sm:$0xff] }
  0x76   : > { %1285 = vmatprep.subr.bf16.mxu0 %v1668_v62  ;;  %1326 = vmatprep.subr.bf16.mxu1 %v1670_v63  ;;  %v1724_v56 = vcombine.high %v608_v50, %v612_v51  ;;  %v1726_v57 = vcombine.high %v609_v52, %v613_v53  ;;  %v616_v58 = vld [vmem:[%s2125_s8 + $0x3c0] sm:$0xff]  ;;  %v617_v60 = vld [vmem:[%s2125_s8 + $0x3c8] sm:$0xff]  ;;  %v1723_v62 = vcombine.low %v608_v50, %v612_v51  ;;  %v542_v44 = vld [vmem:[%s2125_s8 + $0x170] sm:$0xff] }
  0x77   : > { %v620_v59 = vld [vmem:[%s2125_s8 + $0x3e0] sm:$0xff]  ;;  %v621_v61 = vld [vmem:[%s2125_s8 + $0x3e8] sm:$0xff]  ;;  %v1725_v63 = vcombine.low %v609_v52, %v613_v53  ;;  %v539_v45 = vld [vmem:[%s2125_s8 + $0x158] sm:$0xff] }
  0x78   : > { %v1732_v2 = vcombine.high %v616_v58, %v620_v59  ;;  %v1734_v3 = vcombine.high %v617_v60, %v621_v61  ;;  %v546_v51 = vld [vmem:[%s2125_s8 + $0x190] sm:$0xff]  ;;  %v547_v53 = vld [vmem:[%s2125_s8 + $0x198] sm:$0xff] }
  0x79   : > { %1286 = vmatpush1.bf16.msra.mxu0 %v1667_v6  ;;  %1327 = vmatpush1.bf16.msra.mxu1 %v1669_v7  ;;  %v499_v6 = vld [vmem:[%s2125_s8 + $0x18] sm:$0xff]  ;;  %v550_v52 = vld [vmem:[%s2125_s8 + $0x1b0] sm:$0xff] }
  0x7a   : > { %1287 = vmatprep.subr.bf16.mxu0 %v1676_v8  ;;  %1328 = vmatprep.subr.bf16.mxu1 %v1678_v9  ;;  %v503_v7 = vld [vmem:[%s2125_s8 + $0x38] sm:$0xff]  ;;  %v1731_v8 = vcombine.low %v616_v58, %v620_v59  ;;  %v1733_v9 = vcombine.low %v617_v60, %v621_v61  ;;  %v554_v59 = vld [vmem:[%s2125_s8 + $0x1d0] sm:$0xff] }
  0x7b   : > { %v1618_v11 = vcombine.high %v499_v6, %v503_v7  ;;  %v1617_v18 = vcombine.low %v499_v6, %v503_v7  ;;  %v558_v60 = vld [vmem:[%s2125_s8 + $0x1f0] sm:$0xff]  ;;  %v555_v61 = vld [vmem:[%s2125_s8 + $0x1d8] sm:$0xff] }
  0x7c   : > { %v566_v6 = vld [vmem:[%s2125_s8 + $0x230] sm:$0xff]  ;;  %v563_v7 = vld [vmem:[%s2125_s8 + $0x218] sm:$0xff] }
  0x7d   : > { %1288 = vmatpush1.bf16.msra.mxu0 %v1675_v14  ;;  %1329 = vmatpush1.bf16.msra.mxu1 %v1677_v15  ;;  %v2201_v14 = vcombine.low %v2119_v0, %v2119_v0  ;;  %v507_v15 = vld [vmem:[%s2125_s8 + $0x58] sm:$0xff] }
  0x7e   : > { %1289 = vmatprep.subr.bf16.mxu0 %v1684_v16  ;;  %1330 = vmatprep.subr.bf16.mxu1 %v1686_v17  ;;  %v511_v16 = vld [vmem:[%s2125_s8 + $0x78] sm:$0xff]  ;;  %v1615_v17 = vcombine.low %v498_v4, %v502_v5  ;;  %v562_v5 = vld [vmem:[%s2125_s8 + $0x210] sm:$0xff] }
  0x7f   : > { %v1626_v20 = vcombine.high %v507_v15, %v511_v16  ;;  %v515_v0 = vld [vmem:[%s2125_s8 + $0x98] sm:$0xff] }
  0x81   : > { %1290 = vmatpush1.bf16.msra.mxu0 %v1683_v22  ;;  %1331 = vmatpush1.bf16.msra.mxu1 %v1685_v23  ;;  %v518_v22 = vld [vmem:[%s2125_s8 + $0xb0] sm:$0xff]  ;;  %v519_v23 = vld [vmem:[%s2125_s8 + $0xb8] sm:$0xff] }
  0x82   : > { %1291 = vmatprep.subr.bf16.mxu0 %v1692_v24  ;;  %1332 = vmatprep.subr.bf16.mxu1 %v1694_v25  ;;  %v1623_v24 = vcombine.low %v506_v12, %v510_v13  ;;  %v1625_v25 = vcombine.low %v507_v15, %v511_v16  ;;  %v1632_v26 = vcombine.high %v514_v21, %v518_v22  ;;  %v570_v13 = vld [vmem:[%s2125_s8 + $0x250] sm:$0xff]  ;;  %v571_v16 = vld [vmem:[%s2125_s8 + $0x258] sm:$0xff] }
  0x83   : > { %v1634_v27 = vcombine.high %v515_v0, %v519_v23  ;;  %v574_v15 = vld [vmem:[%s2125_s8 + $0x270] sm:$0xff] }
  0x85   : > { %1292 = vmatpush1.bf16.msra.mxu0 %v1691_v30  ;;  %1333 = vmatpush1.bf16.msra.mxu1 %v1693_v31  ;;  %v523_v30 = vld [vmem:[%s2125_s8 + $0xd8] sm:$0xff] }
  0x86   : > { %1293 = vmatprep.subr.bf16.mxu0 %v1700_v32  ;;  %1334 = vmatprep.subr.bf16.mxu1 %v1702_v33  ;;  %v527_v31 = vld [vmem:[%s2125_s8 + $0xf8] sm:$0xff]  ;;  %v1631_v32 = vcombine.low %v514_v21, %v518_v22  ;;  %v1633_v33 = vcombine.low %v515_v0, %v519_v23  ;;  %v578_v22 = vld [vmem:[%s2125_s8 + $0x290] sm:$0xff] }
  0x87   : > { %v1642_v35 = vcombine.high %v523_v30, %v527_v31  ;;  %v582_v0 = vld [vmem:[%s2125_s8 + $0x2b0] sm:$0xff]  ;;  %v579_v23 = vld [vmem:[%s2125_s8 + $0x298] sm:$0xff] }
  0x89   : > { %1294 = vmatpush1.bf16.msra.mxu0 %v1699_v38  ;;  %1335 = vmatpush1.bf16.msra.mxu1 %v1701_v39  ;;  %v531_v38 = vld [vmem:[%s2125_s8 + $0x118] sm:$0xff] }
  0x8a   : > { %1295 = vmatprep.subr.bf16.mxu0 %v1708_v40  ;;  %1336 = vmatprep.subr.bf16.mxu1 %v1710_v41  ;;  %v535_v39 = vld [vmem:[%s2125_s8 + $0x138] sm:$0xff]  ;;  %v1639_v40 = vcombine.low %v522_v28, %v526_v29  ;;  %v1648_v41 = vcombine.high %v530_v36, %v534_v37  ;;  %v586_v29 = vld [vmem:[%s2125_s8 + $0x2d0] sm:$0xff] }
  0x8b   : > { %v1650_v42 = vcombine.high %v531_v38, %v535_v39 }
  0x8d   : > { %1296 = vmatpush1.bf16.msra.mxu0 %v1707_v46  ;;  %1337 = vmatpush1.bf16.msra.mxu1 %v1709_v47  ;;  %v543_v46 = vld [vmem:[%s2125_s8 + $0x178] sm:$0xff]  ;;  %v1647_v47 = vcombine.low %v530_v36, %v534_v37  ;;  %v594_v37 = vld [vmem:[%s2125_s8 + $0x310] sm:$0xff] }
  0x8e   : > { %1297 = vmatprep.subr.bf16.mxu0 %v1716_v48  ;;  %1338 = vmatprep.subr.bf16.mxu1 %v1718_v49  ;;  %v1649_v48 = vcombine.low %v531_v38, %v535_v39  ;;  %v1656_v49 = vcombine.high %v538_v43, %v542_v44  ;;  %v1658_v50 = vcombine.high %v539_v45, %v543_v46  ;;  %v598_v38 = vld [vmem:[%s2125_s8 + $0x330] sm:$0xff]  ;;  %v595_v39 = vld [vmem:[%s2125_s8 + $0x318] sm:$0xff] }
  0x91   : > { %1298 = vmatpush1.bf16.msra.mxu0 %v1715_v54  ;;  %1339 = vmatpush1.bf16.msra.mxu1 %v1717_v55  ;;  %v551_v54 = vld [vmem:[%s2125_s8 + $0x1b8] sm:$0xff]  ;;  %v1655_v55 = vcombine.low %v538_v43, %v542_v44  ;;  %v602_v44 = vld [vmem:[%s2125_s8 + $0x350] sm:$0xff] }
  0x92   : > { %1299 = vmatprep.subr.bf16.mxu0 %v1724_v56  ;;  %1340 = vmatprep.subr.bf16.mxu1 %v1726_v57  ;;  %v1657_v56 = vcombine.low %v539_v45, %v543_v46  ;;  %v1664_v57 = vcombine.high %v546_v51, %v550_v52  ;;  %v1666_v58 = vcombine.high %v547_v53, %v551_v54  ;;  %v606_v45 = vld [vmem:[%s2125_s8 + $0x370] sm:$0xff]  ;;  %v603_v46 = vld [vmem:[%s2125_s8 + $0x358] sm:$0xff] }
  0x95   : > { %1300 = vmatpush1.bf16.msra.mxu0 %v1723_v62  ;;  %1341 = vmatpush1.bf16.msra.mxu1 %v1725_v63  ;;  %v559_v62 = vld [vmem:[%s2125_s8 + $0x1f8] sm:$0xff]  ;;  %v1663_v63 = vcombine.low %v546_v51, %v550_v52  ;;  %v610_v52 = vld [vmem:[%s2125_s8 + $0x390] sm:$0xff] }
  0x96   : > { %1301 = vmatprep.subr.bf16.mxu0 %v1732_v2  ;;  %1342 = vmatprep.subr.bf16.mxu1 %v1734_v3  ;;  %v1665_v2 = vcombine.low %v547_v53, %v551_v54  ;;  %v1672_v3 = vcombine.high %v554_v59, %v558_v60  ;;  %v1674_v4 = vcombine.high %v555_v61, %v559_v62  ;;  %v614_v53 = vld [vmem:[%s2125_s8 + $0x3b0] sm:$0xff]  ;;  %v611_v54 = vld [vmem:[%s2125_s8 + $0x398] sm:$0xff] }
  0x99   : > { %1302 = vmatpush1.bf16.msra.mxu0 %v1731_v8  ;;  %1343 = vmatpush1.bf16.msra.mxu1 %v1733_v9  ;;  %v567_v8 = vld [vmem:[%s2125_s8 + $0x238] sm:$0xff]  ;;  %v1671_v9 = vcombine.low %v554_v59, %v558_v60  ;;  %v618_v60 = vld [vmem:[%s2125_s8 + $0x3d0] sm:$0xff] }
  0x9a   : > { %1353 = vmatprep.subr.bf16.mxu0 %v1616_v10  ;;  %1394 = vmatprep.subr.bf16.mxu1 %v1618_v11  ;;  %v1673_v10 = vcombine.low %v555_v61, %v559_v62  ;;  %v1680_v11 = vcombine.high %v562_v5, %v566_v6  ;;  %v1682_v12 = vcombine.high %v563_v7, %v567_v8  ;;  %v622_v61 = vld [vmem:[%s2125_s8 + $0x3f0] sm:$0xff]  ;;  %v619_v62 = vld [vmem:[%s2125_s8 + $0x3d8] sm:$0xff] }
  0x9c   : > { %1304 = vmatmul.mubr.bf16.vlgmr.msra.gmra.mrb[0].mxu0 %v2201_v14  ;;  %1345 = vmatmul.mubr.bf16.vlgmr.msra.gmra.mrb[0].mxu1 %v2201_v14 }
  0x9d   : > { %1354 = vmatpush1.bf16.msra.mxu0 %v1615_v17  ;;  %1395 = vmatpush1.bf16.msra.mxu1 %v1617_v18  ;;  %v575_v17 = vld [vmem:[%s2125_s8 + $0x278] sm:$0xff]  ;;  %v1679_v18 = vcombine.low %v562_v5, %v566_v6  ;;  %v1735_v6 = vcombine.low %v618_v60, %v622_v61 }
  0x9e   : > { %1355 = vmatprep.subr.bf16.mxu0 %v1624_v19  ;;  %1396 = vmatprep.subr.bf16.mxu1 %v1626_v20  ;;  %v1681_v19 = vcombine.low %v563_v7, %v567_v8  ;;  %v1688_v20 = vcombine.high %v570_v13, %v574_v15  ;;  %v1690_v21 = vcombine.high %v571_v16, %v575_v17 }
  0x9f   : > { %1385 = vmatprep.mubr.bf16.mxu0 %v2123_v1  ;;  %1426 = vmatprep.mubr.bf16.mxu1 %v2123_v1  ;;  %v1641_v1 = vcombine.low %v523_v30, %v527_v31  ;;  %v590_v30 = vld [vmem:[%s2125_s8 + $0x2f0] sm:$0xff]  ;;  %v587_v31 = vld [vmem:[%s2125_s8 + $0x2d8] sm:$0xff] }
  0xa1   : > { %1356 = vmatpush1.bf16.msra.mxu0 %v1623_v24  ;;  %1397 = vmatpush1.bf16.msra.mxu1 %v1625_v25  ;;  %v583_v24 = vld [vmem:[%s2125_s8 + $0x2b8] sm:$0xff]  ;;  %v1687_v25 = vcombine.low %v570_v13, %v574_v15 }
  0xa2   : > { %1357 = vmatprep.subr.bf16.mxu0 %v1632_v26  ;;  %1398 = vmatprep.subr.bf16.mxu1 %v1634_v27  ;;  %v1689_v26 = vcombine.low %v571_v16, %v575_v17  ;;  %v1696_v27 = vcombine.high %v578_v22, %v582_v0  ;;  %v1698_v28 = vcombine.high %v579_v23, %v583_v24 }
  0xa5   : > { %1358 = vmatpush1.bf16.msra.mxu0 %v1631_v32  ;;  %1399 = vmatpush1.bf16.msra.mxu1 %v1633_v33  ;;  %v591_v32 = vld [vmem:[%s2125_s8 + $0x2f8] sm:$0xff]  ;;  %v1695_v33 = vcombine.low %v578_v22, %v582_v0 }
  0xa6   : > { %1359 = vmatprep.subr.bf16.mxu0 %v1640_v34  ;;  %1400 = vmatprep.subr.bf16.mxu1 %v1642_v35  ;;  %v1697_v34 = vcombine.low %v579_v23, %v583_v24  ;;  %v1704_v35 = vcombine.high %v586_v29, %v590_v30  ;;  %v1706_v36 = vcombine.high %v587_v31, %v591_v32 }
  0xa9   : > { %1360 = vmatpush1.bf16.msra.mxu0 %v1639_v40  ;;  %1401 = vmatpush1.bf16.msra.mxu1 %v1641_v1  ;;  %v599_v40 = vld [vmem:[%s2125_s8 + $0x338] sm:$0xff]  ;;  %v1703_v1 = vcombine.low %v586_v29, %v590_v30 }
  0xaa   : > { %1361 = vmatprep.subr.bf16.mxu0 %v1648_v41  ;;  %1402 = vmatprep.subr.bf16.mxu1 %v1650_v42  ;;  %v1705_v41 = vcombine.low %v587_v31, %v591_v32  ;;  %v1712_v42 = vcombine.high %v594_v37, %v598_v38  ;;  %v1714_v43 = vcombine.high %v595_v39, %v599_v40 }
  0xad   : > { %1362 = vmatpush1.bf16.msra.mxu0 %v1647_v47  ;;  %1403 = vmatpush1.bf16.msra.mxu1 %v1649_v48  ;;  %v607_v47 = vld [vmem:[%s2125_s8 + $0x378] sm:$0xff]  ;;  %v1711_v48 = vcombine.low %v594_v37, %v598_v38 }
  0xae   : > { %1363 = vmatprep.subr.bf16.mxu0 %v1656_v49  ;;  %1404 = vmatprep.subr.bf16.mxu1 %v1658_v50  ;;  %v1713_v49 = vcombine.low %v595_v39, %v599_v40  ;;  %v1720_v50 = vcombine.high %v602_v44, %v606_v45  ;;  %v1722_v51 = vcombine.high %v603_v46, %v607_v47 }
  0xb1   : > { %1364 = vmatpush1.bf16.msra.mxu0 %v1655_v55  ;;  %1405 = vmatpush1.bf16.msra.mxu1 %v1657_v56  ;;  %v615_v55 = vld [vmem:[%s2125_s8 + $0x3b8] sm:$0xff]  ;;  %v1719_v56 = vcombine.low %v602_v44, %v606_v45 }
  0xb2   : > { %1365 = vmatprep.subr.bf16.mxu0 %v1664_v57  ;;  %1406 = vmatprep.subr.bf16.mxu1 %v1666_v58  ;;  %v1721_v57 = vcombine.low %v603_v46, %v607_v47  ;;  %v1728_v58 = vcombine.high %v610_v52, %v614_v53  ;;  %v1730_v59 = vcombine.high %v611_v54, %v615_v55 }
  0xb5   : > { %1366 = vmatpush1.bf16.msra.mxu0 %v1663_v63  ;;  %1407 = vmatpush1.bf16.msra.mxu1 %v1665_v2  ;;  %v623_v63 = vld [vmem:[%s2125_s8 + $0x3f8] sm:$0xff]  ;;  %v1727_v2 = vcombine.low %v610_v52, %v614_v53 }
  0xb6   : > { %1367 = vmatprep.subr.bf16.mxu0 %v1672_v3  ;;  %1408 = vmatprep.subr.bf16.mxu1 %v1674_v4  ;;  %v1729_v3 = vcombine.low %v611_v54, %v615_v55  ;;  %v1736_v4 = vcombine.high %v618_v60, %v622_v61  ;;  %v1738_v5 = vcombine.high %v619_v62, %v623_v63 }
  0xb7   : > { %v1737_v7 = vcombine.low %v619_v62, %v623_v63 }
  0xb9   : > { %1368 = vmatpush1.bf16.msra.mxu0 %v1671_v9  ;;  %1409 = vmatpush1.bf16.msra.mxu1 %v1673_v10 }
  0xba   : > { %1369 = vmatprep.subr.bf16.mxu0 %v1680_v11  ;;  %1410 = vmatprep.subr.bf16.mxu1 %v1682_v12 }
  0xbd   : > { %1370 = vmatpush1.bf16.msra.mxu0 %v1679_v18  ;;  %1411 = vmatpush1.bf16.msra.mxu1 %v1681_v19 }
  0xbe   : > { %1371 = vmatprep.subr.bf16.mxu0 %v1688_v20  ;;  %1412 = vmatprep.subr.bf16.mxu1 %v1690_v21 }
  0xc1   : > { %1372 = vmatpush1.bf16.msra.mxu0 %v1687_v25  ;;  %1413 = vmatpush1.bf16.msra.mxu1 %v1689_v26 }
  0xc2   : > { %1373 = vmatprep.subr.bf16.mxu0 %v1696_v27  ;;  %1414 = vmatprep.subr.bf16.mxu1 %v1698_v28 }
  0xc5   : > { %1374 = vmatpush1.bf16.msra.mxu0 %v1695_v33  ;;  %1415 = vmatpush1.bf16.msra.mxu1 %v1697_v34 }
  0xc6   : > { %1375 = vmatprep.subr.bf16.mxu0 %v1704_v35  ;;  %1416 = vmatprep.subr.bf16.mxu1 %v1706_v36 }
  0xc9   : > { %1376 = vmatpush1.bf16.msra.mxu0 %v1703_v1  ;;  %1417 = vmatpush1.bf16.msra.mxu1 %v1705_v41 }
  0xca   : > { %1377 = vmatprep.subr.bf16.mxu0 %v1712_v42  ;;  %1418 = vmatprep.subr.bf16.mxu1 %v1714_v43 }
  0xcd   : > { %1378 = vmatpush1.bf16.msra.mxu0 %v1711_v48  ;;  %1419 = vmatpush1.bf16.msra.mxu1 %v1713_v49 }
  0xce   : > { %1379 = vmatprep.subr.bf16.mxu0 %v1720_v50  ;;  %1420 = vmatprep.subr.bf16.mxu1 %v1722_v51 }
  0xd1   : > { %1380 = vmatpush1.bf16.msra.mxu0 %v1719_v56  ;;  %1421 = vmatpush1.bf16.msra.mxu1 %v1721_v57 }
  0xd2   : > { %1381 = vmatprep.subr.bf16.mxu0 %v1728_v58  ;;  %1422 = vmatprep.subr.bf16.mxu1 %v1730_v59 }
  0xd5   : > { %1382 = vmatpush1.bf16.msra.mxu0 %v1727_v2  ;;  %1423 = vmatpush1.bf16.msra.mxu1 %v1729_v3 }
  0xd6   : > { %1383 = vmatprep.subr.bf16.mxu0 %v1736_v4  ;;  %1424 = vmatprep.subr.bf16.mxu1 %v1738_v5 }
  0xd9   : > { %1384 = vmatpush1.bf16.msra.mxu0 %v1735_v6  ;;  %1425 = vmatpush1.bf16.msra.mxu1 %v1737_v7 }
  0xdc   : > { %1386 = vmatmul.mubr.bf16.vlgmr.msra.gmra.mrb[4].mxu0 %v2201_v14  ;;  %1427 = vmatmul.mubr.bf16.vlgmr.msra.gmra.mrb[4].mxu1 %v2201_v14 }
 0x16f   : > { %v1305_v8 = vpop.f32.mrb[0].mxu0  ;;  %v1346_v11 = vpop.f32.mrb[0].mxu1 }
 0x170   : > { %v1446_v9 = vmul.f32 %v1305_v8, %v1305_v8  ;;  %1464 = vst [vmem:[%s2271_s13] sm:$0xff] %v1305_v8  ;;  %v1307_v10 = vpop.f32.mrb[1].mxu0  ;;  %v1448_v15 = vmul.f32 %v1346_v11, %v1346_v11  ;;  %1466 = vst [vmem:[%s2271_s13 + $0x10] sm:$0xff] %v1346_v11  ;;  %v1348_v16 = vpop.f32.mrb[1].mxu1 }
 0x171   : > { %v1435_v12 = vadd.f32 %v1307_v10, %v1305_v8  ;;  %v1447_v14 = vmul.f32 %v1307_v10, %v1307_v10  ;;  %1465 = vst [vmem:[%s2271_s13 + $0x8] sm:$0xff] %v1307_v10  ;;  %v1309_v13 = vpop.f32.mrb[2].mxu0  ;;  %1467 = vst [vmem:[%s2271_s13 + $0x18] sm:$0xff] %v1348_v16  ;;  %v1350_v18 = vpop.f32.mrb[2].mxu1  ;;  %v1449_v21 = vmul.f32 %v1348_v16, %v1348_v16 }
 0x172   : > { %v1310_v17 = vpop.f32.mrb[3].mxu0  ;;  %v1351_v22 = vpop.f32.mrb[3].mxu1 }
 0x173   : > { %v1454_v19 = vadd.f32 %v1447_v14, %v1446_v9  ;;  %v1436_v20 = vadd.f32 %v1435_v12, %v1346_v11 }
 0x175   : > { %v1455_v0 = vadd.f32 %v1454_v19, %v1448_v15  ;;  %v1437_v23 = vadd.f32 %v1436_v20, %v1348_v16 }
 0x177   : > { %v1456_v24 = vadd.f32 %v1455_v0, %v1449_v21 }
 0x1af   : > { %v1387_v25 = vpop.f32.mrb[4].mxu0  ;;  %v1428_v29 = vpop.f32.mrb[4].mxu1 }
 0x1b0   : > { %v1438_v26 = vadd.f32 %v1437_v23, %v1387_v25  ;;  %v1450_v27 = vmul.f32 %v1387_v25, %v1387_v25  ;;  %1468 = vst [vmem:[%s2271_s13 + $0x20] sm:$0xff] %v1387_v25  ;;  %v1389_v28 = vpop.f32.mrb[5].mxu0  ;;  %1470 = vst [vmem:[%s2271_s13 + $0x30] sm:$0xff] %v1428_v29  ;;  %v1430_v32 = vpop.f32.mrb[5].mxu1  ;;  %v1452_v35 = vmul.f32 %v1428_v29, %v1428_v29 }
 0x1b1   : > { %v1451_v30 = vmul.f32 %v1389_v28, %v1389_v28  ;;  %1469 = vst [vmem:[%s2271_s13 + $0x28] sm:$0xff] %v1389_v28  ;;  %v1391_v31 = vpop.f32.mrb[6].mxu0  ;;  %1471 = vst [vmem:[%s2271_s13 + $0x38] sm:$0xff] %v1430_v32  ;;  %v1432_v37 = vpop.f32.mrb[6].mxu1  ;;  %v1453_v41 = vmul.f32 %v1430_v32, %v1430_v32 }
 0x1b2   : > { %v1457_v33 = vadd.f32 %v1456_v24, %v1450_v27  ;;  %v1439_v34 = vadd.f32 %v1438_v26, %v1389_v28  ;;  %v1392_v36 = vpop.f32.mrb[7].mxu0  ;;  %v1433_v38 = vpop.f32.mrb[7].mxu1 }
 0x1b4   : > { %v1440_v39 = vadd.f32 %v1439_v34, %v1428_v29  ;;  %v1458_v40 = vadd.f32 %v1457_v33, %v1451_v30 }
 0x1b6   : > { %v1441_v1 = vadd.f32 %v1440_v39, %v1430_v32  ;;  %v1459_v42 = vadd.f32 %v1458_v40, %v1452_v35 }
 0x1b8   : > { %1442 = vadd.xlane.f32.xlu0 %v1441_v1  ;;  %v1460_v43 = vadd.f32 %v1459_v42, %v1453_v41 }
 0x1bc   : > { %1461 = vadd.xlane.f32.xlu0 %v1460_v43 }
 0x245   : > { %v1443_v44 = vpop.xlane.xlu0 %1442 }
 0x246   : > { %1445 = vst.msk [vmem:[%s490_s20] sm:$0xff] %vm1444_vm0, %v1443_v44 }
 0x249   : > { %v1462_v45 = vpop.xlane.xlu0 %1461 }
 0x24a   : > { %1463 = vst.msk [vmem:[%s494_s24] sm:$0xff] %vm1444_vm0, %v1462_v45 }
 0x24b PF: > { %p12_p10 = scmp.ge.s32.totalorder %s1836_s19, 4   ;;  %s2304_s15 = smov %s1786_s16 }
 0x24c   : > { %s2305_s16 = smov %s1845_s22  ;;  %s2306_s17 = smov %s1836_s19 }
 0x24d   :  { %14 = sbr.rel (!%p12_p10) target bundleno = 2 (0x2), region = 110 }

// kernel: generator_forward.16
= control target key start
LH: loop header
LB: loop body
LE: loop exit
PB: predicated region body
PF: predicated region fallthrough
CT: control target
= control target key end

     0   :  { %v184_v0 = vmov 0   ;;  %s283_s1 = inlined_call_operand.vmem [shape: f32[8,1], index: 1, kind: input, shape index: {}]   ;;  %s284_s2 = inlined_call_operand.vmem [shape: f32[8,1], index: 2, kind: input, shape index: {}]   ;;  %s285_s0 = inlined_call_operand.vmem [shape: f32[8,2048], index: 0, kind: input, shape index: {}]   ;;  %s286_s3 = inlined_call_operand.vmem [shape: bf16[8,2048], index: 3, kind: output, shape index: {}]  }
   0x1   :  { %183 = vset.pattern.permute.xlu0 %v184_v0  ;;  %v30_v1 = vld [vmem:[%s283_s1] sm:$0xff]  ;;  %v15_v4 = vld [vmem:[%s285_s0 + $0x8] sm:$0xff]  ;;  %v16_v5 = vld [vmem:[%s285_s0 + $0x10] sm:$0xff] }
   0x2   :  { %33 = vperm.xlu0 %183, %v30_v1   ;;  %v52_v2 = vld [vmem:[%s284_s2] sm:$0xff]  ;;  %v17_v6 = vld [vmem:[%s285_s0 + $0x18] sm:$0xff]  ;;  %v19_v8 = vld [vmem:[%s285_s0 + $0x28] sm:$0xff] }
   0x3   :  { %v14_v3 = vld [vmem:[%s285_s0] sm:$0xff]  ;;  %v20_v9 = vld [vmem:[%s285_s0 + $0x30] sm:$0xff]  ;;  %v21_v10 = vld [vmem:[%s285_s0 + $0x38] sm:$0xff] }
   0x4   :  { %v18_v7 = vld [vmem:[%s285_s0 + $0x20] sm:$0xff]  ;;  %v23_v12 = vld [vmem:[%s285_s0 + $0x48] sm:$0xff]  ;;  %v24_v14 = vld [vmem:[%s285_s0 + $0x50] sm:$0xff] }
   0x5   :  { %v22_v11 = vld [vmem:[%s285_s0 + $0x40] sm:$0xff]  ;;  %v25_v15 = vld [vmem:[%s285_s0 + $0x58] sm:$0xff]  ;;  %v27_v17 = vld [vmem:[%s285_s0 + $0x68] sm:$0xff] }
   0x6   :  { %55 = vperm.xlu0 %183, %v52_v2   ;;  %v26_v16 = vld [vmem:[%s285_s0 + $0x60] sm:$0xff]  ;;  %v28_v18 = vld [vmem:[%s285_s0 + $0x70] sm:$0xff]  ;;  %v29_v19 = vld [vmem:[%s285_s0 + $0x78] sm:$0xff] }
  0x81   :  { %v34_v13 = vpop.permute.xlu0 %33 }
  0x82   :  { %v36_v20 = vmul.f32 %v34_v13, %v14_v3  ;;  %v37_v21 = vmul.f32 %v34_v13, %v15_v4  ;;  %v38_v22 = vmul.f32 %v34_v13, %v16_v5  ;;  %v39_v23 = vmul.f32 %v34_v13, %v17_v6 }
  0x83   :  { %v40_v24 = vmul.f32 %v34_v13, %v18_v7  ;;  %v41_v25 = vmul.f32 %v34_v13, %v19_v8  ;;  %v42_v26 = vmul.f32 %v34_v13, %v20_v9  ;;  %v43_v27 = vmul.f32 %v34_v13, %v21_v10 }
  0x84   :  { %v44_v28 = vmul.f32 %v34_v13, %v22_v11  ;;  %v45_v29 = vmul.f32 %v34_v13, %v23_v12  ;;  %v46_v30 = vmul.f32 %v34_v13, %v24_v14  ;;  %v47_v31 = vmul.f32 %v34_v13, %v25_v15 }
  0x85   :  { %v56_v32 = vpop.permute.xlu0 %55  ;;  %v48_v33 = vmul.f32 %v34_v13, %v26_v16  ;;  %v49_v34 = vmul.f32 %v34_v13, %v27_v17  ;;  %v50_v35 = vmul.f32 %v34_v13, %v28_v18  ;;  %v51_v36 = vmul.f32 %v34_v13, %v29_v19 }
  0x86   :  { %v58_v37 = vadd.f32 %v56_v32, %v36_v20  ;;  %v59_v38 = vadd.f32 %v56_v32, %v37_v21  ;;  %v60_v39 = vadd.f32 %v56_v32, %v38_v22  ;;  %v61_v40 = vadd.f32 %v56_v32, %v39_v23 }
  0x87   :  { %v62_v41 = vadd.f32 %v56_v32, %v40_v24  ;;  %v63_v42 = vadd.f32 %v56_v32, %v41_v25  ;;  %v64_v43 = vadd.f32 %v56_v32, %v42_v26  ;;  %v65_v44 = vadd.f32 %v56_v32, %v43_v27 }
  0x88   :  { %v66_v45 = vadd.f32 %v56_v32, %v44_v28  ;;  %v67_v46 = vadd.f32 %v56_v32, %v45_v29  ;;  %v68_v47 = vadd.f32 %v56_v32, %v46_v30  ;;  %v69_v48 = vadd.f32 %v56_v32, %v47_v31 }
  0x89   :  { %v70_v49 = vadd.f32 %v56_v32, %v48_v33  ;;  %v71_v50 = vadd.f32 %v56_v32, %v49_v34  ;;  %v72_v51 = vadd.f32 %v56_v32, %v50_v35  ;;  %v73_v52 = vadd.f32 %v56_v32, %v51_v36 }
  0x8a   :  { %v74_v53 = vmax.f32 %v58_v37, 0.0  ;;  %v75_v54 = vmax.f32 %v59_v38, 0.0  ;;  %v76_v55 = vmax.f32 %v60_v39, 0.0  ;;  %v77_v56 = vmax.f32 %v61_v40, 0.0 }
  0x8b   :  { %v78_v57 = vmax.f32 %v62_v41, 0.0  ;;  %v79_v58 = vmax.f32 %v63_v42, 0.0  ;;  %v80_v59 = vmax.f32 %v64_v43, 0.0  ;;  %v81_v60 = vmax.f32 %v65_v44, 0.0 }
  0x8c   :  { %v82_v61 = vmax.f32 %v66_v45, 0.0  ;;  %v83_v62 = vmax.f32 %v67_v46, 0.0  ;;  %v84_v63 = vmax.f32 %v68_v47, 0.0  ;;  %v85_v0 = vmax.f32 %v69_v48, 0.0 }
  0x8d   :  { %v86_v1 = vmax.f32 %v70_v49, 0.0  ;;  %v87_v2 = vmax.f32 %v71_v50, 0.0  ;;  %v88_v3 = vmax.f32 %v72_v51, 0.0  ;;  %v89_v4 = vmax.f32 %v73_v52, 0.0 }
  0x8e   :  { %v174_v5 = vpack.c.bf16 %v75_v54, %v74_v53  ;;  %v175_v6 = vpack.c.bf16 %v77_v56, %v76_v55  ;;  %v176_v7 = vpack.c.bf16 %v79_v58, %v78_v57  ;;  %v177_v8 = vpack.c.bf16 %v81_v60, %v80_v59 }
  0x8f   :  { %v178_v9 = vpack.c.bf16 %v83_v62, %v82_v61  ;;  %v179_v10 = vpack.c.bf16 %v85_v0, %v84_v63  ;;  %v180_v11 = vpack.c.bf16 %v87_v2, %v86_v1  ;;  %v181_v12 = vpack.c.bf16 %v89_v4, %v88_v3 }
  0x90   :  { %154 = vst [vmem:[%s286_s3] sm:$0xff] %v174_v5  ;;  %155 = vst [vmem:[%s286_s3 + $0x8] sm:$0xff] %v175_v6 }
  0x91   :  { %156 = vst [vmem:[%s286_s3 + $0x10] sm:$0xff] %v176_v7  ;;  %157 = vst [vmem:[%s286_s3 + $0x18] sm:$0xff] %v177_v8 }
  0x92   :  { %158 = vst [vmem:[%s286_s3 + $0x20] sm:$0xff] %v178_v9  ;;  %159 = vst [vmem:[%s286_s3 + $0x28] sm:$0xff] %v179_v10 }
  0x93   :  { %160 = vst [vmem:[%s286_s3 + $0x30] sm:$0xff] %v180_v11  ;;  %161 = vst [vmem:[%s286_s3 + $0x38] sm:$0xff] %v181_v12 }

// kernel: generator_forward.17
= control target key start
LH: loop header
LB: loop body
LE: loop exit
PB: predicated region body
PF: predicated region fallthrough
CT: control target
= control target key end

     0   :  { %s1851_s9 = smov 0   ;;  %s1853_s10 = smov 0   ;;  %s2332_s0 = inlined_call_operand.vmem [shape: bf16[8,128], index: 0, kind: input, shape index: {}]   ;;  %s2333_s1 = inlined_call_operand.vmem [shape: bf16[128,8192], index: 1, kind: input, shape index: {}]   ;;  %s2334_s2 = inlined_call_operand.vmem [shape: f32[8,8192], index: 2, kind: output, shape index: {}]  }
   0x1   :  { %s1855_s11 = smov 0  }
   0x2 LB: > { %s1612_s12 = sadd.s32 4294967295, %s1833_s11   ;;  %s1868_s13 = sadd.s32 1, %s1833_s11   ;;  %s1833_s11 = sphi %s1855_s11, %s2337_s11   ;;  %s1829_s10 = sphi %s1853_s10, %s2336_s10   ;;  %s1825_s9 = sphi %s1851_s9, %s2335_s9  }
   0x3   : > { %s37_s14 = ssub.s32 %s1833_s11, %s1868_s13  ;;  %s40_s15 = sadd.s32 1, %s1829_s10 }
   0x4   : > { %p38_p0 = scmp.eq.s32.totalorder %s37_s14, 0  ;;  %p47_p1 = scmp.ne.s32.totalorder %s1829_s10, %s1825_s9 }
   0x5   : > { %p48_p2 = scmp.eq.s32.totalorder %s1833_s11, 0  ;;  %p1615_p4 = scmp.ge.s32.totalorder %s1833_s11, 4 }
   0x6   : > { %s1877_s16 = scalar_select %p38_p0, %s1829_s10, %s40_s15  }
   0x7   : > { %p49_p3 = por %p48_p2, %p47_p1  ;;  %102 = sbr.rel (%p1615_p4) target bundleno = 82 (0x52), region = 20 }
   0xe   : > { %105 = sbr.rel (!%p49_p3) target bundleno = 82 (0x52), region = 24  ;;  %s107_s17 = sand.u32 (%p49_p3), 1, %s1829_s10  }
   0xf   : > { %s1753_s18 = sshll.u32 (%p49_p3), %s1833_s11, 6  ;;  %s1616_s19 = sshll.u32 (%p49_p3), %s107_s17, 10 }
  0x10   : > { %s1885_s22 = scalar_lea.vmem (%p49_p3), %s2333_s1, %s1753_s18  ;;  %s1890_s23 = scalar_lea.vmem (%p49_p3), [#allocation2], %s1616_s19 }
  0x11   : > { %v125_v0 = vld [vmem:[%s1885_s22] sm:$0xff] (%p49_p3)  ;;  %v127_v1 = vld [vmem:[%s1885_s22 + $0x8] sm:$0xff] (%p49_p3)  ;;  %v129_v2 = vld [vmem:[%s1885_s22 + $0x10] sm:$0xff] (%p49_p3) }
  0x12   : > { %126 = vst [vmem:[%s1890_s23] sm:$0xff] (%p49_p3), %v125_v0  ;;  %128 = vst [vmem:[%s1890_s23 + $0x8] sm:$0xff] (%p49_p3), %v127_v1  ;;  %v131_v3 = vld [vmem:[%s1885_s22 + $0x18] sm:$0xff] (%p49_p3)  ;;  %v133_v4 = vld [vmem:[%s1885_s22 + $0x20] sm:$0xff] (%p49_p3) }
  0x13   : > { %130 = vst [vmem:[%s1890_s23 + $0x10] sm:$0xff] (%p49_p3), %v129_v2  ;;  %v135_v5 = vld [vmem:[%s1885_s22 + $0x28] sm:$0xff] (%p49_p3)  ;;  %132 = vst [vmem:[%s1890_s23 + $0x18] sm:$0xff] (%p49_p3), %v131_v3  ;;  %v137_v6 = vld [vmem:[%s1885_s22 + $0x30] sm:$0xff] (%p49_p3) }
  0x14   : > { %134 = vst [vmem:[%s1890_s23 + $0x20] sm:$0xff] (%p49_p3), %v133_v4  ;;  %136 = vst [vmem:[%s1890_s23 + $0x28] sm:$0xff] (%p49_p3), %v135_v5  ;;  %v139_v7 = vld [vmem:[%s1885_s22 + $0x38] sm:$0xff] (%p49_p3)  ;;  %v141_v8 = vld [vmem:[%s1885_s22 + $0x100] sm:$0xff] (%p49_p3) }
  0x15   : > { %138 = vst [vmem:[%s1890_s23 + $0x30] sm:$0xff] %v137_v6  ;;  %140 = vst [vmem:[%s1890_s23 + $0x38] sm:$0xff] %v139_v7  ;;  %v143_v9 = vld [vmem:[%s1885_s22 + $0x108] sm:$0xff]  ;;  %v145_v10 = vld [vmem:[%s1885_s22 + $0x110] sm:$0xff] }
  0x16   : > { %142 = vst [vmem:[%s1890_s23 + $0x40] sm:$0xff] %v141_v8  ;;  %v147_v11 = vld [vmem:[%s1885_s22 + $0x118] sm:$0xff]  ;;  %144 = vst [vmem:[%s1890_s23 + $0x48] sm:$0xff] %v143_v9  ;;  %v149_v12 = vld [vmem:[%s1885_s22 + $0x120] sm:$0xff] }
  0x17   : > { %146 = vst [vmem:[%s1890_s23 + $0x50] sm:$0xff] %v145_v10  ;;  %148 = vst [vmem:[%s1890_s23 + $0x58] sm:$0xff] %v147_v11  ;;  %v151_v13 = vld [vmem:[%s1885_s22 + $0x128] sm:$0xff]  ;;  %v153_v14 = vld [vmem:[%s1885_s22 + $0x130] sm:$0xff] }
  0x18   : > { %150 = vst [vmem:[%s1890_s23 + $0x60] sm:$0xff] %v149_v12  ;;  %152 = vst [vmem:[%s1890_s23 + $0x68] sm:$0xff] %v151_v13  ;;  %v155_v15 = vld [vmem:[%s1885_s22 + $0x138] sm:$0xff]  ;;  %v157_v16 = vld [vmem:[%s1885_s22 + $0x200] sm:$0xff] }
  0x19   : > { %154 = vst [vmem:[%s1890_s23 + $0x70] sm:$0xff] %v153_v14  ;;  %v159_v17 = vld [vmem:[%s1885_s22 + $0x208] sm:$0xff]  ;;  %156 = vst [vmem:[%s1890_s23 + $0x78] sm:$0xff] %v155_v15  ;;  %v161_v18 = vld [vmem:[%s1885_s22 + $0x210] sm:$0xff] }
  0x1a   : > { %158 = vst [vmem:[%s1890_s23 + $0x80] sm:$0xff] %v157_v16  ;;  %160 = vst [vmem:[%s1890_s23 + $0x88] sm:$0xff] %v159_v17  ;;  %v163_v19 = vld [vmem:[%s1885_s22 + $0x218] sm:$0xff]  ;;  %v165_v20 = vld [vmem:[%s1885_s22 + $0x220] sm:$0xff] }
  0x1b   : > { %162 = vst [vmem:[%s1890_s23 + $0x90] sm:$0xff] %v161_v18  ;;  %164 = vst [vmem:[%s1890_s23 + $0x98] sm:$0xff] %v163_v19  ;;  %v167_v21 = vld [vmem:[%s1885_s22 + $0x228] sm:$0xff]  ;;  %v169_v22 = vld [vmem:[%s1885_s22 + $0x230] sm:$0xff] }
  0x1c   : > { %166 = vst [vmem:[%s1890_s23 + $0xa0] sm:$0xff] %v165_v20  ;;  %v171_v23 = vld [vmem:[%s1885_s22 + $0x238] sm:$0xff]  ;;  %168 = vst [vmem:[%s1890_s23 + $0xa8] sm:$0xff] %v167_v21  ;;  %v173_v24 = vld [vmem:[%s1885_s22 + $0x300] sm:$0xff] }
  0x1d   : > { %170 = vst [vmem:[%s1890_s23 + $0xb0] sm:$0xff] %v169_v22  ;;  %172 = vst [vmem:[%s1890_s23 + $0xb8] sm:$0xff] %v171_v23  ;;  %v175_v25 = vld [vmem:[%s1885_s22 + $0x308] sm:$0xff]  ;;  %v177_v26 = vld [vmem:[%s1885_s22 + $0x310] sm:$0xff] }
  0x1e   : > { %174 = vst [vmem:[%s1890_s23 + $0xc0] sm:$0xff] %v173_v24  ;;  %176 = vst [vmem:[%s1890_s23 + $0xc8] sm:$0xff] %v175_v25  ;;  %v179_v27 = vld [vmem:[%s1885_s22 + $0x318] sm:$0xff]  ;;  %v181_v28 = vld [vmem:[%s1885_s22 + $0x320] sm:$0xff] }
  0x1f   : > { %178 = vst [vmem:[%s1890_s23 + $0xd0] sm:$0xff] %v177_v26  ;;  %v183_v29 = vld [vmem:[%s1885_s22 + $0x328] sm:$0xff]  ;;  %180 = vst [vmem:[%s1890_s23 + $0xd8] sm:$0xff] %v179_v27  ;;  %v185_v30 = vld [vmem:[%s1885_s22 + $0x330] sm:$0xff] }
  0x20   : > { %182 = vst [vmem:[%s1890_s23 + $0xe0] sm:$0xff] %v181_v28  ;;  %184 = vst [vmem:[%s1890_s23 + $0xe8] sm:$0xff] %v183_v29  ;;  %v187_v31 = vld [vmem:[%s1885_s22 + $0x338] sm:$0xff]  ;;  %v189_v32 = vld [vmem:[%s1885_s22 + $0x400] sm:$0xff] }
  0x21   : > { %186 = vst [vmem:[%s1890_s23 + $0xf0] sm:$0xff] %v185_v30  ;;  %188 = vst [vmem:[%s1890_s23 + $0xf8] sm:$0xff] %v187_v31  ;;  %v191_v33 = vld [vmem:[%s1885_s22 + $0x408] sm:$0xff]  ;;  %v193_v34 = vld [vmem:[%s1885_s22 + $0x410] sm:$0xff] }
  0x22   : > { %190 = vst [vmem:[%s1890_s23 + $0x100] sm:$0xff] %v189_v32  ;;  %v195_v35 = vld [vmem:[%s1885_s22 + $0x418] sm:$0xff]  ;;  %192 = vst [vmem:[%s1890_s23 + $0x108] sm:$0xff] %v191_v33  ;;  %v197_v36 = vld [vmem:[%s1885_s22 + $0x420] sm:$0xff] }
  0x23   : > { %194 = vst [vmem:[%s1890_s23 + $0x110] sm:$0xff] %v193_v34  ;;  %196 = vst [vmem:[%s1890_s23 + $0x118] sm:$0xff] %v195_v35  ;;  %v199_v37 = vld [vmem:[%s1885_s22 + $0x428] sm:$0xff]  ;;  %v201_v38 = vld [vmem:[%s1885_s22 + $0x430] sm:$0xff] }
  0x24   : > { %198 = vst [vmem:[%s1890_s23 + $0x120] sm:$0xff] %v197_v36  ;;  %200 = vst [vmem:[%s1890_s23 + $0x128] sm:$0xff] %v199_v37  ;;  %v203_v39 = vld [vmem:[%s1885_s22 + $0x438] sm:$0xff]  ;;  %v205_v40 = vld [vmem:[%s1885_s22 + $0x500] sm:$0xff] }
  0x25   : > { %202 = vst [vmem:[%s1890_s23 + $0x130] sm:$0xff] %v201_v38  ;;  %v207_v41 = vld [vmem:[%s1885_s22 + $0x508] sm:$0xff]  ;;  %204 = vst [vmem:[%s1890_s23 + $0x138] sm:$0xff] %v203_v39  ;;  %v209_v42 = vld [vmem:[%s1885_s22 + $0x510] sm:$0xff] }
  0x26   : > { %206 = vst [vmem:[%s1890_s23 + $0x140] sm:$0xff] %v205_v40  ;;  %208 = vst [vmem:[%s1890_s23 + $0x148] sm:$0xff] %v207_v41  ;;  %v211_v43 = vld [vmem:[%s1885_s22 + $0x518] sm:$0xff]  ;;  %v213_v44 = vld [vmem:[%s1885_s22 + $0x520] sm:$0xff] }
  0x27   : > { %210 = vst [vmem:[%s1890_s23 + $0x150] sm:$0xff] %v209_v42  ;;  %212 = vst [vmem:[%s1890_s23 + $0x158] sm:$0xff] %v211_v43  ;;  %v215_v45 = vld [vmem:[%s1885_s22 + $0x528] sm:$0xff]  ;;  %v217_v46 = vld [vmem:[%s1885_s22 + $0x530] sm:$0xff] }
  0x28   : > { %214 = vst [vmem:[%s1890_s23 + $0x160] sm:$0xff] %v213_v44  ;;  %v219_v47 = vld [vmem:[%s1885_s22 + $0x538] sm:$0xff]  ;;  %216 = vst [vmem:[%s1890_s23 + $0x168] sm:$0xff] %v215_v45  ;;  %v221_v48 = vld [vmem:[%s1885_s22 + $0x600] sm:$0xff] }
  0x29   : > { %218 = vst [vmem:[%s1890_s23 + $0x170] sm:$0xff] %v217_v46  ;;  %220 = vst [vmem:[%s1890_s23 + $0x178] sm:$0xff] %v219_v47  ;;  %v223_v49 = vld [vmem:[%s1885_s22 + $0x608] sm:$0xff]  ;;  %v225_v50 = vld [vmem:[%s1885_s22 + $0x610] sm:$0xff] }
  0x2a   : > { %222 = vst [vmem:[%s1890_s23 + $0x180] sm:$0xff] %v221_v48  ;;  %224 = vst [vmem:[%s1890_s23 + $0x188] sm:$0xff] %v223_v49  ;;  %v227_v51 = vld [vmem:[%s1885_s22 + $0x618] sm:$0xff]  ;;  %v229_v52 = vld [vmem:[%s1885_s22 + $0x620] sm:$0xff] }
  0x2b   : > { %226 = vst [vmem:[%s1890_s23 + $0x190] sm:$0xff] %v225_v50  ;;  %v231_v53 = vld [vmem:[%s1885_s22 + $0x628] sm:$0xff]  ;;  %228 = vst [vmem:[%s1890_s23 + $0x198] sm:$0xff] %v227_v51  ;;  %v233_v54 = vld [vmem:[%s1885_s22 + $0x630] sm:$0xff] }
  0x2c   : > { %230 = vst [vmem:[%s1890_s23 + $0x1a0] sm:$0xff] %v229_v52  ;;  %232 = vst [vmem:[%s1890_s23 + $0x1a8] sm:$0xff] %v231_v53  ;;  %v235_v55 = vld [vmem:[%s1885_s22 + $0x638] sm:$0xff]  ;;  %v237_v56 = vld [vmem:[%s1885_s22 + $0x700] sm:$0xff] }
  0x2d   : > { %234 = vst [vmem:[%s1890_s23 + $0x1b0] sm:$0xff] %v233_v54  ;;  %236 = vst [vmem:[%s1890_s23 + $0x1b8] sm:$0xff] %v235_v55  ;;  %v239_v57 = vld [vmem:[%s1885_s22 + $0x708] sm:$0xff]  ;;  %v241_v58 = vld [vmem:[%s1885_s22 + $0x710] sm:$0xff] }
  0x2e   : > { %238 = vst [vmem:[%s1890_s23 + $0x1c0] sm:$0xff] %v237_v56  ;;  %v243_v59 = vld [vmem:[%s1885_s22 + $0x718] sm:$0xff]  ;;  %240 = vst [vmem:[%s1890_s23 + $0x1c8] sm:$0xff] %v239_v57  ;;  %v245_v60 = vld [vmem:[%s1885_s22 + $0x720] sm:$0xff] }
  0x2f   : > { %242 = vst [vmem:[%s1890_s23 + $0x1d0] sm:$0xff] %v241_v58  ;;  %244 = vst [vmem:[%s1890_s23 + $0x1d8] sm:$0xff] %v243_v59  ;;  %v247_v61 = vld [vmem:[%s1885_s22 + $0x728] sm:$0xff]  ;;  %v249_v62 = vld [vmem:[%s1885_s22 + $0x730] sm:$0xff] }
  0x30   : > { %246 = vst [vmem:[%s1890_s23 + $0x1e0] sm:$0xff] %v245_v60  ;;  %248 = vst [vmem:[%s1890_s23 + $0x1e8] sm:$0xff] %v247_v61  ;;  %v251_v63 = vld [vmem:[%s1885_s22 + $0x738] sm:$0xff]  ;;  %v253_v0 = vld [vmem:[%s1885_s22 + $0x800] sm:$0xff] }
  0x31   : > { %250 = vst [vmem:[%s1890_s23 + $0x1f0] sm:$0xff] %v249_v62  ;;  %v255_v1 = vld [vmem:[%s1885_s22 + $0x808] sm:$0xff]  ;;  %252 = vst [vmem:[%s1890_s23 + $0x1f8] sm:$0xff] %v251_v63  ;;  %v257_v2 = vld [vmem:[%s1885_s22 + $0x810] sm:$0xff] }
  0x32   : > { %254 = vst [vmem:[%s1890_s23 + $0x200] sm:$0xff] %v253_v0  ;;  %256 = vst [vmem:[%s1890_s23 + $0x208] sm:$0xff] %v255_v1  ;;  %v259_v3 = vld [vmem:[%s1885_s22 + $0x818] sm:$0xff]  ;;  %v261_v4 = vld [vmem:[%s1885_s22 + $0x820] sm:$0xff] }
  0x33   : > { %258 = vst [vmem:[%s1890_s23 + $0x210] sm:$0xff] %v257_v2  ;;  %260 = vst [vmem:[%s1890_s23 + $0x218] sm:$0xff] %v259_v3  ;;  %v263_v5 = vld [vmem:[%s1885_s22 + $0x828] sm:$0xff]  ;;  %v265_v6 = vld [vmem:[%s1885_s22 + $0x830] sm:$0xff] }
  0x34   : > { %262 = vst [vmem:[%s1890_s23 + $0x220] sm:$0xff] %v261_v4  ;;  %v267_v7 = vld [vmem:[%s1885_s22 + $0x838] sm:$0xff]  ;;  %264 = vst [vmem:[%s1890_s23 + $0x228] sm:$0xff] %v263_v5  ;;  %v269_v8 = vld [vmem:[%s1885_s22 + $0x900] sm:$0xff] }
  0x35   : > { %266 = vst [vmem:[%s1890_s23 + $0x230] sm:$0xff] %v265_v6  ;;  %268 = vst [vmem:[%s1890_s23 + $0x238] sm:$0xff] %v267_v7  ;;  %v271_v9 = vld [vmem:[%s1885_s22 + $0x908] sm:$0xff]  ;;  %v273_v10 = vld [vmem:[%s1885_s22 + $0x910] sm:$0xff] }
  0x36   : > { %270 = vst [vmem:[%s1890_s23 + $0x240] sm:$0xff] %v269_v8  ;;  %272 = vst [vmem:[%s1890_s23 + $0x248] sm:$0xff] %v271_v9  ;;  %v275_v11 = vld [vmem:[%s1885_s22 + $0x918] sm:$0xff]  ;;  %v277_v12 = vld [vmem:[%s1885_s22 + $0x920] sm:$0xff] }
  0x37   : > { %274 = vst [vmem:[%s1890_s23 + $0x250] sm:$0xff] %v273_v10  ;;  %v279_v13 = vld [vmem:[%s1885_s22 + $0x928] sm:$0xff]  ;;  %276 = vst [vmem:[%s1890_s23 + $0x258] sm:$0xff] %v275_v11  ;;  %v281_v14 = vld [vmem:[%s1885_s22 + $0x930] sm:$0xff] }
  0x38   : > { %278 = vst [vmem:[%s1890_s23 + $0x260] sm:$0xff] %v277_v12  ;;  %280 = vst [vmem:[%s1890_s23 + $0x268] sm:$0xff] %v279_v13  ;;  %v283_v15 = vld [vmem:[%s1885_s22 + $0x938] sm:$0xff]  ;;  %v285_v16 = vld [vmem:[%s1885_s22 + $0xa00] sm:$0xff] }
  0x39   : > { %282 = vst [vmem:[%s1890_s23 + $0x270] sm:$0xff] %v281_v14  ;;  %284 = vst [vmem:[%s1890_s23 + $0x278] sm:$0xff] %v283_v15  ;;  %v287_v17 = vld [vmem:[%s1885_s22 + $0xa08] sm:$0xff]  ;;  %v289_v18 = vld [vmem:[%s1885_s22 + $0xa10] sm:$0xff] }
  0x3a   : > { %286 = vst [vmem:[%s1890_s23 + $0x280] sm:$0xff] %v285_v16  ;;  %v291_v19 = vld [vmem:[%s1885_s22 + $0xa18] sm:$0xff]  ;;  %288 = vst [vmem:[%s1890_s23 + $0x288] sm:$0xff] %v287_v17  ;;  %v293_v20 = vld [vmem:[%s1885_s22 + $0xa20] sm:$0xff] }
  0x3b   : > { %290 = vst [vmem:[%s1890_s23 + $0x290] sm:$0xff] %v289_v18  ;;  %292 = vst [vmem:[%s1890_s23 + $0x298] sm:$0xff] %v291_v19  ;;  %v295_v21 = vld [vmem:[%s1885_s22 + $0xa28] sm:$0xff]  ;;  %v297_v22 = vld [vmem:[%s1885_s22 + $0xa30] sm:$0xff] }
  0x3c   : > { %294 = vst [vmem:[%s1890_s23 + $0x2a0] sm:$0xff] %v293_v20  ;;  %296 = vst [vmem:[%s1890_s23 + $0x2a8] sm:$0xff] %v295_v21  ;;  %v299_v23 = vld [vmem:[%s1885_s22 + $0xa38] sm:$0xff]  ;;  %v301_v24 = vld [vmem:[%s1885_s22 + $0xb00] sm:$0xff] }
  0x3d   : > { %298 = vst [vmem:[%s1890_s23 + $0x2b0] sm:$0xff] %v297_v22  ;;  %v303_v25 = vld [vmem:[%s1885_s22 + $0xb08] sm:$0xff]  ;;  %300 = vst [vmem:[%s1890_s23 + $0x2b8] sm:$0xff] %v299_v23  ;;  %v305_v26 = vld [vmem:[%s1885_s22 + $0xb10] sm:$0xff] }
  0x3e   : > { %302 = vst [vmem:[%s1890_s23 + $0x2c0] sm:$0xff] %v301_v24  ;;  %304 = vst [vmem:[%s1890_s23 + $0x2c8] sm:$0xff] %v303_v25  ;;  %v307_v27 = vld [vmem:[%s1885_s22 + $0xb18] sm:$0xff]  ;;  %v309_v28 = vld [vmem:[%s1885_s22 + $0xb20] sm:$0xff] }
  0x3f   : > { %306 = vst [vmem:[%s1890_s23 + $0x2d0] sm:$0xff] %v305_v26  ;;  %308 = vst [vmem:[%s1890_s23 + $0x2d8] sm:$0xff] %v307_v27  ;;  %v311_v29 = vld [vmem:[%s1885_s22 + $0xb28] sm:$0xff]  ;;  %v313_v30 = vld [vmem:[%s1885_s22 + $0xb30] sm:$0xff] }
  0x40   : > { %310 = vst [vmem:[%s1890_s23 + $0x2e0] sm:$0xff] %v309_v28  ;;  %v315_v31 = vld [vmem:[%s1885_s22 + $0xb38] sm:$0xff]  ;;  %312 = vst [vmem:[%s1890_s23 + $0x2e8] sm:$0xff] %v311_v29  ;;  %v317_v32 = vld [vmem:[%s1885_s22 + $0xc00] sm:$0xff] }
  0x41   : > { %314 = vst [vmem:[%s1890_s23 + $0x2f0] sm:$0xff] %v313_v30  ;;  %316 = vst [vmem:[%s1890_s23 + $0x2f8] sm:$0xff] %v315_v31  ;;  %v319_v33 = vld [vmem:[%s1885_s22 + $0xc08] sm:$0xff]  ;;  %v321_v34 = vld [vmem:[%s1885_s22 + $0xc10] sm:$0xff] }
  0x42   : > { %318 = vst [vmem:[%s1890_s23 + $0x300] sm:$0xff] %v317_v32  ;;  %320 = vst [vmem:[%s1890_s23 + $0x308] sm:$0xff] %v319_v33  ;;  %v323_v35 = vld [vmem:[%s1885_s22 + $0xc18] sm:$0xff]  ;;  %v325_v36 = vld [vmem:[%s1885_s22 + $0xc20] sm:$0xff] }
  0x43   : > { %322 = vst [vmem:[%s1890_s23 + $0x310] sm:$0xff] %v321_v34  ;;  %v327_v37 = vld [vmem:[%s1885_s22 + $0xc28] sm:$0xff]  ;;  %324 = vst [vmem:[%s1890_s23 + $0x318] sm:$0xff] %v323_v35  ;;  %v329_v38 = vld [vmem:[%s1885_s22 + $0xc30] sm:$0xff] }
  0x44   : > { %326 = vst [vmem:[%s1890_s23 + $0x320] sm:$0xff] %v325_v36  ;;  %328 = vst [vmem:[%s1890_s23 + $0x328] sm:$0xff] %v327_v37  ;;  %v331_v39 = vld [vmem:[%s1885_s22 + $0xc38] sm:$0xff]  ;;  %v333_v40 = vld [vmem:[%s1885_s22 + $0xd00] sm:$0xff] }
  0x45   : > { %330 = vst [vmem:[%s1890_s23 + $0x330] sm:$0xff] %v329_v38  ;;  %332 = vst [vmem:[%s1890_s23 + $0x338] sm:$0xff] %v331_v39  ;;  %v335_v41 = vld [vmem:[%s1885_s22 + $0xd08] sm:$0xff]  ;;  %v337_v42 = vld [vmem:[%s1885_s22 + $0xd10] sm:$0xff] }
  0x46   : > { %334 = vst [vmem:[%s1890_s23 + $0x340] sm:$0xff] %v333_v40  ;;  %v339_v43 = vld [vmem:[%s1885_s22 + $0xd18] sm:$0xff]  ;;  %336 = vst [vmem:[%s1890_s23 + $0x348] sm:$0xff] %v335_v41  ;;  %v341_v44 = vld [vmem:[%s1885_s22 + $0xd20] sm:$0xff] }
  0x47   : > { %338 = vst [vmem:[%s1890_s23 + $0x350] sm:$0xff] %v337_v42  ;;  %340 = vst [vmem:[%s1890_s23 + $0x358] sm:$0xff] %v339_v43  ;;  %v343_v45 = vld [vmem:[%s1885_s22 + $0xd28] sm:$0xff]  ;;  %v345_v46 = vld [vmem:[%s1885_s22 + $0xd30] sm:$0xff] }
  0x48   : > { %342 = vst [vmem:[%s1890_s23 + $0x360] sm:$0xff] %v341_v44  ;;  %344 = vst [vmem:[%s1890_s23 + $0x368] sm:$0xff] %v343_v45  ;;  %v347_v47 = vld [vmem:[%s1885_s22 + $0xd38] sm:$0xff]  ;;  %v349_v48 = vld [vmem:[%s1885_s22 + $0xe00] sm:$0xff] }
  0x49   : > { %346 = vst [vmem:[%s1890_s23 + $0x370] sm:$0xff] %v345_v46  ;;  %v351_v49 = vld [vmem:[%s1885_s22 + $0xe08] sm:$0xff]  ;;  %348 = vst [vmem:[%s1890_s23 + $0x378] sm:$0xff] %v347_v47  ;;  %v353_v50 = vld [vmem:[%s1885_s22 + $0xe10] sm:$0xff] }
  0x4a   : > { %350 = vst [vmem:[%s1890_s23 + $0x380] sm:$0xff] %v349_v48  ;;  %352 = vst [vmem:[%s1890_s23 + $0x388] sm:$0xff] %v351_v49  ;;  %v355_v51 = vld [vmem:[%s1885_s22 + $0xe18] sm:$0xff]  ;;  %v357_v52 = vld [vmem:[%s1885_s22 + $0xe20] sm:$0xff] }
  0x4b   : > { %354 = vst [vmem:[%s1890_s23 + $0x390] sm:$0xff] %v353_v50  ;;  %356 = vst [vmem:[%s1890_s23 + $0x398] sm:$0xff] %v355_v51  ;;  %v359_v53 = vld [vmem:[%s1885_s22 + $0xe28] sm:$0xff]  ;;  %v361_v54 = vld [vmem:[%s1885_s22 + $0xe30] sm:$0xff] }
  0x4c   : > { %358 = vst [vmem:[%s1890_s23 + $0x3a0] sm:$0xff] %v357_v52  ;;  %v363_v55 = vld [vmem:[%s1885_s22 + $0xe38] sm:$0xff]  ;;  %360 = vst [vmem:[%s1890_s23 + $0x3a8] sm:$0xff] %v359_v53  ;;  %v365_v56 = vld [vmem:[%s1885_s22 + $0xf00] sm:$0xff] }
  0x4d   : > { %362 = vst [vmem:[%s1890_s23 + $0x3b0] sm:$0xff] %v361_v54  ;;  %364 = vst [vmem:[%s1890_s23 + $0x3b8] sm:$0xff] %v363_v55  ;;  %v367_v57 = vld [vmem:[%s1885_s22 + $0xf08] sm:$0xff]  ;;  %v369_v58 = vld [vmem:[%s1885_s22 + $0xf10] sm:$0xff] }
  0x4e   : > { %366 = vst [vmem:[%s1890_s23 + $0x3c0] sm:$0xff] %v365_v56  ;;  %368 = vst [vmem:[%s1890_s23 + $0x3c8] sm:$0xff] %v367_v57  ;;  %v371_v59 = vld [vmem:[%s1885_s22 + $0xf18] sm:$0xff]  ;;  %v373_v60 = vld [vmem:[%s1885_s22 + $0xf20] sm:$0xff] }
  0x4f   : > { %370 = vst [vmem:[%s1890_s23 + $0x3d0] sm:$0xff] %v369_v58  ;;  %v375_v61 = vld [vmem:[%s1885_s22 + $0xf28] sm:$0xff]  ;;  %372 = vst [vmem:[%s1890_s23 + $0x3d8] sm:$0xff] %v371_v59  ;;  %v377_v62 = vld [vmem:[%s1885_s22 + $0xf30] sm:$0xff] }
  0x50   : > { %374 = vst [vmem:[%s1890_s23 + $0x3e0] sm:$0xff] %v373_v60  ;;  %376 = vst [vmem:[%s1890_s23 + $0x3e8] sm:$0xff] %v375_v61  ;;  %v379_v63 = vld [vmem:[%s1885_s22 + $0xf38] sm:$0xff] }
  0x51   : > { %378 = vst [vmem:[%s1890_s23 + $0x3f0] sm:$0xff] %v377_v62  ;;  %380 = vst [vmem:[%s1890_s23 + $0x3f8] sm:$0xff] %v379_v63 }
  0x52 PF: > { %p1619_p5 = scmp.ge.s32.totalorder %s1833_s11, 1  ;;  %p385_p6 = scmp.lt.s32.totalorder %s1833_s11, 5 }
  0x54   : > { %p386_p7 = pnand %p1619_p5, %p385_p6 }
  0x55   : > { %s392_s24 = sand.u32 (!%p386_p7), 1, %s1825_s9   ;;  %v1835_v0 = vmov (!%p386_p7), 0   ;;  %s1621_s29 = sshll.u32 (!%p386_p7), %s1612_s12, 4 }
  0x56   : > { %389 = sbr.rel (%p386_p7) target bundleno = 447 (0x1bf), region = 47  ;;  %s1620_s25 = sshll.u32 (!%p386_p7), %s392_s24, 10  ;;  %1222 = vmatprep.mubr.bf16.mxu0 (!%p386_p7), %v1835_v0  ;;  %1263 = vmatprep.mubr.bf16.mxu1 (!%p386_p7), %v1835_v0 }
  0x57   : > { %s2150_s26 = scalar_lea.vmem (!%p386_p7), [#allocation2], %s1620_s25  ;;  %p415_p8 = scmp.lt.s32.totalorder (!%p386_p7), %s1621_s29, 63 }
  0x58   : > { %v422_v1 = vld [vmem:[%s2150_s26] sm:$0xff] (!%p386_p7)  ;;  %v423_v3 = vld [vmem:[%s2150_s26 + $0x8] sm:$0xff] (!%p386_p7)  ;;  %v424_v63 = vld [vmem:[%s2150_s26 + $0x10] sm:$0xff] (!%p386_p7) }
  0x59   : > { %v430_v2 = vld [vmem:[%s2150_s26 + $0x40] sm:$0xff] (!%p386_p7)  ;;  %v431_v5 = vld [vmem:[%s2150_s26 + $0x48] sm:$0xff] (!%p386_p7) }
  0x5a   : > { %v1624_v4 = vcombine.high (!%p386_p7), %v422_v1, %v430_v2  ;;  %v1623_v6 = vcombine.low (!%p386_p7), %v422_v1, %v430_v2  ;;  %v438_v7 = vld [vmem:[%s2150_s26 + $0x80] sm:$0xff] (!%p386_p7)  ;;  %v1626_v9 = vcombine.high (!%p386_p7), %v423_v3, %v431_v5  ;;  %v1625_v10 = vcombine.low (!%p386_p7), %v423_v3, %v431_v5  ;;  %v439_v12 = vld [vmem:[%s2150_s26 + $0x88] sm:$0xff] (!%p386_p7)  ;;  %v432_v1 = vld [vmem:[%s2150_s26 + $0x50] sm:$0xff] (!%p386_p7) }
  0x5b   : > { %v446_v8 = vld [vmem:[%s2150_s26 + $0xc0] sm:$0xff] (!%p386_p7)  ;;  %v447_v13 = vld [vmem:[%s2150_s26 + $0xc8] sm:$0xff] (!%p386_p7)  ;;  %v425_v2 = vld [vmem:[%s2150_s26 + $0x18] sm:$0xff] (!%p386_p7) }
  0x5c   : > { %v1640_v11 = vcombine.high (!%p386_p7), %v438_v7, %v446_v8  ;;  %v454_v14 = vld [vmem:[%s2150_s26 + $0x100] sm:$0xff] (!%p386_p7)  ;;  %1190 = vmatprep.subr.bf16.mxu0 (!%p386_p7), %v1624_v4  ;;  %v1642_v15 = vcombine.high (!%p386_p7), %v439_v12, %v447_v13  ;;  %v455_v17 = vld [vmem:[%s2150_s26 + $0x108] sm:$0xff] (!%p386_p7)  ;;  %1231 = vmatprep.subr.bf16.mxu1 (!%p386_p7), %v1626_v9  ;;  %v1639_v19 = vcombine.low (!%p386_p7), %v438_v7, %v446_v8  ;;  %v433_v3 = vld [vmem:[%s2150_s26 + $0x58] sm:$0xff] (!%p386_p7) }
  0x5d   : > { %v462_v16 = vld [vmem:[%s2150_s26 + $0x140] sm:$0xff]  ;;  %v463_v18 = vld [vmem:[%s2150_s26 + $0x148] sm:$0xff]  ;;  %1191 = vmatpush1.bf16.msra.mxu0 %v1623_v6  ;;  %1232 = vmatpush1.bf16.msra.mxu1 %v1625_v10  ;;  %v1641_v20 = vcombine.low %v439_v12, %v447_v13  ;;  %v1628_v6 = vcombine.high %v424_v63, %v432_v1  ;;  %v1630_v7 = vcombine.high %v425_v2, %v433_v3  ;;  %v440_v8 = vld [vmem:[%s2150_s26 + $0x90] sm:$0xff]  ;;  %s2339_s29 = smov (!%p415_p8, %s1621_s29), 63 }
  0x5e   : > { %1192 = vmatprep.subr.bf16.mxu0 %v1640_v11  ;;  %v1656_v21 = vcombine.high %v454_v14, %v462_v16  ;;  %1233 = vmatprep.subr.bf16.mxu1 %v1642_v15  ;;  %v1658_v22 = vcombine.high %v455_v17, %v463_v18  ;;  %v470_v23 = vld [vmem:[%s2150_s26 + $0x180] sm:$0xff]  ;;  %v471_v25 = vld [vmem:[%s2150_s26 + $0x188] sm:$0xff]  ;;  %v1655_v27 = vcombine.low %v454_v14, %v462_v16  ;;  %v448_v9 = vld [vmem:[%s2150_s26 + $0xd0] sm:$0xff]  ;;  %s1622_s30 = sshll.u32 %s2339_s29, 3 }
  0x5f   : > { %v478_v24 = vld [vmem:[%s2150_s26 + $0x1c0] sm:$0xff]  ;;  %v479_v26 = vld [vmem:[%s2150_s26 + $0x1c8] sm:$0xff]  ;;  %v1657_v28 = vcombine.low %v455_v17, %v463_v18  ;;  %v441_v10 = vld [vmem:[%s2150_s26 + $0x98] sm:$0xff]  ;;  %v1627_v13 = vcombine.low %v424_v63, %v432_v1  ;;  %v1629_v14 = vcombine.low %v425_v2, %v433_v3  ;;  %v1644_v15 = vcombine.high %v440_v8, %v448_v9  ;;  %s2304_s5 = scalar_lea.vmem %s2334_s2, %s1622_s30 }
  0x60   : > { %v1672_v29 = vcombine.high %v470_v23, %v478_v24  ;;  %v1674_v30 = vcombine.high %v471_v25, %v479_v26  ;;  %v486_v31 = vld [vmem:[%s2150_s26 + $0x200] sm:$0xff]  ;;  %v487_v33 = vld [vmem:[%s2150_s26 + $0x208] sm:$0xff]  ;;  %v1671_v35 = vcombine.low %v470_v23, %v478_v24  ;;  %v1673_v36 = vcombine.low %v471_v25, %v479_v26  ;;  %v449_v11 = vld [vmem:[%s2150_s26 + $0xd8] sm:$0xff] }
  0x61   : > { %1193 = vmatpush1.bf16.msra.mxu0 %v1639_v19  ;;  %1234 = vmatpush1.bf16.msra.mxu1 %v1641_v20  ;;  %v494_v32 = vld [vmem:[%s2150_s26 + $0x240] sm:$0xff]  ;;  %v495_v34 = vld [vmem:[%s2150_s26 + $0x248] sm:$0xff]  ;;  %v1646_v16 = vcombine.high %v441_v10, %v449_v11  ;;  %v456_v17 = vld [vmem:[%s2150_s26 + $0x110] sm:$0xff] }
  0x62   : > { %1194 = vmatprep.subr.bf16.mxu0 %v1656_v21  ;;  %1235 = vmatprep.subr.bf16.mxu1 %v1658_v22  ;;  %v1688_v37 = vcombine.high %v486_v31, %v494_v32  ;;  %v1690_v38 = vcombine.high %v487_v33, %v495_v34  ;;  %v502_v39 = vld [vmem:[%s2150_s26 + $0x280] sm:$0xff]  ;;  %v503_v41 = vld [vmem:[%s2150_s26 + $0x288] sm:$0xff]  ;;  %v1687_v43 = vcombine.low %v486_v31, %v494_v32  ;;  %v464_v18 = vld [vmem:[%s2150_s26 + $0x150] sm:$0xff] }
  0x63   : > { %v510_v40 = vld [vmem:[%s2150_s26 + $0x2c0] sm:$0xff]  ;;  %v511_v42 = vld [vmem:[%s2150_s26 + $0x2c8] sm:$0xff]  ;;  %v1689_v44 = vcombine.low %v487_v33, %v495_v34  ;;  %v457_v19 = vld [vmem:[%s2150_s26 + $0x118] sm:$0xff]  ;;  %v1643_v21 = vcombine.low %v440_v8, %v448_v9  ;;  %v1645_v22 = vcombine.low %v441_v10, %v449_v11  ;;  %v1660_v23 = vcombine.high %v456_v17, %v464_v18 }
  0x64   : > { %v1704_v45 = vcombine.high %v502_v39, %v510_v40  ;;  %v1706_v46 = vcombine.high %v503_v41, %v511_v42  ;;  %v518_v47 = vld [vmem:[%s2150_s26 + $0x300] sm:$0xff]  ;;  %v519_v49 = vld [vmem:[%s2150_s26 + $0x308] sm:$0xff]  ;;  %v1703_v51 = vcombine.low %v502_v39, %v510_v40  ;;  %v1705_v52 = vcombine.low %v503_v41, %v511_v42  ;;  %v465_v20 = vld [vmem:[%s2150_s26 + $0x158] sm:$0xff] }
  0x65   : > { %1195 = vmatpush1.bf16.msra.mxu0 %v1655_v27  ;;  %1236 = vmatpush1.bf16.msra.mxu1 %v1657_v28  ;;  %v526_v48 = vld [vmem:[%s2150_s26 + $0x340] sm:$0xff]  ;;  %v527_v50 = vld [vmem:[%s2150_s26 + $0x348] sm:$0xff]  ;;  %v1662_v24 = vcombine.high %v457_v19, %v465_v20  ;;  %v472_v25 = vld [vmem:[%s2150_s26 + $0x190] sm:$0xff] }
  0x66   : > { %1196 = vmatprep.subr.bf16.mxu0 %v1672_v29  ;;  %1237 = vmatprep.subr.bf16.mxu1 %v1674_v30  ;;  %v1720_v53 = vcombine.high %v518_v47, %v526_v48  ;;  %v1722_v54 = vcombine.high %v519_v49, %v527_v50  ;;  %v534_v55 = vld [vmem:[%s2150_s26 + $0x380] sm:$0xff]  ;;  %v535_v57 = vld [vmem:[%s2150_s26 + $0x388] sm:$0xff]  ;;  %v1719_v59 = vcombine.low %v518_v47, %v526_v48  ;;  %v480_v26 = vld [vmem:[%s2150_s26 + $0x1d0] sm:$0xff] }
  0x67   : > { %v542_v56 = vld [vmem:[%s2150_s26 + $0x3c0] sm:$0xff]  ;;  %v543_v58 = vld [vmem:[%s2150_s26 + $0x3c8] sm:$0xff]  ;;  %v1721_v60 = vcombine.low %v519_v49, %v527_v50  ;;  %v473_v27 = vld [vmem:[%s2150_s26 + $0x198] sm:$0xff]  ;;  %v1659_v29 = vcombine.low %v456_v17, %v464_v18  ;;  %v1661_v30 = vcombine.low %v457_v19, %v465_v20  ;;  %v1676_v31 = vcombine.high %v472_v25, %v480_v26 }
  0x68   : > { %v1736_v61 = vcombine.high %v534_v55, %v542_v56  ;;  %v1738_v62 = vcombine.high %v535_v57, %v543_v58  ;;  %v1735_v4 = vcombine.low %v534_v55, %v542_v56  ;;  %v1737_v5 = vcombine.low %v535_v57, %v543_v58  ;;  %v2195_v12 = vld [vmem:[%s2332_s0] sm:$0xf]  ;;  %v481_v28 = vld [vmem:[%s2150_s26 + $0x1d8] sm:$0xff]  ;;  %v488_v33 = vld [vmem:[%s2150_s26 + $0x210] sm:$0xff] }
  0x69   : > { %1197 = vmatpush1.bf16.msra.mxu0 %v1671_v35  ;;  %1238 = vmatpush1.bf16.msra.mxu1 %v1673_v36  ;;  %v1678_v32 = vcombine.high %v473_v27, %v481_v28  ;;  %v496_v34 = vld [vmem:[%s2150_s26 + $0x250] sm:$0xff]  ;;  %v489_v35 = vld [vmem:[%s2150_s26 + $0x218] sm:$0xff]  ;;  %v426_v2 = vld [vmem:[%s2150_s26 + $0x20] sm:$0xff] }
  0x6a   : > { %1198 = vmatprep.subr.bf16.mxu0 %v1688_v37  ;;  %1239 = vmatprep.subr.bf16.mxu1 %v1690_v38  ;;  %v497_v36 = vld [vmem:[%s2150_s26 + $0x258] sm:$0xff]  ;;  %v1675_v37 = vcombine.low %v472_v25, %v480_v26  ;;  %v1677_v38 = vcombine.low %v473_v27, %v481_v28  ;;  %v1692_v39 = vcombine.high %v488_v33, %v496_v34  ;;  %v504_v41 = vld [vmem:[%s2150_s26 + $0x290] sm:$0xff]  ;;  %v434_v3 = vld [vmem:[%s2150_s26 + $0x60] sm:$0xff] }
  0x6b   : > { %v1694_v40 = vcombine.high %v489_v35, %v497_v36  ;;  %v512_v42 = vld [vmem:[%s2150_s26 + $0x2d0] sm:$0xff]  ;;  %v1632_v8 = vcombine.high %v426_v2, %v434_v3  ;;  %v442_v10 = vld [vmem:[%s2150_s26 + $0xa0] sm:$0xff] }
  0x6c   : > { %v1708_v47 = vcombine.high %v504_v41, %v512_v42  ;;  %v520_v49 = vld [vmem:[%s2150_s26 + $0x310] sm:$0xff]  ;;  %v450_v11 = vld [vmem:[%s2150_s26 + $0xe0] sm:$0xff] }
  0x6d   : > { %1199 = vmatpush1.bf16.msra.mxu0 %v1687_v43  ;;  %1240 = vmatpush1.bf16.msra.mxu1 %v1689_v44  ;;  %v505_v43 = vld [vmem:[%s2150_s26 + $0x298] sm:$0xff]  ;;  %v528_v50 = vld [vmem:[%s2150_s26 + $0x350] sm:$0xff]  ;;  %v1648_v17 = vcombine.high %v442_v10, %v450_v11  ;;  %v458_v19 = vld [vmem:[%s2150_s26 + $0x120] sm:$0xff] }
  0x6e   : > { %1200 = vmatprep.subr.bf16.mxu0 %v1704_v45  ;;  %1241 = vmatprep.subr.bf16.mxu1 %v1706_v46  ;;  %v513_v44 = vld [vmem:[%s2150_s26 + $0x2d8] sm:$0xff]  ;;  %v1691_v45 = vcombine.low %v488_v33, %v496_v34  ;;  %v1693_v46 = vcombine.low %v489_v35, %v497_v36  ;;  %v1724_v55 = vcombine.high %v520_v49, %v528_v50  ;;  %v536_v57 = vld [vmem:[%s2150_s26 + $0x390] sm:$0xff]  ;;  %v466_v20 = vld [vmem:[%s2150_s26 + $0x160] sm:$0xff] }
  0x6f   : > { %v1710_v48 = vcombine.high %v505_v43, %v513_v44  ;;  %v544_v58 = vld [vmem:[%s2150_s26 + $0x3d0] sm:$0xff]  ;;  %v1664_v25 = vcombine.high %v458_v19, %v466_v20  ;;  %v474_v27 = vld [vmem:[%s2150_s26 + $0x1a0] sm:$0xff] }
  0x70   : > { %v1740_v63 = vcombine.high %v536_v57, %v544_v58  ;;  %v482_v28 = vld [vmem:[%s2150_s26 + $0x1e0] sm:$0xff] }
  0x71   : > { %1201 = vmatpush1.bf16.msra.mxu0 %v1703_v51  ;;  %1242 = vmatpush1.bf16.msra.mxu1 %v1705_v52  ;;  %v521_v51 = vld [vmem:[%s2150_s26 + $0x318] sm:$0xff]  ;;  %v1680_v33 = vcombine.high %v474_v27, %v482_v28  ;;  %v490_v35 = vld [vmem:[%s2150_s26 + $0x220] sm:$0xff] }
  0x72   : > { %1202 = vmatprep.subr.bf16.mxu0 %v1720_v53  ;;  %1243 = vmatprep.subr.bf16.mxu1 %v1722_v54  ;;  %v529_v52 = vld [vmem:[%s2150_s26 + $0x358] sm:$0xff]  ;;  %v1707_v53 = vcombine.low %v504_v41, %v512_v42  ;;  %v1709_v54 = vcombine.low %v505_v43, %v513_v44  ;;  %v498_v36 = vld [vmem:[%s2150_s26 + $0x260] sm:$0xff] }
  0x73   : > { %v1726_v56 = vcombine.high %v521_v51, %v529_v52  ;;  %v1696_v41 = vcombine.high %v490_v35, %v498_v36  ;;  %v506_v43 = vld [vmem:[%s2150_s26 + $0x2a0] sm:$0xff] }
  0x74   : > { %v514_v44 = vld [vmem:[%s2150_s26 + $0x2e0] sm:$0xff] }
  0x75   : > { %1203 = vmatpush1.bf16.msra.mxu0 %v1719_v59  ;;  %1244 = vmatpush1.bf16.msra.mxu1 %v1721_v60  ;;  %v537_v59 = vld [vmem:[%s2150_s26 + $0x398] sm:$0xff] }
  0x76   : > { %1204 = vmatprep.subr.bf16.mxu0 %v1736_v61  ;;  %1245 = vmatprep.subr.bf16.mxu1 %v1738_v62  ;;  %v545_v60 = vld [vmem:[%s2150_s26 + $0x3d8] sm:$0xff]  ;;  %v1723_v61 = vcombine.low %v520_v49, %v528_v50  ;;  %v1725_v62 = vcombine.low %v521_v51, %v529_v52  ;;  %v1712_v49 = vcombine.high %v506_v43, %v514_v44  ;;  %v522_v51 = vld [vmem:[%s2150_s26 + $0x320] sm:$0xff] }
  0x77   : > { %v1742_v1 = vcombine.high %v537_v59, %v545_v60  ;;  %v530_v52 = vld [vmem:[%s2150_s26 + $0x360] sm:$0xff] }
  0x79   : > { %1205 = vmatpush1.bf16.msra.mxu0 %v1735_v4  ;;  %1246 = vmatpush1.bf16.msra.mxu1 %v1737_v5  ;;  %v427_v4 = vld [vmem:[%s2150_s26 + $0x28] sm:$0xff] }
  0x7a   : > { %1272 = vmatprep.subr.bf16.mxu0 %v1628_v6  ;;  %1313 = vmatprep.subr.bf16.mxu1 %v1630_v7  ;;  %v435_v5 = vld [vmem:[%s2150_s26 + $0x68] sm:$0xff]  ;;  %v1739_v6 = vcombine.low %v536_v57, %v544_v58  ;;  %v1741_v7 = vcombine.low %v537_v59, %v545_v60  ;;  %v1728_v57 = vcombine.high %v522_v51, %v530_v52  ;;  %v538_v59 = vld [vmem:[%s2150_s26 + $0x3a0] sm:$0xff] }
  0x7b   : > { %v1634_v9 = vcombine.high %v427_v4, %v435_v5  ;;  %v546_v60 = vld [vmem:[%s2150_s26 + $0x3e0] sm:$0xff] }
  0x7c   : > { %1223 = vmatmul.mubr.bf16.vlgmr.msra.gmra.mrb[0].mxu0 %v2195_v12  ;;  %1264 = vmatmul.mubr.bf16.vlgmr.msra.gmra.mrb[0].mxu1 %v2195_v12 }
  0x7d   : > { %1273 = vmatpush1.bf16.msra.mxu0 %v1627_v13  ;;  %1314 = vmatpush1.bf16.msra.mxu1 %v1629_v14  ;;  %v443_v13 = vld [vmem:[%s2150_s26 + $0xa8] sm:$0xff] }
  0x7e   : > { %1274 = vmatprep.subr.bf16.mxu0 %v1644_v15  ;;  %1315 = vmatprep.subr.bf16.mxu1 %v1646_v16  ;;  %v451_v14 = vld [vmem:[%s2150_s26 + $0xe8] sm:$0xff]  ;;  %v1631_v15 = vcombine.low %v426_v2, %v434_v3  ;;  %v1633_v16 = vcombine.low %v427_v4, %v435_v5  ;;  %v1744_v2 = vcombine.high %v538_v59, %v546_v60  ;;  %v428_v4 = vld [vmem:[%s2150_s26 + $0x30] sm:$0xff] }
  0x7f   : > { %1304 = vmatprep.mubr.bf16.mxu0 %v1835_v0  ;;  %1345 = vmatprep.mubr.bf16.mxu1 %v1835_v0  ;;  %v1650_v18 = vcombine.high %v443_v13, %v451_v14  ;;  %v436_v5 = vld [vmem:[%s2150_s26 + $0x70] sm:$0xff] }
  0x81   : > { %1275 = vmatpush1.bf16.msra.mxu0 %v1643_v21  ;;  %1316 = vmatpush1.bf16.msra.mxu1 %v1645_v22  ;;  %v459_v21 = vld [vmem:[%s2150_s26 + $0x128] sm:$0xff] }
  0x82   : > { %1276 = vmatprep.subr.bf16.mxu0 %v1660_v23  ;;  %1317 = vmatprep.subr.bf16.mxu1 %v1662_v24  ;;  %v467_v22 = vld [vmem:[%s2150_s26 + $0x168] sm:$0xff]  ;;  %v1647_v23 = vcombine.low %v442_v10, %v450_v11  ;;  %v1649_v24 = vcombine.low %v443_v13, %v451_v14  ;;  %v1636_v10 = vcombine.high %v428_v4, %v436_v5  ;;  %v444_v13 = vld [vmem:[%s2150_s26 + $0xb0] sm:$0xff] }
  0x83   : > { %v1666_v26 = vcombine.high %v459_v21, %v467_v22  ;;  %v452_v14 = vld [vmem:[%s2150_s26 + $0xf0] sm:$0xff] }
  0x85   : > { %1277 = vmatpush1.bf16.msra.mxu0 %v1659_v29  ;;  %1318 = vmatpush1.bf16.msra.mxu1 %v1661_v30  ;;  %v475_v29 = vld [vmem:[%s2150_s26 + $0x1a8] sm:$0xff] }
  0x86   : > { %1278 = vmatprep.subr.bf16.mxu0 %v1676_v31  ;;  %1319 = vmatprep.subr.bf16.mxu1 %v1678_v32  ;;  %v483_v30 = vld [vmem:[%s2150_s26 + $0x1e8] sm:$0xff]  ;;  %v1663_v31 = vcombine.low %v458_v19, %v466_v20  ;;  %v1665_v32 = vcombine.low %v459_v21, %v467_v22  ;;  %v1652_v19 = vcombine.high %v444_v13, %v452_v14  ;;  %v460_v21 = vld [vmem:[%s2150_s26 + $0x130] sm:$0xff] }
  0x87   : > { %v1682_v34 = vcombine.high %v475_v29, %v483_v30  ;;  %v468_v22 = vld [vmem:[%s2150_s26 + $0x170] sm:$0xff] }
  0x89   : > { %1279 = vmatpush1.bf16.msra.mxu0 %v1675_v37  ;;  %1320 = vmatpush1.bf16.msra.mxu1 %v1677_v38  ;;  %v491_v37 = vld [vmem:[%s2150_s26 + $0x228] sm:$0xff] }
  0x8a   : > { %1280 = vmatprep.subr.bf16.mxu0 %v1692_v39  ;;  %1321 = vmatprep.subr.bf16.mxu1 %v1694_v40  ;;  %v499_v38 = vld [vmem:[%s2150_s26 + $0x268] sm:$0xff]  ;;  %v1679_v39 = vcombine.low %v474_v27, %v482_v28  ;;  %v1681_v40 = vcombine.low %v475_v29, %v483_v30  ;;  %v1668_v27 = vcombine.high %v460_v21, %v468_v22  ;;  %v476_v29 = vld [vmem:[%s2150_s26 + $0x1b0] sm:$0xff] }
  0x8b   : > { %v1698_v42 = vcombine.high %v491_v37, %v499_v38  ;;  %v484_v30 = vld [vmem:[%s2150_s26 + $0x1f0] sm:$0xff] }
  0x8d   : > { %1281 = vmatpush1.bf16.msra.mxu0 %v1691_v45  ;;  %1322 = vmatpush1.bf16.msra.mxu1 %v1693_v46  ;;  %v507_v45 = vld [vmem:[%s2150_s26 + $0x2a8] sm:$0xff] }
  0x8e   : > { %1282 = vmatprep.subr.bf16.mxu0 %v1708_v47  ;;  %1323 = vmatprep.subr.bf16.mxu1 %v1710_v48  ;;  %v515_v46 = vld [vmem:[%s2150_s26 + $0x2e8] sm:$0xff]  ;;  %v1695_v47 = vcombine.low %v490_v35, %v498_v36  ;;  %v1697_v48 = vcombine.low %v491_v37, %v499_v38  ;;  %v1684_v35 = vcombine.high %v476_v29, %v484_v30  ;;  %v492_v37 = vld [vmem:[%s2150_s26 + $0x230] sm:$0xff] }
  0x8f   : > { %v1714_v50 = vcombine.high %v507_v45, %v515_v46  ;;  %v500_v38 = vld [vmem:[%s2150_s26 + $0x270] sm:$0xff] }
  0x91   : > { %1283 = vmatpush1.bf16.msra.mxu0 %v1707_v53  ;;  %1324 = vmatpush1.bf16.msra.mxu1 %v1709_v54  ;;  %v523_v53 = vld [vmem:[%s2150_s26 + $0x328] sm:$0xff] }
  0x92   : > { %1284 = vmatprep.subr.bf16.mxu0 %v1724_v55  ;;  %1325 = vmatprep.subr.bf16.mxu1 %v1726_v56  ;;  %v531_v54 = vld [vmem:[%s2150_s26 + $0x368] sm:$0xff]  ;;  %v1711_v55 = vcombine.low %v506_v43, %v514_v44  ;;  %v1713_v56 = vcombine.low %v507_v45, %v515_v46  ;;  %v508_v44 = vld [vmem:[%s2150_s26 + $0x2b0] sm:$0xff]  ;;  %v509_v46 = vld [vmem:[%s2150_s26 + $0x2b8] sm:$0xff] }
  0x93   : > { %v1730_v58 = vcombine.high %v523_v53, %v531_v54  ;;  %v516_v45 = vld [vmem:[%s2150_s26 + $0x2f0] sm:$0xff] }
  0x95   : > { %1285 = vmatpush1.bf16.msra.mxu0 %v1723_v61  ;;  %1326 = vmatpush1.bf16.msra.mxu1 %v1725_v62  ;;  %v539_v61 = vld [vmem:[%s2150_s26 + $0x3a8] sm:$0xff] }
  0x96   : > { %1286 = vmatprep.subr.bf16.mxu0 %v1740_v63  ;;  %1327 = vmatprep.subr.bf16.mxu1 %v1742_v1  ;;  %v547_v62 = vld [vmem:[%s2150_s26 + $0x3e8] sm:$0xff]  ;;  %v1727_v63 = vcombine.low %v522_v51, %v530_v52  ;;  %v1729_v1 = vcombine.low %v523_v53, %v531_v54  ;;  %v524_v52 = vld [vmem:[%s2150_s26 + $0x330] sm:$0xff]  ;;  %v525_v54 = vld [vmem:[%s2150_s26 + $0x338] sm:$0xff] }
  0x97   : > { %v1746_v3 = vcombine.high %v539_v61, %v547_v62  ;;  %v532_v53 = vld [vmem:[%s2150_s26 + $0x370] sm:$0xff] }
  0x99   : > { %1287 = vmatpush1.bf16.msra.mxu0 %v1739_v6  ;;  %1328 = vmatpush1.bf16.msra.mxu1 %v1741_v7  ;;  %v429_v6 = vld [vmem:[%s2150_s26 + $0x38] sm:$0xff] }
  0x9a   : > { %1354 = vmatprep.subr.bf16.mxu0 %v1632_v8  ;;  %1395 = vmatprep.subr.bf16.mxu1 %v1634_v9  ;;  %v437_v7 = vld [vmem:[%s2150_s26 + $0x78] sm:$0xff]  ;;  %v1743_v8 = vcombine.low %v538_v59, %v546_v60  ;;  %v1745_v9 = vcombine.low %v539_v61, %v547_v62  ;;  %v540_v60 = vld [vmem:[%s2150_s26 + $0x3b0] sm:$0xff] }
  0x9b   : > { %v1638_v11 = vcombine.high %v429_v6, %v437_v7  ;;  %v548_v61 = vld [vmem:[%s2150_s26 + $0x3f0] sm:$0xff]  ;;  %v541_v62 = vld [vmem:[%s2150_s26 + $0x3b8] sm:$0xff] }
  0x9c   : > { %1305 = vmatmul.mubr.bf16.vlgmr.msra.gmra.mrb[4].mxu0 %v2195_v12  ;;  %1346 = vmatmul.mubr.bf16.vlgmr.msra.gmra.mrb[4].mxu1 %v2195_v12 }
  0x9d   : > { %1355 = vmatpush1.bf16.msra.mxu0 %v1631_v15  ;;  %1396 = vmatpush1.bf16.msra.mxu1 %v1633_v16  ;;  %v445_v15 = vld [vmem:[%s2150_s26 + $0xb8] sm:$0xff] }
  0x9e   : > { %1356 = vmatprep.subr.bf16.mxu0 %v1648_v17  ;;  %1397 = vmatprep.subr.bf16.mxu1 %v1650_v18  ;;  %v453_v16 = vld [vmem:[%s2150_s26 + $0xf8] sm:$0xff]  ;;  %v1635_v17 = vcombine.low %v428_v4, %v436_v5  ;;  %v1637_v18 = vcombine.low %v429_v6, %v437_v7  ;;  %v1747_v5 = vcombine.low %v540_v60, %v548_v61 }
  0x9f   : > { %1386 = vmatprep.mubr.bf16.mxu0 %v1835_v0  ;;  %1427 = vmatprep.mubr.bf16.mxu1 %v1835_v0  ;;  %v1654_v20 = vcombine.high %v445_v15, %v453_v16 }
  0xa1   : > { %1357 = vmatpush1.bf16.msra.mxu0 %v1647_v23  ;;  %1398 = vmatpush1.bf16.msra.mxu1 %v1649_v24  ;;  %v461_v23 = vld [vmem:[%s2150_s26 + $0x138] sm:$0xff] }
  0xa2   : > { %1358 = vmatprep.subr.bf16.mxu0 %v1664_v25  ;;  %1399 = vmatprep.subr.bf16.mxu1 %v1666_v26  ;;  %v469_v24 = vld [vmem:[%s2150_s26 + $0x178] sm:$0xff]  ;;  %v1651_v25 = vcombine.low %v444_v13, %v452_v14  ;;  %v1653_v26 = vcombine.low %v445_v15, %v453_v16 }
  0xa3   : > { %v1670_v28 = vcombine.high %v461_v23, %v469_v24 }
  0xa5   : > { %1359 = vmatpush1.bf16.msra.mxu0 %v1663_v31  ;;  %1400 = vmatpush1.bf16.msra.mxu1 %v1665_v32  ;;  %v477_v31 = vld [vmem:[%s2150_s26 + $0x1b8] sm:$0xff] }
  0xa6   : > { %1360 = vmatprep.subr.bf16.mxu0 %v1680_v33  ;;  %1401 = vmatprep.subr.bf16.mxu1 %v1682_v34  ;;  %v485_v32 = vld [vmem:[%s2150_s26 + $0x1f8] sm:$0xff]  ;;  %v1667_v33 = vcombine.low %v460_v21, %v468_v22  ;;  %v1669_v34 = vcombine.low %v461_v23, %v469_v24 }
  0xa7   : > { %v1686_v36 = vcombine.high %v477_v31, %v485_v32 }
  0xa9   : > { %1361 = vmatpush1.bf16.msra.mxu0 %v1679_v39  ;;  %1402 = vmatpush1.bf16.msra.mxu1 %v1681_v40  ;;  %v493_v39 = vld [vmem:[%s2150_s26 + $0x238] sm:$0xff] }
  0xaa   : > { %1362 = vmatprep.subr.bf16.mxu0 %v1696_v41  ;;  %1403 = vmatprep.subr.bf16.mxu1 %v1698_v42  ;;  %v501_v40 = vld [vmem:[%s2150_s26 + $0x278] sm:$0xff]  ;;  %v1683_v41 = vcombine.low %v476_v29, %v484_v30  ;;  %v1700_v42 = vcombine.high %v492_v37, %v500_v38 }
  0xab   : > { %v1702_v43 = vcombine.high %v493_v39, %v501_v40 }
  0xad   : > { %1363 = vmatpush1.bf16.msra.mxu0 %v1695_v47  ;;  %1404 = vmatpush1.bf16.msra.mxu1 %v1697_v48  ;;  %v517_v47 = vld [vmem:[%s2150_s26 + $0x2f8] sm:$0xff]  ;;  %v1699_v48 = vcombine.low %v492_v37, %v500_v38 }
  0xae   : > { %1364 = vmatprep.subr.bf16.mxu0 %v1712_v49  ;;  %1405 = vmatprep.subr.bf16.mxu1 %v1714_v50  ;;  %v1701_v49 = vcombine.low %v493_v39, %v501_v40  ;;  %v1716_v50 = vcombine.high %v508_v44, %v516_v45  ;;  %v1718_v51 = vcombine.high %v509_v46, %v517_v47 }
  0xb1   : > { %1365 = vmatpush1.bf16.msra.mxu0 %v1711_v55  ;;  %1406 = vmatpush1.bf16.msra.mxu1 %v1713_v56  ;;  %v533_v55 = vld [vmem:[%s2150_s26 + $0x378] sm:$0xff]  ;;  %v1715_v56 = vcombine.low %v508_v44, %v516_v45 }
  0xb2   : > { %1366 = vmatprep.subr.bf16.mxu0 %v1728_v57  ;;  %1407 = vmatprep.subr.bf16.mxu1 %v1730_v58  ;;  %v1717_v57 = vcombine.low %v509_v46, %v517_v47  ;;  %v1732_v58 = vcombine.high %v524_v52, %v532_v53  ;;  %v1734_v59 = vcombine.high %v525_v54, %v533_v55 }
  0xb5   : > { %1367 = vmatpush1.bf16.msra.mxu0 %v1727_v63  ;;  %1408 = vmatpush1.bf16.msra.mxu1 %v1729_v1  ;;  %v549_v63 = vld [vmem:[%s2150_s26 + $0x3f8] sm:$0xff]  ;;  %v1731_v1 = vcombine.low %v524_v52, %v532_v53 }
  0xb6   : > { %1368 = vmatprep.subr.bf16.mxu0 %v1744_v2  ;;  %1409 = vmatprep.subr.bf16.mxu1 %v1746_v3  ;;  %v1733_v2 = vcombine.low %v525_v54, %v533_v55  ;;  %v1748_v3 = vcombine.high %v540_v60, %v548_v61  ;;  %v1750_v4 = vcombine.high %v541_v62, %v549_v63 }
  0xb7   : > { %v1749_v6 = vcombine.low %v541_v62, %v549_v63 }
  0xb9   : > { %1369 = vmatpush1.bf16.msra.mxu0 %v1743_v8  ;;  %1410 = vmatpush1.bf16.msra.mxu1 %v1745_v9 }
  0xba   : > { %1436 = vmatprep.subr.bf16.mxu0 %v1636_v10  ;;  %1477 = vmatprep.subr.bf16.mxu1 %v1638_v11 }
  0xbc   : > { %1387 = vmatmul.mubr.bf16.vlgmr.msra.gmra.mrb[8].mxu0 %v2195_v12  ;;  %1428 = vmatmul.mubr.bf16.vlgmr.msra.gmra.mrb[8].mxu1 %v2195_v12 }
  0xbd   : > { %1437 = vmatpush1.bf16.msra.mxu0 %v1635_v17  ;;  %1478 = vmatpush1.bf16.msra.mxu1 %v1637_v18 }
  0xbe   : > { %1438 = vmatprep.subr.bf16.mxu0 %v1652_v19  ;;  %1479 = vmatprep.subr.bf16.mxu1 %v1654_v20 }
  0xbf   : > { %1468 = vmatprep.mubr.bf16.mxu0 %v1835_v0  ;;  %1509 = vmatprep.mubr.bf16.mxu1 %v1835_v0  ;;  %v1685_v0 = vcombine.low %v477_v31, %v485_v32 }
  0xc1   : > { %1439 = vmatpush1.bf16.msra.mxu0 %v1651_v25  ;;  %1480 = vmatpush1.bf16.msra.mxu1 %v1653_v26 }
  0xc2   : > { %1440 = vmatprep.subr.bf16.mxu0 %v1668_v27  ;;  %1481 = vmatprep.subr.bf16.mxu1 %v1670_v28 }
  0xc5   : > { %1441 = vmatpush1.bf16.msra.mxu0 %v1667_v33  ;;  %1482 = vmatpush1.bf16.msra.mxu1 %v1669_v34 }
  0xc6   : > { %1442 = vmatprep.subr.bf16.mxu0 %v1684_v35  ;;  %1483 = vmatprep.subr.bf16.mxu1 %v1686_v36 }
  0xc9   : > { %1443 = vmatpush1.bf16.msra.mxu0 %v1683_v41  ;;  %1484 = vmatpush1.bf16.msra.mxu1 %v1685_v0 }
  0xca   : > { %1444 = vmatprep.subr.bf16.mxu0 %v1700_v42  ;;  %1485 = vmatprep.subr.bf16.mxu1 %v1702_v43 }
  0xcd   : > { %1445 = vmatpush1.bf16.msra.mxu0 %v1699_v48  ;;  %1486 = vmatpush1.bf16.msra.mxu1 %v1701_v49 }
  0xce   : > { %1446 = vmatprep.subr.bf16.mxu0 %v1716_v50  ;;  %1487 = vmatprep.subr.bf16.mxu1 %v1718_v51 }
  0xd1   : > { %1447 = vmatpush1.bf16.msra.mxu0 %v1715_v56  ;;  %1488 = vmatpush1.bf16.msra.mxu1 %v1717_v57 }
  0xd2   : > { %1448 = vmatprep.subr.bf16.mxu0 %v1732_v58  ;;  %1489 = vmatprep.subr.bf16.mxu1 %v1734_v59 }
  0xd5   : > { %1449 = vmatpush1.bf16.msra.mxu0 %v1731_v1  ;;  %1490 = vmatpush1.bf16.msra.mxu1 %v1733_v2 }
  0xd6   : > { %1450 = vmatprep.subr.bf16.mxu0 %v1748_v3  ;;  %1491 = vmatprep.subr.bf16.mxu1 %v1750_v4 }
  0xd9   : > { %1451 = vmatpush1.bf16.msra.mxu0 %v1747_v5  ;;  %1492 = vmatpush1.bf16.msra.mxu1 %v1749_v6 }
  0xdc   : > { %1469 = vmatmul.mubr.bf16.vlgmr.msra.gmra.mrb[12].mxu0 %v2195_v12  ;;  %1510 = vmatmul.mubr.bf16.vlgmr.msra.gmra.mrb[12].mxu1 %v2195_v12 }
 0x14f   : > { %v1224_v7 = vpop.f32.mrb[0].mxu0  ;;  %v1265_v8 = vpop.f32.mrb[0].mxu1 }
 0x150   : > { %1779 = vtanh.f32 %v1224_v7  ;;  %v1226_v9 = vpop.f32.mrb[1].mxu0  ;;  %v1267_v10 = vpop.f32.mrb[1].mxu1 }
 0x151   : > { %1781 = vtanh.f32 %v1265_v8  ;;  %v1228_v11 = vpop.f32.mrb[2].mxu0  ;;  %v1269_v13 = vpop.f32.mrb[2].mxu1 }
 0x152   : > { %1783 = vtanh.f32 %v1226_v9  ;;  %v1229_v14 = vpop.f32.mrb[3].mxu0  ;;  %v1270_v15 = vpop.f32.mrb[3].mxu1 }
 0x153   : > { %1785 = vtanh.f32 %v1267_v10 }
 0x15a   : > { %v1780_v12 = vpop.eup %1779 }
 0x15b   : > { %v1782_v16 = vpop.eup %1781  ;;  %1534 = vst [vmem:[%s2304_s5] sm:$0xff] %v1780_v12 }
 0x15c   : > { %v1784_v17 = vpop.eup %1783  ;;  %1536 = vst [vmem:[%s2304_s5 + $0x10] sm:$0xff] %v1782_v16 }
 0x15d   : > { %v1786_v18 = vpop.eup %1785  ;;  %1535 = vst [vmem:[%s2304_s5 + $0x8] sm:$0xff] %v1784_v17 }
 0x15e   : > { %1537 = vst [vmem:[%s2304_s5 + $0x18] sm:$0xff] %v1786_v18 }
 0x16f   : > { %v1306_v19 = vpop.f32.mrb[4].mxu0  ;;  %v1347_v20 = vpop.f32.mrb[4].mxu1 }
 0x170   : > { %1787 = vtanh.f32 %v1306_v19  ;;  %v1308_v21 = vpop.f32.mrb[5].mxu0  ;;  %v1349_v22 = vpop.f32.mrb[5].mxu1 }
 0x171   : > { %1789 = vtanh.f32 %v1347_v20  ;;  %v1310_v23 = vpop.f32.mrb[6].mxu0  ;;  %v1351_v24 = vpop.f32.mrb[6].mxu1 }
 0x172   : > { %1791 = vtanh.f32 %v1308_v21  ;;  %v1311_v25 = vpop.f32.mrb[7].mxu0  ;;  %v1352_v26 = vpop.f32.mrb[7].mxu1 }
 0x173   : > { %1793 = vtanh.f32 %v1349_v22 }
 0x17a   : > { %v1788_v27 = vpop.eup %1787 }
 0x17b   : > { %v1790_v28 = vpop.eup %1789  ;;  %1538 = vst [vmem:[%s2304_s5 + $0x20] sm:$0xff] %v1788_v27 }
 0x17c   : > { %v1792_v29 = vpop.eup %1791  ;;  %1540 = vst [vmem:[%s2304_s5 + $0x30] sm:$0xff] %v1790_v28 }
 0x17d   : > { %v1794_v30 = vpop.eup %1793  ;;  %1539 = vst [vmem:[%s2304_s5 + $0x28] sm:$0xff] %v1792_v29 }
 0x17e   : > { %1541 = vst [vmem:[%s2304_s5 + $0x38] sm:$0xff] %v1794_v30 }
 0x18f   : > { %v1388_v31 = vpop.f32.mrb[8].mxu0  ;;  %v1429_v32 = vpop.f32.mrb[8].mxu1 }
 0x190   : > { %1795 = vtanh.f32 %v1388_v31  ;;  %v1390_v33 = vpop.f32.mrb[9].mxu0  ;;  %v1431_v34 = vpop.f32.mrb[9].mxu1 }
 0x191   : > { %1797 = vtanh.f32 %v1429_v32  ;;  %v1392_v35 = vpop.f32.mrb[10].mxu0  ;;  %v1433_v36 = vpop.f32.mrb[10].mxu1 }
 0x192   : > { %1799 = vtanh.f32 %v1390_v33  ;;  %v1393_v37 = vpop.f32.mrb[11].mxu0  ;;  %v1434_v38 = vpop.f32.mrb[11].mxu1 }
 0x193   : > { %1801 = vtanh.f32 %v1431_v34 }
 0x19a   : > { %v1796_v39 = vpop.eup %1795 }
 0x19b   : > { %v1798_v40 = vpop.eup %1797  ;;  %1542 = vst [vmem:[%s2304_s5 + $0x40] sm:$0xff] %v1796_v39 }
 0x19c   : > { %v1800_v41 = vpop.eup %1799  ;;  %1544 = vst [vmem:[%s2304_s5 + $0x50] sm:$0xff] %v1798_v40 }
 0x19d   : > { %v1802_v0 = vpop.eup %1801  ;;  %1543 = vst [vmem:[%s2304_s5 + $0x48] sm:$0xff] %v1800_v41 }
 0x19e   : > { %1545 = vst [vmem:[%s2304_s5 + $0x58] sm:$0xff] %v1802_v0 }
 0x1af   : > { %v1470_v42 = vpop.f32.mrb[12].mxu0  ;;  %v1511_v43 = vpop.f32.mrb[12].mxu1 }
 0x1b0   : > { %1803 = vtanh.f32 %v1470_v42  ;;  %v1472_v44 = vpop.f32.mrb[13].mxu0  ;;  %v1513_v45 = vpop.f32.mrb[13].mxu1 }
 0x1b1   : > { %1805 = vtanh.f32 %v1511_v43  ;;  %v1474_v46 = vpop.f32.mrb[14].mxu0  ;;  %v1515_v47 = vpop.f32.mrb[14].mxu1 }
 0x1b2   : > { %1807 = vtanh.f32 %v1472_v44  ;;  %v1475_v48 = vpop.f32.mrb[15].mxu0  ;;  %v1516_v49 = vpop.f32.mrb[15].mxu1 }
 0x1b3   : > { %1809 = vtanh.f32 %v1513_v45 }
 0x1ba   : > { %v1804_v50 = vpop.eup %1803 }
 0x1bb   : > { %v1806_v51 = vpop.eup %1805  ;;  %1546 = vst [vmem:[%s2304_s5 + $0x60] sm:$0xff] %v1804_v50 }
 0x1bc   : > { %v1808_v52 = vpop.eup %1807  ;;  %1548 = vst [vmem:[%s2304_s5 + $0x70] sm:$0xff] %v1806_v51 }
 0x1bd   : > { %v1810_v53 = vpop.eup %1809  ;;  %1547 = vst [vmem:[%s2304_s5 + $0x68] sm:$0xff] %v1808_v52 }
 0x1be   : > { %1549 = vst [vmem:[%s2304_s5 + $0x78] sm:$0xff] %v1810_v53 }
 0x1bf PF: > { %p9_p9 = scmp.ge.s32.totalorder %s1868_s13, 6   ;;  %s2335_s9 = smov %s1829_s10 }
 0x1c0   : > { %s2336_s10 = smov %s1877_s16  ;;  %s2337_s11 = smov %s1868_s13 }
 0x1c1   :  { %11 = sbr.rel (!%p9_p9) target bundleno = 2 (0x2), region = 86 }

</bundles_post_ra>
